<compile_context>
chip_gen: v7x
topology: tpu7x:2x2x1
jax: 0.10.0
libtpu: 0.0.40
codegen_flags: <defaults>
</compile_context>

<pallas_src>
import functools

import jax
import jax.numpy as jnp
from jax.experimental import pallas as pl
from jax.experimental.pallas import tpu as pltpu

_VMEM = pltpu.MemorySpace.VMEM
_SMEM = pltpu.MemorySpace.SMEM


def _vspec():
    return pl.BlockSpec(memory_space=_VMEM)


def _sspec():
    return pl.BlockSpec(memory_space=_SMEM)


def _fuse_first(n_inputs):
    # Allow XLA to fuse the (im2col / flatten / cast) producer of input 0
    # into the kernel's input instead of materializing it in HBM.
    return pltpu.CompilerParams(allow_input_fusion=[True] + [False] * (n_inputs - 1))


# ----------------------------------------------------------------------------
# Pallas kernels
# ----------------------------------------------------------------------------

def _conv_sa_kernel(p_ref, w_ref, b_ref, wqkv_ref, bqkv_ref, g_ref, o_ref,
                    *, B, HW, C, C8):
    """Fused (conv-as-matmul + bias + ReLU) -> SelfAttention for one stage.

    p_ref:    (B*HW, K)            bf16   im2col patches
    w_ref:    (K, C)               bf16   conv weight (khkw,ic -> oc ordering)
    b_ref:    (1, C)               f32    conv bias
    wqkv_ref: (C, 2*C8 + C)        bf16   fused q|k|v 1x1-conv weights
    bqkv_ref: (1, 2*C8 + C)        f32    fused q|k|v biases
    g_ref:    (1,)                 f32    gamma (SMEM scalar)
    o_ref:    (B*HW, C)            f32    stage output, row order (b, h, w)
    """
    # Conv: bf16 MXU operands, f32 accumulation, f32 element-wise.
    h = jnp.dot(p_ref[...], w_ref[...], preferred_element_type=jnp.float32)
    h = jnp.maximum(h + b_ref[...], 0.0)                       # (B*HW, C) f32

    # Single wide q|k|v projection (one MXU pass instead of three narrow ones).
    qkv = jnp.dot(h.astype(jnp.bfloat16), wqkv_ref[...],
                  preferred_element_type=jnp.float32) + bqkv_ref[...]

    gamma = g_ref[0]
    for bi in range(B):                                        # B tiny & static
        lo = bi * HW                                           # static slices
        hb = h[lo:lo + HW, :]                                  # (HW, C)
        q = qkv[lo:lo + HW, 0:C8]                              # (HW, C8)
        k = qkv[lo:lo + HW, C8:2 * C8]                         # (HW, C8)
        v = qkv[lo:lo + HW, 2 * C8:2 * C8 + C]                 # (HW, C)
        # attention[i, j] = softmax_j(q_i . k_j); out = attention @ V
        s = jnp.dot(q, k.T, preferred_element_type=jnp.float32)  # (HW, HW)
        s = s - jnp.max(s, axis=-1, keepdims=True)
        e = jnp.exp(s)
        probs = e * pl.reciprocal(jnp.sum(e, axis=-1, keepdims=True), approx=True)
        attn = jnp.dot(probs, v, preferred_element_type=jnp.float32)  # (HW, C)
        o_ref[lo:lo + HW, :] = gamma * attn + hb


def _latent_kernel(x_ref, wml_ref, bml_ref, eps_ref, wd_ref, bd_ref,
                   mu_ref, lv_ref, d_ref, *, L):
    """Fused fc_mu | fc_logvar (concatenated) + reparameterize + decoder_input.

    x_ref:   (B, F)      bf16 flattened encoder output (NCHW order)
    wml_ref: (F, 2L)     bf16 concat(fc_mu_w.T, fc_logvar_w.T)
    bml_ref: (1, 2L)     f32
    eps_ref: (B, L)      f32
    wd_ref:  (L, F)      bf16 decoder_input weight.T
    bd_ref:  (1, F)      f32
    """
    ml = jnp.dot(x_ref[...], wml_ref[...],
                 preferred_element_type=jnp.float32) + bml_ref[...]   # (B, 2L)
    mu = ml[:, 0:L]
    lv = ml[:, L:2 * L]
    z = mu + eps_ref[...] * jnp.exp(0.5 * lv)                          # f32
    d = jnp.dot(z.astype(jnp.bfloat16), wd_ref[...],
                preferred_element_type=jnp.float32) + bd_ref[...]      # (B, F)
    mu_ref[...] = mu
    lv_ref[...] = lv
    d_ref[...] = d


def _conv_matmul_kernel(p_ref, w_ref, b_ref, o_ref, *, act):
    """o = act(patches @ w + b).  bf16 MXU operands, f32 accumulate."""
    y = jnp.dot(p_ref[...], w_ref[...], preferred_element_type=jnp.float32)
    y = y + b_ref[...]
    if act == "relu":
        y = jnp.maximum(y, 0.0)
    elif act == "tanh":
        y = jnp.tanh(y)
    o_ref[...] = y


def _convT_out_kernel(pT_ref, w_ref, b_ref, o_ref):
    """Final OC=1 transposed conv, computed transposed for a lane-dense output.

    pT_ref: (K, M) bf16 transposed patches; w_ref: (1, K) bf16; b_ref: (1,) SMEM.
    o_ref:  (1, M) f32  -> tanh(w_row @ patches^T + b)
    """
    y = jnp.dot(w_ref[...], pT_ref[...], preferred_element_type=jnp.float32)
    o_ref[...] = jnp.tanh(y + b_ref[0])


# ----------------------------------------------------------------------------
# Conv lowering glue (im2col) — plain JAX, fusible into the kernel input DMA
# ----------------------------------------------------------------------------

def _im2col(x, kh, kw, stride, pad):
    """x: (B, H, W, C) -> patches (B*Ho*Wo, kh*kw*C) in (i, j, c) order."""
    B, H, W, C = x.shape
    xp = jnp.pad(x, ((0, 0), (pad, pad), (pad, pad), (0, 0)))
    Hp, Wp = H + 2 * pad, W + 2 * pad
    Ho = (Hp - kh) // stride + 1
    Wo = (Wp - kw) // stride + 1
    cols = []
    for i in range(kh):
        for j in range(kw):
            cols.append(xp[:, i:i + (Ho - 1) * stride + 1:stride,
                           j:j + (Wo - 1) * stride + 1:stride, :])
    patches = jnp.stack(cols, axis=3)            # (B, Ho, Wo, kh*kw, C)
    return patches.reshape(B * Ho * Wo, kh * kw * C), Ho, Wo


def _deconv_patches(x, k, stride, pad):
    """Zero-insert (stride dilation) + im2col for ConvTranspose2d lowering."""
    B, H, W, C = x.shape
    xd = jnp.zeros((B, (H - 1) * stride + 1, (W - 1) * stride + 1, C), x.dtype)
    xd = xd.at[:, ::stride, ::stride, :].set(x)
    return _im2col(xd, k, k, 1, k - 1 - pad)


# ----------------------------------------------------------------------------
# Stage wrappers (one pallas_call each)
# ----------------------------------------------------------------------------

def encoder_stage(x_nhwc, sp):
    """Fused Conv2d(k=4,s=2,p=1) + ReLU + SelfAttention."""
    B = x_nhwc.shape[0]
    patches, Ho, Wo = _im2col(x_nhwc, 4, 4, 2, 1)
    HW = Ho * Wo
    C = sp["w"].shape[1]
    C8 = C // 8
    out = pl.pallas_call(
        functools.partial(_conv_sa_kernel, B=B, HW=HW, C=C, C8=C8),
        out_shape=jax.ShapeDtypeStruct((B * HW, C), jnp.float32),
        in_specs=[_vspec(), _vspec(), _vspec(), _vspec(), _vspec(), _sspec()],
        out_specs=_vspec(),
        compiler_params=_fuse_first(6),
    )(patches.astype(jnp.bfloat16), sp["w"], sp["b"],
      sp["wqkv"], sp["bqkv"], sp["gamma"])
    return out.reshape(B, Ho, Wo, C)


def latent_block(flat, eps, lp, L):
    """Fused fc_mu + fc_logvar + reparameterize + decoder_input."""
    B, F = flat.shape
    mu, lv, d = pl.pallas_call(
        functools.partial(_latent_kernel, L=L),
        out_shape=(jax.ShapeDtypeStruct((B, L), jnp.float32),
                   jax.ShapeDtypeStruct((B, L), jnp.float32),
                   jax.ShapeDtypeStruct((B, F), jnp.float32)),
        in_specs=[_vspec()] * 6,
        out_specs=(_vspec(), _vspec(), _vspec()),
        compiler_params=_fuse_first(6),
    )(flat.astype(jnp.bfloat16), lp["wml"], lp["bml"], eps, lp["wd"], lp["bd"])
    return mu, lv, d


def conv_transpose_stage(x, sp, act):
    """ConvTranspose2d(k=4,s=2,p=1) + activation via zero-insert + im2col."""
    B = x.shape[0]
    patches, Ho, Wo = _deconv_patches(x, 4, 2, 1)
    OC = sp["w"].shape[1]
    y = pl.pallas_call(
        functools.partial(_conv_matmul_kernel, act=act),
        out_shape=jax.ShapeDtypeStruct((patches.shape[0], OC), jnp.float32),
        in_specs=[_vspec(), _vspec(), _vspec()],
        out_specs=_vspec(),
        compiler_params=_fuse_first(3),
    )(patches.astype(jnp.bfloat16), sp["w"], sp["b"])
    return y.reshape(B, Ho, Wo, OC)


def conv_transpose_out(x, sp):
    """Final ConvTranspose2d(32->1,k=4,s=2,p=1) + Tanh, lane-dense output."""
    B = x.shape[0]
    patches, Ho, Wo = _deconv_patches(x, 4, 2, 1)     # (M, K), M = B*Ho*Wo
    M = patches.shape[0]
    y = pl.pallas_call(
        _convT_out_kernel,
        out_shape=jax.ShapeDtypeStruct((1, M), jnp.float32),
        in_specs=[_vspec(), _vspec(), _sspec()],
        out_specs=_vspec(),
        compiler_params=_fuse_first(3),
    )(patches.T.astype(jnp.bfloat16), sp["w_row"], sp["b"])
    # (1, B*Ho*Wo) -> (B, 1, Ho, Wo)  NCHW
    return y.reshape(B, Ho, Wo)[:, None, :, :]


# ----------------------------------------------------------------------------
# Parameter init (deterministic, synthetic) + one-time layout preparation
# ----------------------------------------------------------------------------

def init_params(key, latent_dim, img_size):
    s8 = img_size // 8
    flat = 128 * s8 * s8
    keys = iter(jax.random.split(key, 64))

    def w(shape, scale=0.05):
        return jax.random.normal(next(keys), shape, jnp.float32) * scale

    def sa(C):
        return dict(wq=w((C // 8, C, 1, 1)), bq=w((C // 8,)),
                    wk=w((C // 8, C, 1, 1)), bk=w((C // 8,)),
                    wv=w((C, C, 1, 1)), bv=w((C,)),
                    gamma=jnp.zeros((1,), jnp.float32))   # torch.zeros(1) init

    p = {}
    p["enc1_w"], p["enc1_b"] = w((32, 1, 4, 4)), w((32,))
    p["sa1"] = sa(32)
    p["enc2_w"], p["enc2_b"] = w((64, 32, 4, 4)), w((64,))
    p["sa2"] = sa(64)
    p["enc3_w"], p["enc3_b"] = w((128, 64, 4, 4)), w((128,))
    p["sa3"] = sa(128)
    p["fc_mu_w"], p["fc_mu_b"] = w((latent_dim, flat)), w((latent_dim,))
    p["fc_lv_w"], p["fc_lv_b"] = w((latent_dim, flat)), w((latent_dim,))
    p["dec_in_w"], p["dec_in_b"] = w((flat, latent_dim)), w((flat,))
    p["dec1_w"], p["dec1_b"] = w((128, 64, 4, 4)), w((64,))
    p["dec2_w"], p["dec2_b"] = w((64, 32, 4, 4)), w((32,))
    p["dec3_w"], p["dec3_b"] = w((32, 1, 4, 4)), w((1,))
    return p


def prepare_params(p):
    """All weight layout transforms / concatenations / bf16 casts, done once."""

    def conv_w_mat(w):                       # Conv2d (OC, IC, KH, KW) -> (K, OC)
        OC, IC, KH, KW = w.shape
        return jnp.transpose(w, (2, 3, 1, 0)).reshape(KH * KW * IC, OC).astype(jnp.bfloat16)

    def convT_w_mat(w):                      # ConvTranspose2d (IC, OC, KH, KW) -> (K, OC)
        IC, OC, KH, KW = w.shape
        wf = jnp.flip(w, axis=(2, 3))
        return jnp.transpose(wf, (2, 3, 0, 1)).reshape(KH * KW * IC, OC).astype(jnp.bfloat16)

    def sa_pack(sa, C):
        C8 = C // 8
        wq = sa["wq"].reshape(C8, C).T
        wk = sa["wk"].reshape(C8, C).T
        wv = sa["wv"].reshape(C, C).T
        wqkv = jnp.concatenate([wq, wk, wv], axis=1).astype(jnp.bfloat16)   # (C, 2*C8+C)
        bqkv = jnp.concatenate([sa["bq"], sa["bk"], sa["bv"]]).reshape(1, 2 * C8 + C).astype(jnp.float32)
        gamma = sa["gamma"].reshape(1).astype(jnp.float32)
        return wqkv, bqkv, gamma

    q = {}
    for idx, (wn, bn, sn, C) in enumerate(
            [("enc1_w", "enc1_b", "sa1", 32),
             ("enc2_w", "enc2_b", "sa2", 64),
             ("enc3_w", "enc3_b", "sa3", 128)], start=1):
        wqkv, bqkv, gamma = sa_pack(p[sn], C)
        q[f"stage{idx}"] = dict(w=conv_w_mat(p[wn]),
                                b=p[bn].reshape(1, -1).astype(jnp.float32),
                                wqkv=wqkv, bqkv=bqkv, gamma=gamma)

    # fc_mu | fc_logvar concatenated along N; decoder_input transposed.
    wml = jnp.concatenate([p["fc_mu_w"].T, p["fc_lv_w"].T], axis=1).astype(jnp.bfloat16)
    bml = jnp.concatenate([p["fc_mu_b"], p["fc_lv_b"]]).reshape(1, -1).astype(jnp.float32)
    q["latent"] = dict(wml=wml, bml=bml,
                       wd=p["dec_in_w"].T.astype(jnp.bfloat16),
                       bd=p["dec_in_b"].reshape(1, -1).astype(jnp.float32))

    q["dec1"] = dict(w=convT_w_mat(p["dec1_w"]),
                     b=p["dec1_b"].reshape(1, -1).astype(jnp.float32))
    q["dec2"] = dict(w=convT_w_mat(p["dec2_w"]),
                     b=p["dec2_b"].reshape(1, -1).astype(jnp.float32))
    w3 = convT_w_mat(p["dec3_w"])                               # (K, 1)
    q["dec3"] = dict(w_row=w3.T,                                # (1, K) bf16
                     b=p["dec3_b"].reshape(1).astype(jnp.float32))
    return q


# ----------------------------------------------------------------------------
# Forward pass (same semantics as VAE.forward)
# ----------------------------------------------------------------------------

def vae_forward(x_nchw, qp, eps_key, *, img_size, latent_dim):
    """Returns (recon NCHW, mu, logvar)."""
    B = x_nchw.shape[0]
    s8 = img_size // 8

    # ---- encoder (3 fused conv+ReLU+SelfAttention stages) ----
    x = jnp.transpose(x_nchw, (0, 2, 3, 1)).astype(jnp.float32)    # NHWC
    h = encoder_stage(x, qp["stage1"])                             # (B, 8, 8, 32)
    h = encoder_stage(h, qp["stage2"])                             # (B, 4, 4, 64)
    h = encoder_stage(h, qp["stage3"])                             # (B, 2, 2, 128)

    # nn.Flatten flattens NCHW order
    flat = jnp.transpose(h, (0, 3, 1, 2)).reshape(B, -1)           # (B, 128*s8*s8)

    # ---- fused fc_mu / fc_logvar / reparameterize / decoder_input ----
    eps = jax.random.normal(eps_key, (B, latent_dim), jnp.float32)
    mu, logvar, d = latent_block(flat, eps, qp["latent"], latent_dim)

    # ---- decoder ----
    d = d.reshape(B, 128, s8, s8)                                  # NCHW view
    d = jnp.transpose(d, (0, 2, 3, 1))                             # NHWC
    d = conv_transpose_stage(d, qp["dec1"], act="relu")            # (B, 4, 4, 64)
    d = conv_transpose_stage(d, qp["dec2"], act="relu")            # (B, 8, 8, 32)
    recon = conv_transpose_out(d, qp["dec3"])                      # (B, 1, 16, 16)
    return recon, mu, logvar


# ----------------------------------------------------------------------------
# Main
# ----------------------------------------------------------------------------

if __name__ == "__main__":
    latent_dim = 8
    img_size = 16
    batch = 2

    root = jax.random.PRNGKey(0)
    k_param, k_input, k_eps = jax.random.split(root, 3)

    params = init_params(k_param, latent_dim, img_size)
    qparams = prepare_params(params)        # one-time layout prep (hoisted)
    x = jax.random.normal(k_input, (batch, 1, img_size, img_size), jnp.float32)

    fwd = jax.jit(functools.partial(vae_forward, img_size=img_size,
                                    latent_dim=latent_dim))
    recon, mu, logvar = fwd(x, qparams, k_eps)
    jax.block_until_ready((recon, mu, logvar))

    assert recon.shape == (batch, 1, img_size, img_size), recon.shape
    assert mu.shape == (batch, latent_dim), mu.shape
    assert logvar.shape == (batch, latent_dim), logvar.shape
    assert bool(jnp.all(jnp.isfinite(recon)))
    assert bool(jnp.all(jnp.isfinite(mu))) and bool(jnp.all(jnp.isfinite(logvar)))
    print("KERNEL_OK")
</pallas_src>

<mosaic_0001>
module attributes {stable_mosaic.version = 11 : i64} {
  func.func @_conv_sa_kernel(%arg0: memref<128x16xbf16, #tpu.memory_space<vmem>>, %arg1: memref<16x32xbf16, #tpu.memory_space<vmem>>, %arg2: memref<1x32xf32, #tpu.memory_space<vmem>>, %arg3: memref<32x40xbf16, #tpu.memory_space<vmem>>, %arg4: memref<1x40xf32, #tpu.memory_space<vmem>>, %arg5: memref<1xf32, #tpu.memory_space<smem>>, %arg6: memref<128x32xf32, #tpu.memory_space<vmem>>) attributes {dimension_semantics = [], scalar_prefetch = 0 : i64, scratch_operands = 0 : i64, tpu.core_type = #tpu.core_type<tc>} {
    %c0 = arith.constant 0 : index
    %c0_0 = arith.constant 0 : index
    %0 = vector.load %arg0[%c0, %c0_0] : memref<128x16xbf16, #tpu.memory_space<vmem>>, vector<128x16xbf16>
    %c0_1 = arith.constant 0 : index
    %c0_2 = arith.constant 0 : index
    %1 = vector.load %arg1[%c0_1, %c0_2] : memref<16x32xbf16, #tpu.memory_space<vmem>>, vector<16x32xbf16>
    %cst = arith.constant dense<0.000000e+00> : vector<128x32xf32>
    %2 = tpu.matmul %0, %1, %cst {dimension_numbers = #tpu.dot_dimension_numbers<[1], [0], [0], [1], [0, 0, 1, 1], [], []>} : vector<128x16xbf16>, vector<16x32xbf16>, vector<128x32xf32> -> vector<128x32xf32>
    %c0_3 = arith.constant 0 : index
    %c0_4 = arith.constant 0 : index
    %3 = vector.load %arg2[%c0_3, %c0_4] : memref<1x32xf32, #tpu.memory_space<vmem>>, vector<1x32xf32>
    %4 = vector.broadcast %3 : vector<1x32xf32> to vector<128x32xf32>
    %5 = arith.addf %2, %4 : vector<128x32xf32>
    %cst_5 = arith.constant 0.000000e+00 : f32
    %6 = vector.broadcast %cst_5 : f32 to vector<128x32xf32>
    %7 = arith.maximumf %5, %6 : vector<128x32xf32>
    %8 = arith.truncf %7 : vector<128x32xf32> to vector<128x32xbf16>
    %c0_6 = arith.constant 0 : index
    %c0_7 = arith.constant 0 : index
    %9 = vector.load %arg3[%c0_6, %c0_7] : memref<32x40xbf16, #tpu.memory_space<vmem>>, vector<32x40xbf16>
    %cst_8 = arith.constant dense<0.000000e+00> : vector<128x40xf32>
    %10 = tpu.matmul %8, %9, %cst_8 {dimension_numbers = #tpu.dot_dimension_numbers<[1], [0], [0], [1], [0, 0, 1, 1], [], []>} : vector<128x32xbf16>, vector<32x40xbf16>, vector<128x40xf32> -> vector<128x40xf32>
    %c0_9 = arith.constant 0 : index
    %c0_10 = arith.constant 0 : index
    %11 = vector.load %arg4[%c0_9, %c0_10] : memref<1x40xf32, #tpu.memory_space<vmem>>, vector<1x40xf32>
    %12 = vector.broadcast %11 : vector<1x40xf32> to vector<128x40xf32>
    %13 = arith.addf %10, %12 : vector<128x40xf32>
    %c0_11 = arith.constant 0 : index
    %14 = memref.load %arg5[%c0_11] : memref<1xf32, #tpu.memory_space<smem>>
    %15 = vector.extract_strided_slice %7 {offsets = [0, 0], sizes = [64, 32], strides = [1, 1]} : vector<128x32xf32> to vector<64x32xf32>
    %16 = vector.extract_strided_slice %13 {offsets = [0, 0], sizes = [64, 4], strides = [1, 1]} : vector<128x40xf32> to vector<64x4xf32>
    %17 = vector.extract_strided_slice %13 {offsets = [0, 4], sizes = [64, 4], strides = [1, 1]} : vector<128x40xf32> to vector<64x4xf32>
    %18 = vector.extract_strided_slice %13 {offsets = [0, 8], sizes = [64, 32], strides = [1, 1]} : vector<128x40xf32> to vector<64x32xf32>
    %19 = tpu.transpose %17, [1, 0] : vector<64x4xf32> -> vector<4x64xf32>
    %cst_12 = arith.constant dense<0.000000e+00> : vector<64x64xf32>
    %20 = tpu.matmul %16, %19, %cst_12 {dimension_numbers = #tpu.dot_dimension_numbers<[1], [0], [0], [1], [0, 0, 1, 1], [], []>} : vector<64x4xf32>, vector<4x64xf32>, vector<64x64xf32> -> vector<64x64xf32>
    %cst_13 = arith.constant dense<0xFF800000> : vector<64xf32>
    %21 = vector.multi_reduction <maximumf>, %20, %cst_13 [1] : vector<64x64xf32> to vector<64xf32>
    %22 = vector.shape_cast %21 : vector<64xf32> to vector<64x1xf32>
    %23 = vector.broadcast %22 : vector<64x1xf32> to vector<64x64xf32>
    %24 = arith.subf %20, %23 : vector<64x64xf32>
    %25 = math.exp %24 : vector<64x64xf32>
    %cst_14 = arith.constant dense<0.000000e+00> : vector<64xf32>
    %26 = vector.multi_reduction <add>, %25, %cst_14 [1] : vector<64x64xf32> to vector<64xf32>
    %27 = vector.shape_cast %26 : vector<64xf32> to vector<64x1xf32>
    %28 = tpu.reciprocal %27 {approx = true} : vector<64x1xf32> -> vector<64x1xf32>
    %29 = vector.broadcast %28 : vector<64x1xf32> to vector<64x64xf32>
    %30 = arith.mulf %25, %29 : vector<64x64xf32>
    %cst_15 = arith.constant dense<0.000000e+00> : vector<64x32xf32>
    %31 = tpu.matmul %30, %18, %cst_15 {dimension_numbers = #tpu.dot_dimension_numbers<[1], [0], [0], [1], [0, 0, 1, 1], [], []>} : vector<64x64xf32>, vector<64x32xf32>, vector<64x32xf32> -> vector<64x32xf32>
    %32 = vector.broadcast %14 : f32 to vector<64x32xf32>
    %33 = arith.mulf %32, %31 : vector<64x32xf32>
    %34 = arith.addf %33, %15 : vector<64x32xf32>
    %c0_16 = arith.constant 0 : index
    %c0_17 = arith.constant 0 : index
    %35 = vector.load %arg6[%c0_16, %c0_17] : memref<128x32xf32, #tpu.memory_space<vmem>>, vector<64x32xf32>
    tpu.vector_store %arg6[%c0_16, %c0_17], %34 {strides = array<i32>} : memref<128x32xf32, #tpu.memory_space<vmem>>, vector<64x32xf32>,
    %36 = vector.extract_strided_slice %7 {offsets = [64, 0], sizes = [64, 32], strides = [1, 1]} : vector<128x32xf32> to vector<64x32xf32>
    %37 = vector.extract_strided_slice %13 {offsets = [64, 0], sizes = [64, 4], strides = [1, 1]} : vector<128x40xf32> to vector<64x4xf32>
    %38 = vector.extract_strided_slice %13 {offsets = [64, 4], sizes = [64, 4], strides = [1, 1]} : vector<128x40xf32> to vector<64x4xf32>
    %39 = vector.extract_strided_slice %13 {offsets = [64, 8], sizes = [64, 32], strides = [1, 1]} : vector<128x40xf32> to vector<64x32xf32>
    %40 = tpu.transpose %38, [1, 0] : vector<64x4xf32> -> vector<4x64xf32>
    %cst_18 = arith.constant dense<0.000000e+00> : vector<64x64xf32>
    %41 = tpu.matmul %37, %40, %cst_18 {dimension_numbers = #tpu.dot_dimension_numbers<[1], [0], [0], [1], [0, 0, 1, 1], [], []>} : vector<64x4xf32>, vector<4x64xf32>, vector<64x64xf32> -> vector<64x64xf32>
    %cst_19 = arith.constant dense<0xFF800000> : vector<64xf32>
    %42 = vector.multi_reduction <maximumf>, %41, %cst_19 [1] : vector<64x64xf32> to vector<64xf32>
    %43 = vector.shape_cast %42 : vector<64xf32> to vector<64x1xf32>
    %44 = vector.broadcast %43 : vector<64x1xf32> to vector<64x64xf32>
    %45 = arith.subf %41, %44 : vector<64x64xf32>
    %46 = math.exp %45 : vector<64x64xf32>
    %cst_20 = arith.constant dense<0.000000e+00> : vector<64xf32>
    %47 = vector.multi_reduction <add>, %46, %cst_20 [1] : vector<64x64xf32> to vector<64xf32>
    %48 = vector.shape_cast %47 : vector<64xf32> to vector<64x1xf32>
    %49 = tpu.reciprocal %48 {approx = true} : vector<64x1xf32> -> vector<64x1xf32>
    %50 = vector.broadcast %49 : vector<64x1xf32> to vector<64x64xf32>
    %51 = arith.mulf %46, %50 : vector<64x64xf32>
    %cst_21 = arith.constant dense<0.000000e+00> : vector<64x32xf32>
    %52 = tpu.matmul %51, %39, %cst_21 {dimension_numbers = #tpu.dot_dimension_numbers<[1], [0], [0], [1], [0, 0, 1, 1], [], []>} : vector<64x64xf32>, vector<64x32xf32>, vector<64x32xf32> -> vector<64x32xf32>
    %53 = vector.broadcast %14 : f32 to vector<64x32xf32>
    %54 = arith.mulf %53, %52 : vector<64x32xf32>
    %55 = arith.addf %54, %36 : vector<64x32xf32>
    %c64 = arith.constant 64 : index
    %c0_22 = arith.constant 0 : index
    %56 = vector.load %arg6[%c64, %c0_22] : memref<128x32xf32, #tpu.memory_space<vmem>>, vector<64x32xf32>
    tpu.vector_store %arg6[%c64, %c0_22], %55 {strides = array<i32>} : memref<128x32xf32, #tpu.memory_space<vmem>>, vector<64x32xf32>,
    return
  }
}

module attributes {stable_mosaic.version = 11 : i64} {
  func.func @_conv_sa_kernel(%arg0: memref<32x512xbf16, #tpu.memory_space<vmem>>, %arg1: memref<512x64xbf16, #tpu.memory_space<vmem>>, %arg2: memref<1x64xf32, #tpu.memory_space<vmem>>, %arg3: memref<64x80xbf16, #tpu.memory_space<vmem>>, %arg4: memref<1x80xf32, #tpu.memory_space<vmem>>, %arg5: memref<1xf32, #tpu.memory_space<smem>>, %arg6: memref<32x64xf32, #tpu.memory_space<vmem>>) attributes {dimension_semantics = [], scalar_prefetch = 0 : i64, scratch_operands = 0 : i64, tpu.core_type = #tpu.core_type<tc>} {
    %c0 = arith.constant 0 : index
    %c0_0 = arith.constant 0 : index
    %0 = vector.load %arg0[%c0, %c0_0] : memref<32x512xbf16, #tpu.memory_space<vmem>>, vector<32x512xbf16>
    %c0_1 = arith.constant 0 : index
    %c0_2 = arith.constant 0 : index
    %1 = vector.load %arg1[%c0_1, %c0_2] : memref<512x64xbf16, #tpu.memory_space<vmem>>, vector<512x64xbf16>
    %cst = arith.constant dense<0.000000e+00> : vector<32x64xf32>
    %2 = tpu.matmul %0, %1, %cst {dimension_numbers = #tpu.dot_dimension_numbers<[1], [0], [0], [1], [0, 0, 1, 1], [], []>} : vector<32x512xbf16>, vector<512x64xbf16>, vector<32x64xf32> -> vector<32x64xf32>
    %c0_3 = arith.constant 0 : index
    %c0_4 = arith.constant 0 : index
    %3 = vector.load %arg2[%c0_3, %c0_4] : memref<1x64xf32, #tpu.memory_space<vmem>>, vector<1x64xf32>
    %4 = vector.broadcast %3 : vector<1x64xf32> to vector<32x64xf32>
    %5 = arith.addf %2, %4 : vector<32x64xf32>
    %cst_5 = arith.constant 0.000000e+00 : f32
    %6 = vector.broadcast %cst_5 : f32 to vector<32x64xf32>
    %7 = arith.maximumf %5, %6 : vector<32x64xf32>
    %8 = arith.truncf %7 : vector<32x64xf32> to vector<32x64xbf16>
    %c0_6 = arith.constant 0 : index
    %c0_7 = arith.constant 0 : index
    %9 = vector.load %arg3[%c0_6, %c0_7] : memref<64x80xbf16, #tpu.memory_space<vmem>>, vector<64x80xbf16>
    %cst_8 = arith.constant dense<0.000000e+00> : vector<32x80xf32>
    %10 = tpu.matmul %8, %9, %cst_8 {dimension_numbers = #tpu.dot_dimension_numbers<[1], [0], [0], [1], [0, 0, 1, 1], [], []>} : vector<32x64xbf16>, vector<64x80xbf16>, vector<32x80xf32> -> vector<32x80xf32>
    %c0_9 = arith.constant 0 : index
    %c0_10 = arith.constant 0 : index
    %11 = vector.load %arg4[%c0_9, %c0_10] : memref<1x80xf32, #tpu.memory_space<vmem>>, vector<1x80xf32>
    %12 = vector.broadcast %11 : vector<1x80xf32> to vector<32x80xf32>
    %13 = arith.addf %10, %12 : vector<32x80xf32>
    %c0_11 = arith.constant 0 : index
    %14 = memref.load %arg5[%c0_11] : memref<1xf32, #tpu.memory_space<smem>>
    %15 = vector.extract_strided_slice %7 {offsets = [0, 0], sizes = [16, 64], strides = [1, 1]} : vector<32x64xf32> to vector<16x64xf32>
    %16 = vector.extract_strided_slice %13 {offsets = [0, 0], sizes = [16, 8], strides = [1, 1]} : vector<32x80xf32> to vector<16x8xf32>
    %17 = vector.extract_strided_slice %13 {offsets = [0, 8], sizes = [16, 8], strides = [1, 1]} : vector<32x80xf32> to vector<16x8xf32>
    %18 = vector.extract_strided_slice %13 {offsets = [0, 16], sizes = [16, 64], strides = [1, 1]} : vector<32x80xf32> to vector<16x64xf32>
    %19 = tpu.transpose %17, [1, 0] : vector<16x8xf32> -> vector<8x16xf32>
    %cst_12 = arith.constant dense<0.000000e+00> : vector<16x16xf32>
    %20 = tpu.matmul %16, %19, %cst_12 {dimension_numbers = #tpu.dot_dimension_numbers<[1], [0], [0], [1], [0, 0, 1, 1], [], []>} : vector<16x8xf32>, vector<8x16xf32>, vector<16x16xf32> -> vector<16x16xf32>
    %cst_13 = arith.constant dense<0xFF800000> : vector<16xf32>
    %21 = vector.multi_reduction <maximumf>, %20, %cst_13 [1] : vector<16x16xf32> to vector<16xf32>
    %22 = vector.shape_cast %21 : vector<16xf32> to vector<16x1xf32>
    %23 = vector.broadcast %22 : vector<16x1xf32> to vector<16x16xf32>
    %24 = arith.subf %20, %23 : vector<16x16xf32>
    %25 = math.exp %24 : vector<16x16xf32>
    %cst_14 = arith.constant dense<0.000000e+00> : vector<16xf32>
    %26 = vector.multi_reduction <add>, %25, %cst_14 [1] : vector<16x16xf32> to vector<16xf32>
    %27 = vector.shape_cast %26 : vector<16xf32> to vector<16x1xf32>
    %28 = tpu.reciprocal %27 {approx = true} : vector<16x1xf32> -> vector<16x1xf32>
    %29 = vector.broadcast %28 : vector<16x1xf32> to vector<16x16xf32>
    %30 = arith.mulf %25, %29 : vector<16x16xf32>
    %cst_15 = arith.constant dense<0.000000e+00> : vector<16x64xf32>
    %31 = tpu.matmul %30, %18, %cst_15 {dimension_numbers = #tpu.dot_dimension_numbers<[1], [0], [0], [1], [0, 0, 1, 1], [], []>} : vector<16x16xf32>, vector<16x64xf32>, vector<16x64xf32> -> vector<16x64xf32>
    %32 = vector.broadcast %14 : f32 to vector<16x64xf32>
    %33 = arith.mulf %32, %31 : vector<16x64xf32>
    %34 = arith.addf %33, %15 : vector<16x64xf32>
    %c0_16 = arith.constant 0 : index
    %c0_17 = arith.constant 0 : index
    %35 = vector.load %arg6[%c0_16, %c0_17] : memref<32x64xf32, #tpu.memory_space<vmem>>, vector<16x64xf32>
    tpu.vector_store %arg6[%c0_16, %c0_17], %34 {strides = array<i32>} : memref<32x64xf32, #tpu.memory_space<vmem>>, vector<16x64xf32>,
    %36 = vector.extract_strided_slice %7 {offsets = [16, 0], sizes = [16, 64], strides = [1, 1]} : vector<32x64xf32> to vector<16x64xf32>
    %37 = vector.extract_strided_slice %13 {offsets = [16, 0], sizes = [16, 8], strides = [1, 1]} : vector<32x80xf32> to vector<16x8xf32>
    %38 = vector.extract_strided_slice %13 {offsets = [16, 8], sizes = [16, 8], strides = [1, 1]} : vector<32x80xf32> to vector<16x8xf32>
    %39 = vector.extract_strided_slice %13 {offsets = [16, 16], sizes = [16, 64], strides = [1, 1]} : vector<32x80xf32> to vector<16x64xf32>
    %40 = tpu.transpose %38, [1, 0] : vector<16x8xf32> -> vector<8x16xf32>
    %cst_18 = arith.constant dense<0.000000e+00> : vector<16x16xf32>
    %41 = tpu.matmul %37, %40, %cst_18 {dimension_numbers = #tpu.dot_dimension_numbers<[1], [0], [0], [1], [0, 0, 1, 1], [], []>} : vector<16x8xf32>, vector<8x16xf32>, vector<16x16xf32> -> vector<16x16xf32>
    %cst_19 = arith.constant dense<0xFF800000> : vector<16xf32>
    %42 = vector.multi_reduction <maximumf>, %41, %cst_19 [1] : vector<16x16xf32> to vector<16xf32>
    %43 = vector.shape_cast %42 : vector<16xf32> to vector<16x1xf32>
    %44 = vector.broadcast %43 : vector<16x1xf32> to vector<16x16xf32>
    %45 = arith.subf %41, %44 : vector<16x16xf32>
    %46 = math.exp %45 : vector<16x16xf32>
    %cst_20 = arith.constant dense<0.000000e+00> : vector<16xf32>
    %47 = vector.multi_reduction <add>, %46, %cst_20 [1] : vector<16x16xf32> to vector<16xf32>
    %48 = vector.shape_cast %47 : vector<16xf32> to vector<16x1xf32>
    %49 = tpu.reciprocal %48 {approx = true} : vector<16x1xf32> -> vector<16x1xf32>
    %50 = vector.broadcast %49 : vector<16x1xf32> to vector<16x16xf32>
    %51 = arith.mulf %46, %50 : vector<16x16xf32>
    %cst_21 = arith.constant dense<0.000000e+00> : vector<16x64xf32>
    %52 = tpu.matmul %51, %39, %cst_21 {dimension_numbers = #tpu.dot_dimension_numbers<[1], [0], [0], [1], [0, 0, 1, 1], [], []>} : vector<16x16xf32>, vector<16x64xf32>, vector<16x64xf32> -> vector<16x64xf32>
    %53 = vector.broadcast %14 : f32 to vector<16x64xf32>
    %54 = arith.mulf %53, %52 : vector<16x64xf32>
    %55 = arith.addf %54, %36 : vector<16x64xf32>
    %c16 = arith.constant 16 : index
    %c0_22 = arith.constant 0 : index
    %56 = vector.load %arg6[%c16, %c0_22] : memref<32x64xf32, #tpu.memory_space<vmem>>, vector<16x64xf32>
    tpu.vector_store %arg6[%c16, %c0_22], %55 {strides = array<i32>} : memref<32x64xf32, #tpu.memory_space<vmem>>, vector<16x64xf32>,
    return
  }
}

module attributes {stable_mosaic.version = 11 : i64} {
  func.func @_conv_sa_kernel(%arg0: memref<8x1024xbf16, #tpu.memory_space<vmem>>, %arg1: memref<1024x128xbf16, #tpu.memory_space<vmem>>, %arg2: memref<1x128xf32, #tpu.memory_space<vmem>>, %arg3: memref<128x160xbf16, #tpu.memory_space<vmem>>, %arg4: memref<1x160xf32, #tpu.memory_space<vmem>>, %arg5: memref<1xf32, #tpu.memory_space<smem>>, %arg6: memref<8x128xf32, #tpu.memory_space<vmem>>) attributes {dimension_semantics = [], scalar_prefetch = 0 : i64, scratch_operands = 0 : i64, tpu.core_type = #tpu.core_type<tc>} {
    %c0 = arith.constant 0 : index
    %c0_0 = arith.constant 0 : index
    %0 = vector.load %arg0[%c0, %c0_0] : memref<8x1024xbf16, #tpu.memory_space<vmem>>, vector<8x1024xbf16>
    %c0_1 = arith.constant 0 : index
    %c0_2 = arith.constant 0 : index
    %1 = vector.load %arg1[%c0_1, %c0_2] : memref<1024x128xbf16, #tpu.memory_space<vmem>>, vector<1024x128xbf16>
    %cst = arith.constant dense<0.000000e+00> : vector<8x128xf32>
    %2 = tpu.matmul %0, %1, %cst {dimension_numbers = #tpu.dot_dimension_numbers<[1], [0], [0], [1], [0, 0, 1, 1], [], []>} : vector<8x1024xbf16>, vector<1024x128xbf16>, vector<8x128xf32> -> vector<8x128xf32>
    %c0_3 = arith.constant 0 : index
    %c0_4 = arith.constant 0 : index
    %3 = vector.load %arg2[%c0_3, %c0_4] : memref<1x128xf32, #tpu.memory_space<vmem>>, vector<1x128xf32>
    %4 = vector.broadcast %3 : vector<1x128xf32> to vector<8x128xf32>
    %5 = arith.addf %2, %4 : vector<8x128xf32>
    %cst_5 = arith.constant 0.000000e+00 : f32
    %6 = vector.broadcast %cst_5 : f32 to vector<8x128xf32>
    %7 = arith.maximumf %5, %6 : vector<8x128xf32>
    %8 = arith.truncf %7 : vector<8x128xf32> to vector<8x128xbf16>
    %c0_6 = arith.constant 0 : index
    %c0_7 = arith.constant 0 : index
    %9 = vector.load %arg3[%c0_6, %c0_7] : memref<128x160xbf16, #tpu.memory_space<vmem>>, vector<128x160xbf16>
    %cst_8 = arith.constant dense<0.000000e+00> : vector<8x160xf32>
    %10 = tpu.matmul %8, %9, %cst_8 {dimension_numbers = #tpu.dot_dimension_numbers<[1], [0], [0], [1], [0, 0, 1, 1], [], []>} : vector<8x128xbf16>, vector<128x160xbf16>, vector<8x160xf32> -> vector<8x160xf32>
    %c0_9 = arith.constant 0 : index
    %c0_10 = arith.constant 0 : index
    %11 = vector.load %arg4[%c0_9, %c0_10] : memref<1x160xf32, #tpu.memory_space<vmem>>, vector<1x160xf32>
    %12 = vector.broadcast %11 : vector<1x160xf32> to vector<8x160xf32>
    %13 = arith.addf %10, %12 : vector<8x160xf32>
    %c0_11 = arith.constant 0 : index
    %14 = memref.load %arg5[%c0_11] : memref<1xf32, #tpu.memory_space<smem>>
    %15 = vector.extract_strided_slice %7 {offsets = [0, 0], sizes = [4, 128], strides = [1, 1]} : vector<8x128xf32> to vector<4x128xf32>
    %16 = vector.extract_strided_slice %13 {offsets = [0, 0], sizes = [4, 16], strides = [1, 1]} : vector<8x160xf32> to vector<4x16xf32>
    %17 = vector.extract_strided_slice %13 {offsets = [0, 16], sizes = [4, 16], strides = [1, 1]} : vector<8x160xf32> to vector<4x16xf32>
    %18 = vector.extract_strided_slice %13 {offsets = [0, 32], sizes = [4, 128], strides = [1, 1]} : vector<8x160xf32> to vector<4x128xf32>
    %19 = tpu.transpose %17, [1, 0] : vector<4x16xf32> -> vector<16x4xf32>
    %cst_12 = arith.constant dense<0.000000e+00> : vector<4x4xf32>
    %20 = tpu.matmul %16, %19, %cst_12 {dimension_numbers = #tpu.dot_dimension_numbers<[1], [0], [0], [1], [0, 0, 1, 1], [], []>} : vector<4x16xf32>, vector<16x4xf32>, vector<4x4xf32> -> vector<4x4xf32>
    %cst_13 = arith.constant dense<0xFF800000> : vector<4xf32>
    %21 = vector.multi_reduction <maximumf>, %20, %cst_13 [1] : vector<4x4xf32> to vector<4xf32>
    %22 = vector.shape_cast %21 : vector<4xf32> to vector<4x1xf32>
    %23 = vector.broadcast %22 : vector<4x1xf32> to vector<4x4xf32>
    %24 = arith.subf %20, %23 : vector<4x4xf32>
    %25 = math.exp %24 : vector<4x4xf32>
    %cst_14 = arith.constant dense<0.000000e+00> : vector<4xf32>
    %26 = vector.multi_reduction <add>, %25, %cst_14 [1] : vector<4x4xf32> to vector<4xf32>
    %27 = vector.shape_cast %26 : vector<4xf32> to vector<4x1xf32>
    %28 = tpu.reciprocal %27 {approx = true} : vector<4x1xf32> -> vector<4x1xf32>
    %29 = vector.broadcast %28 : vector<4x1xf32> to vector<4x4xf32>
    %30 = arith.mulf %25, %29 : vector<4x4xf32>
    %cst_15 = arith.constant dense<0.000000e+00> : vector<4x128xf32>
    %31 = tpu.matmul %30, %18, %cst_15 {dimension_numbers = #tpu.dot_dimension_numbers<[1], [0], [0], [1], [0, 0, 1, 1], [], []>} : vector<4x4xf32>, vector<4x128xf32>, vector<4x128xf32> -> vector<4x128xf32>
    %32 = vector.broadcast %14 : f32 to vector<4x128xf32>
    %33 = arith.mulf %32, %31 : vector<4x128xf32>
    %34 = arith.addf %33, %15 : vector<4x128xf32>
    %c0_16 = arith.constant 0 : index
    %c0_17 = arith.constant 0 : index
    %35 = vector.load %arg6[%c0_16, %c0_17] : memref<8x128xf32, #tpu.memory_space<vmem>>, vector<4x128xf32>
    tpu.vector_store %arg6[%c0_16, %c0_17], %34 {strides = array<i32>} : memref<8x128xf32, #tpu.memory_space<vmem>>, vector<4x128xf32>,
    %36 = vector.extract_strided_slice %7 {offsets = [4, 0], sizes = [4, 128], strides = [1, 1]} : vector<8x128xf32> to vector<4x128xf32>
    %37 = vector.extract_strided_slice %13 {offsets = [4, 0], sizes = [4, 16], strides = [1, 1]} : vector<8x160xf32> to vector<4x16xf32>
    %38 = vector.extract_strided_slice %13 {offsets = [4, 16], sizes = [4, 16], strides = [1, 1]} : vector<8x160xf32> to vector<4x16xf32>
    %39 = vector.extract_strided_slice %13 {offsets = [4, 32], sizes = [4, 128], strides = [1, 1]} : vector<8x160xf32> to vector<4x128xf32>
    %40 = tpu.transpose %38, [1, 0] : vector<4x16xf32> -> vector<16x4xf32>
    %cst_18 = arith.constant dense<0.000000e+00> : vector<4x4xf32>
    %41 = tpu.matmul %37, %40, %cst_18 {dimension_numbers = #tpu.dot_dimension_numbers<[1], [0], [0], [1], [0, 0, 1, 1], [], []>} : vector<4x16xf32>, vector<16x4xf32>, vector<4x4xf32> -> vector<4x4xf32>
    %cst_19 = arith.constant dense<0xFF800000> : vector<4xf32>
    %42 = vector.multi_reduction <maximumf>, %41, %cst_19 [1] : vector<4x4xf32> to vector<4xf32>
    %43 = vector.shape_cast %42 : vector<4xf32> to vector<4x1xf32>
    %44 = vector.broadcast %43 : vector<4x1xf32> to vector<4x4xf32>
    %45 = arith.subf %41, %44 : vector<4x4xf32>
    %46 = math.exp %45 : vector<4x4xf32>
    %cst_20 = arith.constant dense<0.000000e+00> : vector<4xf32>
    %47 = vector.multi_reduction <add>, %46, %cst_20 [1] : vector<4x4xf32> to vector<4xf32>
    %48 = vector.shape_cast %47 : vector<4xf32> to vector<4x1xf32>
    %49 = tpu.reciprocal %48 {approx = true} : vector<4x1xf32> -> vector<4x1xf32>
    %50 = vector.broadcast %49 : vector<4x1xf32> to vector<4x4xf32>
    %51 = arith.mulf %46, %50 : vector<4x4xf32>
    %cst_21 = arith.constant dense<0.000000e+00> : vector<4x128xf32>
    %52 = tpu.matmul %51, %39, %cst_21 {dimension_numbers = #tpu.dot_dimension_numbers<[1], [0], [0], [1], [0, 0, 1, 1], [], []>} : vector<4x4xf32>, vector<4x128xf32>, vector<4x128xf32> -> vector<4x128xf32>
    %53 = vector.broadcast %14 : f32 to vector<4x128xf32>
    %54 = arith.mulf %53, %52 : vector<4x128xf32>
    %55 = arith.addf %54, %36 : vector<4x128xf32>
    %c4 = arith.constant 4 : index
    %c0_22 = arith.constant 0 : index
    %56 = vector.load %arg6[%c4, %c0_22] : memref<8x128xf32, #tpu.memory_space<vmem>>, vector<4x128xf32>
    tpu.vector_store %arg6[%c4, %c0_22], %55 {strides = array<i32>} : memref<8x128xf32, #tpu.memory_space<vmem>>, vector<4x128xf32>,
    return
  }
}

module attributes {stable_mosaic.version = 11 : i64} {
  func.func @_latent_kernel(%arg0: memref<2x512xbf16, #tpu.memory_space<vmem>>, %arg1: memref<512x16xbf16, #tpu.memory_space<vmem>>, %arg2: memref<1x16xf32, #tpu.memory_space<vmem>>, %arg3: memref<2x8xf32, #tpu.memory_space<vmem>>, %arg4: memref<8x512xbf16, #tpu.memory_space<vmem>>, %arg5: memref<1x512xf32, #tpu.memory_space<vmem>>, %arg6: memref<2x8xf32, #tpu.memory_space<vmem>>, %arg7: memref<2x8xf32, #tpu.memory_space<vmem>>, %arg8: memref<2x512xf32, #tpu.memory_space<vmem>>) attributes {dimension_semantics = [], scalar_prefetch = 0 : i64, scratch_operands = 0 : i64, tpu.core_type = #tpu.core_type<tc>} {
    %c0 = arith.constant 0 : index
    %c0_0 = arith.constant 0 : index
    %0 = vector.load %arg0[%c0, %c0_0] : memref<2x512xbf16, #tpu.memory_space<vmem>>, vector<2x512xbf16>
    %c0_1 = arith.constant 0 : index
    %c0_2 = arith.constant 0 : index
    %1 = vector.load %arg1[%c0_1, %c0_2] : memref<512x16xbf16, #tpu.memory_space<vmem>>, vector<512x16xbf16>
    %cst = arith.constant dense<0.000000e+00> : vector<2x16xf32>
    %2 = tpu.matmul %0, %1, %cst {dimension_numbers = #tpu.dot_dimension_numbers<[1], [0], [0], [1], [0, 0, 1, 1], [], []>} : vector<2x512xbf16>, vector<512x16xbf16>, vector<2x16xf32> -> vector<2x16xf32>
    %c0_3 = arith.constant 0 : index
    %c0_4 = arith.constant 0 : index
    %3 = vector.load %arg2[%c0_3, %c0_4] : memref<1x16xf32, #tpu.memory_space<vmem>>, vector<1x16xf32>
    %4 = vector.broadcast %3 : vector<1x16xf32> to vector<2x16xf32>
    %5 = arith.addf %2, %4 : vector<2x16xf32>
    %6 = vector.extract_strided_slice %5 {offsets = [0, 0], sizes = [2, 8], strides = [1, 1]} : vector<2x16xf32> to vector<2x8xf32>
    %7 = vector.extract_strided_slice %5 {offsets = [0, 8], sizes = [2, 8], strides = [1, 1]} : vector<2x16xf32> to vector<2x8xf32>
    %c0_5 = arith.constant 0 : index
    %c0_6 = arith.constant 0 : index
    %8 = vector.load %arg3[%c0_5, %c0_6] : memref<2x8xf32, #tpu.memory_space<vmem>>, vector<2x8xf32>
    %cst_7 = arith.constant 5.000000e-01 : f32
    %9 = vector.broadcast %cst_7 : f32 to vector<2x8xf32>
    %10 = arith.mulf %9, %7 : vector<2x8xf32>
    %11 = math.exp %10 : vector<2x8xf32>
    %12 = arith.mulf %8, %11 : vector<2x8xf32>
    %13 = arith.addf %6, %12 : vector<2x8xf32>
    %14 = arith.truncf %13 : vector<2x8xf32> to vector<2x8xbf16>
    %c0_8 = arith.constant 0 : index
    %c0_9 = arith.constant 0 : index
    %15 = vector.load %arg4[%c0_8, %c0_9] : memref<8x512xbf16, #tpu.memory_space<vmem>>, vector<8x512xbf16>
    %cst_10 = arith.constant dense<0.000000e+00> : vector<2x512xf32>
    %16 = tpu.matmul %14, %15, %cst_10 {dimension_numbers = #tpu.dot_dimension_numbers<[1], [0], [0], [1], [0, 0, 1, 1], [], []>} : vector<2x8xbf16>, vector<8x512xbf16>, vector<2x512xf32> -> vector<2x512xf32>
    %c0_11 = arith.constant 0 : index
    %c0_12 = arith.constant 0 : index
    %17 = vector.load %arg5[%c0_11, %c0_12] : memref<1x512xf32, #tpu.memory_space<vmem>>, vector<1x512xf32>
    %18 = vector.broadcast %17 : vector<1x512xf32> to vector<2x512xf32>
    %19 = arith.addf %16, %18 : vector<2x512xf32>
    %c0_13 = arith.constant 0 : index
    %c0_14 = arith.constant 0 : index
    %20 = vector.load %arg6[%c0_13, %c0_14] : memref<2x8xf32, #tpu.memory_space<vmem>>, vector<2x8xf32>
    tpu.vector_store %arg6[%c0_13, %c0_14], %6 {strides = array<i32>} : memref<2x8xf32, #tpu.memory_space<vmem>>, vector<2x8xf32>,
    %c0_15 = arith.constant 0 : index
    %c0_16 = arith.constant 0 : index
    %21 = vector.load %arg7[%c0_15, %c0_16] : memref<2x8xf32, #tpu.memory_space<vmem>>, vector<2x8xf32>
    tpu.vector_store %arg7[%c0_15, %c0_16], %7 {strides = array<i32>} : memref<2x8xf32, #tpu.memory_space<vmem>>, vector<2x8xf32>,
    %c0_17 = arith.constant 0 : index
    %c0_18 = arith.constant 0 : index
    %22 = vector.load %arg8[%c0_17, %c0_18] : memref<2x512xf32, #tpu.memory_space<vmem>>, vector<2x512xf32>
    tpu.vector_store %arg8[%c0_17, %c0_18], %19 {strides = array<i32>} : memref<2x512xf32, #tpu.memory_space<vmem>>, vector<2x512xf32>,
    return
  }
}

module attributes {stable_mosaic.version = 11 : i64} {
  func.func @_conv_matmul_kernel(%arg0: memref<32x2048xbf16, #tpu.memory_space<vmem>>, %arg1: memref<2048x64xbf16, #tpu.memory_space<vmem>>, %arg2: memref<1x64xf32, #tpu.memory_space<vmem>>, %arg3: memref<32x64xf32, #tpu.memory_space<vmem>>) attributes {dimension_semantics = [], scalar_prefetch = 0 : i64, scratch_operands = 0 : i64, tpu.core_type = #tpu.core_type<tc>} {
    %c0 = arith.constant 0 : index
    %c0_0 = arith.constant 0 : index
    %0 = vector.load %arg0[%c0, %c0_0] : memref<32x2048xbf16, #tpu.memory_space<vmem>>, vector<32x2048xbf16>
    %c0_1 = arith.constant 0 : index
    %c0_2 = arith.constant 0 : index
    %1 = vector.load %arg1[%c0_1, %c0_2] : memref<2048x64xbf16, #tpu.memory_space<vmem>>, vector<2048x64xbf16>
    %cst = arith.constant dense<0.000000e+00> : vector<32x64xf32>
    %2 = tpu.matmul %0, %1, %cst {dimension_numbers = #tpu.dot_dimension_numbers<[1], [0], [0], [1], [0, 0, 1, 1], [], []>} : vector<32x2048xbf16>, vector<2048x64xbf16>, vector<32x64xf32> -> vector<32x64xf32>
    %c0_3 = arith.constant 0 : index
    %c0_4 = arith.constant 0 : index
    %3 = vector.load %arg2[%c0_3, %c0_4] : memref<1x64xf32, #tpu.memory_space<vmem>>, vector<1x64xf32>
    %4 = vector.broadcast %3 : vector<1x64xf32> to vector<32x64xf32>
    %5 = arith.addf %2, %4 : vector<32x64xf32>
    %cst_5 = arith.constant 0.000000e+00 : f32
    %6 = vector.broadcast %cst_5 : f32 to vector<32x64xf32>
    %7 = arith.maximumf %5, %6 : vector<32x64xf32>
    %c0_6 = arith.constant 0 : index
    %c0_7 = arith.constant 0 : index
    %8 = vector.load %arg3[%c0_6, %c0_7] : memref<32x64xf32, #tpu.memory_space<vmem>>, vector<32x64xf32>
    tpu.vector_store %arg3[%c0_6, %c0_7], %7 {strides = array<i32>} : memref<32x64xf32, #tpu.memory_space<vmem>>, vector<32x64xf32>,
    return
  }
}

module attributes {stable_mosaic.version = 11 : i64} {
  func.func @_conv_matmul_kernel(%arg0: memref<128x1024xbf16, #tpu.memory_space<vmem>>, %arg1: memref<1024x32xbf16, #tpu.memory_space<vmem>>, %arg2: memref<1x32xf32, #tpu.memory_space<vmem>>, %arg3: memref<128x32xf32, #tpu.memory_space<vmem>>) attributes {dimension_semantics = [], scalar_prefetch = 0 : i64, scratch_operands = 0 : i64, tpu.core_type = #tpu.core_type<tc>} {
    %c0 = arith.constant 0 : index
    %c0_0 = arith.constant 0 : index
    %0 = vector.load %arg0[%c0, %c0_0] : memref<128x1024xbf16, #tpu.memory_space<vmem>>, vector<128x1024xbf16>
    %c0_1 = arith.constant 0 : index
    %c0_2 = arith.constant 0 : index
    %1 = vector.load %arg1[%c0_1, %c0_2] : memref<1024x32xbf16, #tpu.memory_space<vmem>>, vector<1024x32xbf16>
    %cst = arith.constant dense<0.000000e+00> : vector<128x32xf32>
    %2 = tpu.matmul %0, %1, %cst {dimension_numbers = #tpu.dot_dimension_numbers<[1], [0], [0], [1], [0, 0, 1, 1], [], []>} : vector<128x1024xbf16>, vector<1024x32xbf16>, vector<128x32xf32> -> vector<128x32xf32>
    %c0_3 = arith.constant 0 : index
    %c0_4 = arith.constant 0 : index
    %3 = vector.load %arg2[%c0_3, %c0_4] : memref<1x32xf32, #tpu.memory_space<vmem>>, vector<1x32xf32>
    %4 = vector.broadcast %3 : vector<1x32xf32> to vector<128x32xf32>
    %5 = arith.addf %2, %4 : vector<128x32xf32>
    %cst_5 = arith.constant 0.000000e+00 : f32
    %6 = vector.broadcast %cst_5 : f32 to vector<128x32xf32>
    %7 = arith.maximumf %5, %6 : vector<128x32xf32>
    %c0_6 = arith.constant 0 : index
    %c0_7 = arith.constant 0 : index
    %8 = vector.load %arg3[%c0_6, %c0_7] : memref<128x32xf32, #tpu.memory_space<vmem>>, vector<128x32xf32>
    tpu.vector_store %arg3[%c0_6, %c0_7], %7 {strides = array<i32>} : memref<128x32xf32, #tpu.memory_space<vmem>>, vector<128x32xf32>,
    return
  }
}

module attributes {stable_mosaic.version = 11 : i64} {
  func.func @_convT_out_kernel(%arg0: memref<512x512xbf16, #tpu.memory_space<vmem>>, %arg1: memref<1x512xbf16, #tpu.memory_space<vmem>>, %arg2: memref<1xf32, #tpu.memory_space<smem>>, %arg3: memref<1x512xf32, #tpu.memory_space<vmem>>) attributes {dimension_semantics = [], scalar_prefetch = 0 : i64, scratch_operands = 0 : i64, tpu.core_type = #tpu.core_type<tc>} {
    %c0 = arith.constant 0 : index
    %c0_0 = arith.constant 0 : index
    %0 = vector.load %arg1[%c0, %c0_0] : memref<1x512xbf16, #tpu.memory_space<vmem>>, vector<1x512xbf16>
    %c0_1 = arith.constant 0 : index
    %c0_2 = arith.constant 0 : index
    %1 = vector.load %arg0[%c0_1, %c0_2] : memref<512x512xbf16, #tpu.memory_space<vmem>>, vector<512x512xbf16>
    %cst = arith.constant dense<0.000000e+00> : vector<1x512xf32>
    %2 = tpu.matmul %0, %1, %cst {dimension_numbers = #tpu.dot_dimension_numbers<[1], [0], [0], [1], [0, 0, 1, 1], [], []>} : vector<1x512xbf16>, vector<512x512xbf16>, vector<1x512xf32> -> vector<1x512xf32>
    %c0_3 = arith.constant 0 : index
    %3 = memref.load %arg2[%c0_3] : memref<1xf32, #tpu.memory_space<smem>>
    %4 = vector.broadcast %3 : f32 to vector<1x512xf32>
    %5 = arith.addf %2, %4 : vector<1x512xf32>
    %6 = math.tanh %5 : vector<1x512xf32>
    %c0_4 = arith.constant 0 : index
    %c0_5 = arith.constant 0 : index
    %7 = vector.load %arg3[%c0_4, %c0_5] : memref<1x512xf32, #tpu.memory_space<vmem>>, vector<1x512xf32>
    tpu.vector_store %arg3[%c0_4, %c0_5], %6 {strides = array<i32>} : memref<1x512xf32, #tpu.memory_space<vmem>>, vector<1x512xf32>,
    return
  }
}

</mosaic_0001>

<bundles_post_ra>
// kernel: vae_forward.9
= control target key start
LH: loop header
LB: loop body
LE: loop exit
PB: predicated region body
PF: predicated region fallthrough
CT: control target
= control target key end

     0   :  { %12 = vsyncpa [#allocation4], 0  ;;  %s2567_s0 = inlined_call_operand.vmem [shape: bf16[128,16], index: 0, kind: input, shape index: {}]   ;;  %s2568_s1 = inlined_call_operand.hbm [shape: bf16[16,32], index: 1, kind: input, shape index: {}]   ;;  %s2569_s2 = inlined_call_operand.hbm [shape: f32[1,32], index: 2, kind: input, shape index: {}]   ;;  %s2570_s3 = inlined_call_operand.hbm [shape: bf16[32,40], index: 3, kind: input, shape index: {}]   ;;  %s2571_s4 = inlined_call_operand.hbm [shape: f32[1,40], index: 4, kind: input, shape index: {}]   ;;  %s2572_s5 = inlined_call_operand.<no memory space> [shape: f32[1], index: 5, kind: input, shape index: {}]   ;;  %s2573_s6 = inlined_call_operand.vmem [shape: f32[128,32], index: 6, kind: output, shape index: {}]  }
   0x1   :  { %13 = vsyncpa [#allocation6], 0 }
   0x2   :  { %14 = vsyncpa [#allocation9], 0  ;;  %s1948_s21 = smov [#allocation5]   ;;  %s1949_s23 = smov [#allocation3]  }
   0x3   :  { %s35_s22 = sshll.u32 %s1948_s21, 4  ;;  %s22_s24 = sshll.u32 %s1949_s23, 4  ;;  %s36_s22 = int_to_ptr.vmem [resolvable:$true] %s35_s22  ;;  %s1991_s24 = int_to_ptr.vmem [resolvable:$true] %s22_s24 }
   0x4   :  { %s1854_s27 = scalar_lea.hbm %s2569_s2, 16 }
   0x5   :  { %p1855_p0 = scmp.ne.s32.totalorder %s2569_s2, %s1854_s27  ;;  %p1858_p1 = scmp.lt.u32.totalorder %s1854_s27, %s2569_s2 }
   0x7   :  { %p1860_p2 = pnand %p1858_p1, %p1855_p0 }
   0x9   :  { %1863 = shalt.err (!%p1860_p2)
}
   0xa   :  { %s1864_s8 = scalar_lea.vmem %s36_s22, 16  ;;  %s1868_s9 = scalar_lea.vmem %s36_s22, 32 }
   0xb   :  { %p1865_p3 = scmp.ne.s32.totalorder %s36_s22, %s1864_s8  ;;  %p1869_p4 = scmp.lt.s32.totalorder %s36_s22, %s36_s22 }
   0xc   :  { %p1870_p5 = scmp.lt.s32.totalorder %s1868_s9, %s1864_s8 }
   0xe   :  { %p1871_p6 = por %p1870_p5, %p1869_p4 }
  0x10   :  { %p1872_p7 = pnand %p1871_p6, %p1865_p3 }
  0x12   :  { %1875 = shalt.err (!%p1872_p7)
}
  0x13   :  { %38 = dma.hbm_to_vmem [thread:$0]  %s2569_s2, 16, %s36_s22, [#allocation6]  }
  0x14   :  { %s1876_s14 = scalar_lea.hbm %s2568_s1, 128 }
  0x15   :  { %p1877_p8 = scmp.ne.s32.totalorder %s2568_s1, %s1876_s14  ;;  %p1880_p9 = scmp.lt.u32.totalorder %s1876_s14, %s2568_s1 }
  0x17   :  { %p1882_p10 = pnand %p1880_p9, %p1877_p8 }
  0x19   :  { %1885 = shalt.err (!%p1882_p10)
}
  0x1a   :  { %s1886_s19 = scalar_lea.vmem %s1991_s24, 128  ;;  %p1891_p12 = scmp.lt.s32.totalorder %s1991_s24, %s1991_s24 }
  0x1b   :  { %p1887_p11 = scmp.ne.s32.totalorder %s1991_s24, %s1886_s19  ;;  %p1892_p13 = scmp.lt.s32.totalorder %s1886_s19, %s1886_s19 }
  0x1d   :  { %p1893_p0 = por %p1892_p13, %p1891_p12 }
  0x1f   :  { %p1894_p1 = pnand %p1893_p0, %p1887_p11 }
  0x21   :  { %1897 = shalt.err (!%p1894_p1)
}
  0x22   :  { %s1950_s2 = smov 64   ;;  %s1951_s20 = smov 4  }
  0x23   :  { %28 = dma.hbm_to_vmem [thread:$0]  %s2568_s1, 128, %s1991_s24, [#allocation4], %s1950_s2, %s1950_s2, %s1951_s20  }
  0x24   :  { %s1952_s23 = smov [#allocation7]   ;;  %s1953_s26 = smov [#allocation8]  }
  0x25   :  { %s44_s25 = sshll.u32 %s1952_s23, 4  ;;  %s57_s27 = sshll.u32 %s1953_s26, 4  ;;  %s45_s25 = int_to_ptr.vmem [resolvable:$true] %s44_s25  ;;  %s58_s27 = int_to_ptr.vmem [resolvable:$true] %s57_s27 }
  0x26   :  { %s1898_s30 = scalar_lea.hbm %s2570_s3, 256 }
  0x27   :  { %p1899_p2 = scmp.ne.s32.totalorder %s2570_s3, %s1898_s30  ;;  %p1902_p3 = scmp.lt.u32.totalorder %s1898_s30, %s2570_s3 }
  0x29   :  { %p1904_p4 = pnand %p1902_p3, %p1899_p2 }
  0x2b   :  { %1907 = shalt.err (!%p1904_p4)
}
  0x2c   :  { %s1908_s1 = scalar_lea.vmem %s45_s25, 256  ;;  %p1913_p6 = scmp.lt.s32.totalorder %s45_s25, %s45_s25 }
  0x2d   :  { %p1909_p5 = scmp.ne.s32.totalorder %s45_s25, %s1908_s1  ;;  %p1914_p7 = scmp.lt.s32.totalorder %s1908_s1, %s1908_s1 }
  0x2f   :  { %p1915_p8 = por %p1914_p7, %p1913_p6 }
  0x31   :  { %p1916_p9 = pnand %p1915_p8, %p1909_p5 }
  0x33   :  { %1919 = shalt.err (!%p1916_p9)
}
  0x34   :  { %50 = dma.hbm_to_vmem [thread:$0]  %s2570_s3, 256, %s45_s25, [#allocation6], %s1950_s2, %s1950_s2, %s1951_s20  }
  0x35   :  { %s1920_s14 = scalar_lea.hbm %s2571_s4, 16 }
  0x36   :  { %p1921_p10 = scmp.ne.s32.totalorder %s2571_s4, %s1920_s14  ;;  %p1924_p11 = scmp.lt.u32.totalorder %s1920_s14, %s2571_s4 }
  0x38   :  { %p1926_p12 = pnand %p1924_p11, %p1921_p10 }
  0x3a   :  { %1929 = shalt.err (!%p1926_p12)
}
  0x3b   :  { %s1930_s19 = scalar_lea.vmem %s58_s27, 16  ;;  %s1934_s21 = scalar_lea.vmem %s58_s27, 32 }
  0x3c   :  { %p1931_p13 = scmp.ne.s32.totalorder %s58_s27, %s1930_s19  ;;  %p1935_p0 = scmp.lt.s32.totalorder %s58_s27, %s58_s27 }
  0x3d   :  { %p1936_p1 = scmp.lt.s32.totalorder %s1934_s21, %s1930_s19 }
  0x3f   :  { %p1937_p2 = por %p1936_p1, %p1935_p0 }
  0x41   :  { %p1938_p3 = pnand %p1937_p2, %p1931_p13 }
  0x43   :  { %1941 = shalt.err (!%p1938_p3)
}
  0x44   :  { %60 = dma.hbm_to_vmem [thread:$0]  %s2571_s4, 16, %s58_s27, [#allocation9]  }
  0x45   :  { %1942 = dma.done.wait [#allocation4], 128  }
  0x46   :  { %1943 = vsyncadd [#allocation4], 4294967168 }
  0x47   :  { %1944 = dma.done.wait [#allocation6], 272  }
  0x48   :  { %1945 = vsyncadd [#allocation6], 4294967024 }
  0x49   :  { %1946 = dma.done.wait [#allocation9], 16  }
  0x4a   :  { %1947 = vsyncadd [#allocation9], 4294967280  ;;  %v1779_v0 = vld [vmem:[#allocation3] sm:$0xff]   ;;  %vm147_vm0 = vcmask 130048   ;;  %v1781_v2 = vld [vmem:[%s2567_s0 + $0x8] sm:$0xff]   ;;  %vm316_vm1 = vcmask 261120  }
  0x4b   :  { %v1780_v1 = vld [vmem:[%s2567_s0] sm:$0xff]   ;;  %1461 = vmatprep.subr.bf16.mxu0 %v1779_v0  ;;  %v1782_v3 = vld [vmem:[%s2567_s0 + $0x10] sm:$0xff]   ;;  %v1783_v4 = vld [vmem:[%s2567_s0 + $0x18] sm:$0xff]   ;;  %vm463_vm2 = vcmask 31744   ;;  %s1955_s11 = smov 120   ;;  %vm601_vm4 = vcmask 523264  }
  0x4c   :  { %1462 = vmatpush3.bf16.msra.mxu0 %v1779_v0  ;;  %1463 = vmatprep.mubr.msk.bf16.mxu0 %vm147_vm0, %v1780_v1  ;;  %v1784_v5 = vld [vmem:[%s2567_s0 + $0x20] sm:$0xff]   ;;  %v1785_v6 = vld [vmem:[%s2567_s0 + $0x28] sm:$0xff]   ;;  %v1786_v7 = vld [vmem:[%s2567_s0 + $0x30] sm:$0xff]  }
  0x4d   :  { %v1787_v8 = vld [vmem:[%s2567_s0 + $0x38] sm:$0xff]   ;;  %v1788_v9 = vld [vmem:[#allocation7] sm:$0xff]   ;;  %v1301_v11 = vld [vmem:[#allocation5] ss:$0 sm:$0xff]  ;;  %s1954_s0 = smov 124  }
  0x4e   :  { %1479 = vmatprep.subr.bf16.mxu1 %v1788_v9  ;;  %v1789_v10 = vld [vmem:[#allocation7 + $0x8] sm:$0xff]   ;;  %vm2238_vm3 = vmpackc.low %vm463_vm2, %vm463_vm2 }
  0x4f   :  { %1464 = vmatmul.mubr.msk.bf16.vlgmr.msra.gmra.mrb[0].mxu0 %vm147_vm0, %v1781_v2  ;;  %1480 = vmatpush3.bf16.msra.mxu1 %v1788_v9 }
  0x50   :  { %1467 = vmatprep.mubr.msk.bf16.mxu0 %vm147_vm0, %v1782_v3  ;;  %1481 = vmatprep.subr.bf16.mxu1 %v1789_v10 }
  0x53   :  { %1482 = vmatpush3.bf16.msra.mxu1 %v1789_v10 }
  0x57   :  { %1468 = vmatmul.mubr.msk.bf16.gmra.mrb[4].mxu0 %vm147_vm0, %v1783_v4  ;;  %v1319_v4 = vld [vmem:[#allocation8] ss:$0 sm:$0xff] }
  0x58   :  { %1471 = vmatprep.mubr.msk.bf16.mxu0 %vm147_vm0, %v1784_v5 }
  0x5f   :  { %1472 = vmatmul.mubr.msk.bf16.gmra.mrb[8].mxu0 %vm147_vm0, %v1785_v6 }
  0x60   :  { %1475 = vmatprep.mubr.msk.bf16.mxu0 %vm147_vm0, %v1786_v7 }
  0x67   :  { %1476 = vmatmul.mubr.msk.bf16.gmra.mrb[12].mxu0 %vm147_vm0, %v1787_v8 }
 0x122   :  { %v1465_v12 = vpop.f32.mrb[0].mxu0 }
 0x123   :  { %v206_v13 = vpop.f32.mrb[1].mxu0  ;;  %v2080_v16 = vadd.f32 %v1465_v12, %v1301_v11 }
 0x124   :  { %v2078_v14 = vadd.f32 %v1301_v11, %v206_v13  ;;  %v1466_v15 = vpop.f32.mrb[2].mxu0 }
 0x125   :  { %v2082_v17 = vadd.f32 %v1466_v15, %v1301_v11  ;;  %v209_v18 = vpop.f32.mrb[3].mxu0  ;;  %v271_v23 = vmax.f32 %v2080_v16, 0.0 }
 0x126   :  { %v2084_v19 = vadd.f32 %v1301_v11, %v209_v18  ;;  %v269_v21 = vmax.f32 %v2078_v14, 0.0 }
 0x127   :  { %v272_v20 = vmax.f32 %v2082_v17, 0.0 }
 0x128   :  { %v270_v22 = vmax.f32 %v2084_v19, 0.0 }
 0x129   :  { %v286_v26 = vpack.c.bf16 %v272_v20, %v271_v23 }
 0x12a   :  { %v1469_v24 = vpop.f32.mrb[4].mxu0  ;;  %v285_v25 = vpack.c.bf16 %v270_v22, %v269_v21 }
 0x12b   :  { %v2098_v27 = vadd.f32 %v1469_v24, %v1301_v11  ;;  %v222_v28 = vpop.f32.mrb[5].mxu0 }
 0x12c   :  { %v2100_v29 = vadd.f32 %v1301_v11, %v222_v28  ;;  %v1470_v30 = vpop.f32.mrb[6].mxu0  ;;  %1483 = vmatprep.mubr.msk.bf16.mxu1 %vm316_vm1, %v285_v25 }
 0x12d   :  { %v275_v31 = vmax.f32 %v2098_v27, 0.0  ;;  %v2104_v32 = vadd.f32 %v1470_v30, %v1301_v11  ;;  %v225_v33 = vpop.f32.mrb[7].mxu0  ;;  %1484 = vmatmul.mubr.msk.bf16.vlgmr.msra.gmra.mrb[0].mxu1 %vm316_vm1, %v286_v26 }
 0x12e   :  { %v273_v34 = vmax.f32 %v2100_v29, 0.0  ;;  %v2108_v35 = vadd.f32 %v1301_v11, %v225_v33 }
 0x12f   :  { %v276_v36 = vmax.f32 %v2104_v32, 0.0 }
 0x130   :  { %v274_v37 = vmax.f32 %v2108_v35, 0.0 }
 0x131   :  { %v288_v38 = vpack.c.bf16 %v276_v36, %v275_v31 }
 0x132   :  { %v287_v39 = vpack.c.bf16 %v274_v37, %v273_v34  ;;  %v1473_v40 = vpop.f32.mrb[8].mxu0 }
 0x133   :  { %v2120_v41 = vadd.f32 %v1473_v40, %v1301_v11  ;;  %v238_v42 = vpop.f32.mrb[9].mxu0 }
 0x134   :  { %v2122_v43 = vadd.f32 %v1301_v11, %v238_v42  ;;  %v1474_v44 = vpop.f32.mrb[10].mxu0  ;;  %1487 = vmatprep.mubr.msk.bf16.mxu1 %vm316_vm1, %v287_v39 }
 0x135   :  { %v2578_v45 = vmax.f32 %v2120_v41, 0.0  ;;  %v2126_v46 = vadd.f32 %v1474_v44, %v1301_v11  ;;  %v241_v47 = vpop.f32.mrb[11].mxu0  ;;  %1488 = vmatmul.mubr.msk.bf16.gmra.mrb[4].mxu1 %vm316_vm1, %v288_v38 }
 0x136   :  { %v2580_v48 = vmax.f32 %v2122_v43, 0.0  ;;  %v2130_v49 = vadd.f32 %v1301_v11, %v241_v47  ;;  %v2585_v27 = vmax.f32 %v2122_v43, 0.0  ;;  %v2587_v43 = vmax.f32 %v2120_v41, 0.0 }
 0x137   :  { %v2579_v50 = vmax.f32 %v2126_v46, 0.0 }
 0x138   :  { %v2581_v51 = vmax.f32 %v2130_v49, 0.0  ;;  %v2584_v32 = vmax.f32 %v2130_v49, 0.0  ;;  %v2586_v49 = vmax.f32 %v2126_v46, 0.0 }
 0x139   :  { %v290_v52 = vpack.c.bf16 %v2579_v50, %v2578_v45 }
 0x13a   :  { %v289_v53 = vpack.c.bf16 %v2581_v51, %v2580_v48  ;;  %v1477_v54 = vpop.f32.mrb[12].mxu0 }
 0x13b   :  { %v2142_v55 = vadd.f32 %v1477_v54, %v1301_v11  ;;  %v254_v56 = vpop.f32.mrb[13].mxu0 }
 0x13c   :  { %v2144_v57 = vadd.f32 %v1301_v11, %v254_v56  ;;  %v1478_v58 = vpop.f32.mrb[14].mxu0  ;;  %1491 = vmatprep.mubr.msk.bf16.mxu1 %vm316_vm1, %v289_v53 }
 0x13d   :  { %v2574_v59 = vmax.f32 %v2142_v55, 0.0  ;;  %v2148_v60 = vadd.f32 %v1478_v58, %v1301_v11  ;;  %v257_v61 = vpop.f32.mrb[15].mxu0  ;;  %1492 = vmatmul.mubr.msk.bf16.gmra.mrb[8].mxu1 %vm316_vm1, %v290_v52 }
 0x13e   :  { %v2576_v62 = vmax.f32 %v2144_v57, 0.0  ;;  %v2152_v63 = vadd.f32 %v1301_v11, %v257_v61  ;;  %v2589_v41 = vmax.f32 %v2144_v57, 0.0  ;;  %v2591_v57 = vmax.f32 %v2142_v55, 0.0 }
 0x13f   :  { %v2575_v0 = vmax.f32 %v2148_v60, 0.0 }
 0x140   :  { %v2577_v1 = vmax.f32 %v2152_v63, 0.0  ;;  %v2588_v46 = vmax.f32 %v2152_v63, 0.0  ;;  %v2590_v63 = vmax.f32 %v2148_v60, 0.0 }
 0x141   :  { %v292_v2 = vpack.c.bf16 %v2575_v0, %v2574_v59 }
 0x142   :  { %v291_v3 = vpack.c.bf16 %v2577_v1, %v2576_v62 }
 0x144   :  { %1495 = vmatprep.mubr.msk.bf16.mxu1 %vm316_vm1, %v291_v3 }
 0x145   :  { %1496 = vmatmul.mubr.msk.bf16.gmra.mrb[12].mxu1 %vm316_vm1, %v292_v2 }
 0x200   :  { %v1485_v5 = vpop.f32.mrb[0].mxu1 }
 0x201   :  { %v375_v6 = vpop.f32.mrb[1].mxu1  ;;  %v2172_v13 = vadd.f32 %v1485_v5, %v1319_v4 }
 0x202   :  { %v376_v7 = vadd.f32 %v1319_v4, %v375_v6  ;;  %v1486_v8 = vpop.f32.mrb[2].mxu1 }
 0x203   :  { %v378_v9 = vpop.f32.mrb[3].mxu1  ;;  %v2169_v11 = vadd.f32 %v1486_v8, %v1319_v4 }
 0x204   :  { %v2166_v10 = vadd.f32 %v1319_v4, %v378_v9  ;;  %1515 = vmatprep.mubr.msk.f32.mxu0 %vm463_vm2, %v376_v7 }
 0x205   :  { %v1704_v26 = vpack.i.bf16 %v2169_v11, %v2172_v13 }
 0x206   :  { %v1699_v12 = vpack.i.bf16 %v2166_v10, %v376_v7 }
 0x208   :  { %v1489_v15 = vpop.f32.mrb[4].mxu1  ;;  %1700 = vrot.lane.b32.xlu0 %v1699_v12, %s1954_s0 }
 0x209   :  { %v391_v18 = vpop.f32.mrb[5].mxu1  ;;  %v2182_v33 = vadd.f32 %v1489_v15, %v1319_v4 }
 0x20a   :  { %v2175_v24 = vadd.f32 %v1319_v4, %v391_v18  ;;  %v1490_v25 = vpop.f32.mrb[6].mxu1 }
 0x20b   :  { %v394_v28 = vpop.f32.mrb[7].mxu1  ;;  %v2184_v38 = vadd.f32 %v1490_v25, %v1319_v4 }
 0x20c   :  { %v2179_v30 = vadd.f32 %v1319_v4, %v394_v28  ;;  %1705 = vrot.lane.b32.xlu0 %v1704_v26, %s1954_s0 }
 0x20d   :  { %v1714_v47 = vpack.i.bf16 %v2184_v38, %v2182_v33 }
 0x20e   :  { %v1709_v39 = vpack.i.bf16 %v2179_v30, %v2175_v24 }
 0x210   :  { %1710 = vrot.lane.b32.xlu1 %v1709_v39, %s1954_s0  ;;  %v1493_v40 = vpop.f32.mrb[8].mxu1 }
 0x211   :  { %v2189_v42 = vadd.f32 %v1493_v40, %v1319_v4  ;;  %v407_v44 = vpop.f32.mrb[9].mxu1 }
 0x212   :  { %v2193_v52 = vadd.f32 %v1319_v4, %v407_v44  ;;  %v1494_v53 = vpop.f32.mrb[10].mxu1 }
 0x213   :  { %v2195_v54 = vadd.f32 %v1494_v53, %v1319_v4  ;;  %v410_v56 = vpop.f32.mrb[11].mxu1 }
 0x214   :  { %1715 = vrot.lane.b32.xlu1 %v1714_v47, %s1954_s0  ;;  %v2198_v58 = vadd.f32 %v1319_v4, %v410_v56 }
 0x215   :  { %v2202_v61 = vpack.i.bf16 %v2195_v54, %v2189_v42 }
 0x216   :  { %v2206_v2 = vpack.i.bf16 %v2198_v58, %v2193_v52 }
 0x218   :  { %v1497_v3 = vpop.f32.mrb[12].mxu1  ;;  %1725 = vrot.lane.b32.xlu1 %v2202_v61, %s1954_s0  ;;  %1720 = vrot.lane.b32.xlu0 %v2206_v2, %s1954_s0 }
 0x219   :  { %v2212_v5 = vadd.f32 %v1497_v3, %v1319_v4  ;;  %v423_v6 = vpop.f32.mrb[13].mxu1 }
 0x21a   :  { %v2214_v7 = vadd.f32 %v1319_v4, %v423_v6  ;;  %v1498_v8 = vpop.f32.mrb[14].mxu1 }
 0x21b   :  { %v2216_v9 = vadd.f32 %v1498_v8, %v1319_v4  ;;  %v426_v15 = vpop.f32.mrb[15].mxu1 }
 0x21c   :  { %v2218_v18 = vadd.f32 %v1319_v4, %v426_v15 }
 0x21d   :  { %v2222_v25 = vpack.i.bf16 %v2216_v9, %v2212_v5 }
 0x21e   :  { %v2226_v28 = vpack.i.bf16 %v2218_v18, %v2214_v7 }
 0x21f   :  { %1735 = vrot.lane.b32.xlu1 %v2222_v25, %s1954_s0 }
 0x220   :  { %1730 = vrot.lane.b32.xlu0 %v2226_v28, %s1954_s0 }
 0x223   :  { %1740 = vrot.lane.b32.xlu1 %v1699_v12, %s1955_s11 }
 0x224   :  { %1745 = vrot.lane.b32.xlu0 %v1704_v26, %s1955_s11 }
 0x227   :  { %1750 = vrot.lane.b32.xlu1 %v1709_v39, %s1955_s11 }
 0x22b   :  { %1755 = vrot.lane.b32.xlu1 %v1714_v47, %s1955_s11 }
 0x27a   :  { %v1701_v4 = vpop.permute.xlu0 %1700 }
 0x27b   :  { %v1703_v40 = vunpack.i.h.bf16 %v1701_v4  ;;  %v1702_v44 = vunpack.i.l.bf16 %v1701_v4 }
 0x27d   :  { %v1611_v56 = vpack.c.bf16 %v1703_v40, %v1702_v44 }
 0x27e   :  { %v1706_v3 = vpop.permute.xlu0 %1705 }
 0x27f   :  { %v1708_v6 = vunpack.i.h.bf16 %v1706_v3  ;;  %v1707_v8 = vunpack.i.l.bf16 %v1706_v3  ;;  %1613 = vmatprep.subr.msk.bf16.mxu0 %vm2238_vm3, %v1611_v56 }
 0x280   :  { %1616 = vmatpush3.bf16.xpose.msk.msra.mxu0 %vm2238_vm3, %v1611_v56 }
 0x281   :  { %v1617_v12 = vpack.c.bf16 %v1708_v6, %v1707_v8 }
 0x282   :  { %v1711_v26 = vpop.permute.xlu1 %1710 }
 0x283   :  { %v1713_v39 = vunpack.i.h.bf16 %v1711_v26  ;;  %v1712_v47 = vunpack.i.l.bf16 %v1711_v26  ;;  %1619 = vmatprep.subr.msk.bf16.mxu0 %vm2238_vm3, %v1617_v12 }
 0x285   :  { %v1623_v15 = vpack.c.bf16 %v1713_v39, %v1712_v47 }
 0x286   :  { %v1716_v4 = vpop.permute.xlu1 %1715 }
 0x287   :  { %v1718_v40 = vunpack.i.h.bf16 %v1716_v4  ;;  %v1717_v44 = vunpack.i.l.bf16 %v1716_v4 }
 0x288   :  { %1622 = vmatpush3.bf16.xpose.msk.msra.mxu0 %vm2238_vm3, %v1617_v12 }
 0x289   :  { %1625 = vmatprep.subr.msk.bf16.mxu0 %vm2238_vm3, %v1623_v15  ;;  %v1629_v56 = vpack.c.bf16 %v1718_v40, %v1717_v44 }
 0x28a   :  { %v1726_v3 = vpop.permute.xlu1 %1725  ;;  %v1721_v59 = vpop.permute.xlu0 %1720 }
 0x28b   :  { %v1723_v6 = vunpack.i.h.bf16 %v1721_v59  ;;  %v1722_v8 = vunpack.i.l.bf16 %v1721_v59 }
 0x28d   :  { %v1651_v47 = vpack.c.bf16 %v1723_v6, %v1722_v8  ;;  %v1728_v6 = vunpack.i.h.bf16 %v1726_v3  ;;  %v1727_v8 = vunpack.i.l.bf16 %v1726_v3 }
 0x290   :  { %1628 = vmatpush3.bf16.xpose.msk.msra.mxu0 %vm2238_vm3, %v1623_v15 }
 0x291   :  { %v1736_v26 = vpop.permute.xlu1 %1735  ;;  %1631 = vmatprep.subr.msk.bf16.mxu0 %vm2238_vm3, %v1629_v56 }
 0x292   :  { %v1731_v39 = vpop.permute.xlu0 %1730 }
 0x295   :  { %v1741_v12 = vpop.permute.xlu1 %1740 }
 0x296   :  { %v1743_v0 = vunpack.i.h.bf16 %v1741_v12  ;;  %v1742_v62 = vunpack.i.l.bf16 %v1741_v12  ;;  %v1746_v1 = vpop.permute.xlu0 %1745 }
 0x297   :  { %v1748_v45 = vunpack.i.h.bf16 %v1746_v1  ;;  %v1747_v4 = vunpack.i.l.bf16 %v1746_v1 }
 0x298   :  { %v1635_v50 = vpack.c.bf16 %v1743_v0, %v1742_v62  ;;  %1634 = vmatpush3.bf16.xpose.msk.msra.mxu0 %vm2238_vm3, %v1629_v56  ;;  %v1732_v62 = vunpack.i.l.bf16 %v1731_v39 }
 0x299   :  { %v1639_v40 = vpack.c.bf16 %v1748_v45, %v1747_v4  ;;  %v1751_v15 = vpop.permute.xlu1 %1750  ;;  %1653 = vmatprep.subr.msk.bf16.mxu0 %vm2238_vm3, %v1651_v47  ;;  %v1657_v45 = vpack.c.bf16 %v1728_v6, %v1727_v8 }
 0x29a   :  { %v1753_v59 = vunpack.i.h.bf16 %v1751_v15  ;;  %v1752_v44 = vunpack.i.l.bf16 %v1751_v15  ;;  %1636 = vmatprep.subr.bf16.mxu1 %v1635_v50 }
 0x29b   :  { %1638 = vmatpush3.bf16.msra.mxu1 %v1635_v50  ;;  %v1733_v50 = vunpack.i.h.bf16 %v1731_v39 }
 0x29c   :  { %1640 = vmatprep.subr.bf16.mxu1 %v1639_v40  ;;  %v1643_v48 = vpack.c.bf16 %v1753_v59, %v1752_v44 }
 0x29d   :  { %v1756_v12 = vpop.permute.xlu1 %1755 }
 0x29e   :  { %v1758_v51 = vunpack.i.h.bf16 %v1756_v12  ;;  %v1757_v1 = vunpack.i.l.bf16 %v1756_v12 }
 0x29f   :  { %1516 = vmatmul.mubr.msk.f32.vlgmr.msra.gmra.mrb[16].mxu0 %vm463_vm2, %v2166_v10  ;;  %1642 = vmatpush3.bf16.msra.mxu1 %v1639_v40  ;;  %v1663_v10 = vpack.c.bf16 %v1733_v50, %v1732_v62 }
 0x2a0   :  { %1518 = vmatprep.mubr.msk.f32.mxu0 %vm463_vm2, %v2172_v13  ;;  %1644 = vmatprep.subr.bf16.mxu1 %v1643_v48  ;;  %v1647_v0 = vpack.c.bf16 %v1758_v51, %v1757_v1  ;;  %v1737_v51 = vunpack.i.l.bf16 %v1736_v26 }
 0x2a1   :  { %1656 = vmatpush3.bf16.xpose.msk.msra.mxu0 %vm2238_vm3, %v1651_v47 }
 0x2a2   :  { %1659 = vmatprep.subr.msk.bf16.mxu0 %vm2238_vm3, %v1657_v45 }
 0x2a3   :  { %1519 = vmatmul.mubr.msk.f32.gmra.mrb[18].mxu0 %vm463_vm2, %v2169_v11  ;;  %1646 = vmatpush3.bf16.msra.mxu1 %v1643_v48  ;;  %v1738_v48 = vunpack.i.h.bf16 %v1736_v26 }
 0x2a4   :  { %1521 = vmatprep.mubr.msk.f32.mxu0 %vm463_vm2, %v2175_v24  ;;  %1648 = vmatprep.subr.bf16.mxu1 %v1647_v0 }
 0x2a5   :  { %v1669_v11 = vpack.c.bf16 %v1738_v48, %v1737_v51 }
 0x2a7   :  { %1522 = vmatmul.mubr.msk.f32.gmra.mrb[20].mxu0 %vm463_vm2, %v2179_v30  ;;  %1650 = vmatpush3.bf16.msra.mxu1 %v1647_v0 }
 0x2a8   :  { %1524 = vmatprep.mubr.msk.f32.mxu0 %vm463_vm2, %v2182_v33 }
 0x2a9   :  { %1662 = vmatpush3.bf16.xpose.msk.msra.mxu0 %vm2238_vm3, %v1657_v45 }
 0x2aa   :  { %1665 = vmatprep.subr.msk.bf16.mxu0 %vm2238_vm3, %v1663_v10 }
 0x2ab   :  { %1525 = vmatmul.mubr.msk.f32.gmra.mrb[22].mxu0 %vm463_vm2, %v2184_v38 }
 0x2ac   :  { %1571 = vmatprep.mubr.msk.f32.mxu0 %vm463_vm2, %v2193_v52 }
 0x2b1   :  { %1668 = vmatpush3.bf16.xpose.msk.msra.mxu0 %vm2238_vm3, %v1663_v10 }
 0x2b2   :  { %1671 = vmatprep.subr.msk.bf16.mxu0 %vm2238_vm3, %v1669_v11 }
 0x2b9   :  { %1674 = vmatpush3.bf16.xpose.msk.msra.mxu0 %vm2238_vm3, %v1669_v11 }
 0x2c0   :  { %1572 = vmatmul.mubr.msk.f32.vlgmr.msra.gmra.mrb[24].mxu0 %vm463_vm2, %v2198_v58 }
 0x2c1   :  { %1574 = vmatprep.mubr.msk.f32.mxu0 %vm463_vm2, %v2189_v42 }
 0x2c4   :  { %1575 = vmatmul.mubr.msk.f32.gmra.mrb[26].mxu0 %vm463_vm2, %v2195_v54 }
 0x2c5   :  { %1577 = vmatprep.mubr.msk.f32.mxu0 %vm463_vm2, %v2214_v7 }
 0x2c8   :  { %1578 = vmatmul.mubr.msk.f32.gmra.mrb[28].mxu0 %vm463_vm2, %v2218_v18 }
 0x2c9   :  { %1580 = vmatprep.mubr.msk.f32.mxu0 %vm463_vm2, %v2212_v5 }
 0x2cc   :  { %1581 = vmatmul.mubr.msk.f32.gmra.mrb[30].mxu0 %vm463_vm2, %v2216_v9 }
 0x372   :  { %v1517_v13 = vpop.f32.mrb[16].mxu0 }
 0x373   :  { %v562_v24 = vpop.f32.mrb[17].mxu0  ;;  %v605_v30 = vsel %vm601_vm4, %v1517_v13, -inf }
 0x374   :  { %606 = vmax.xlane.f32.xlu1 %v605_v30  ;;  %v602_v33 = vsel %vm601_vm4, %v562_v24, -inf }
 0x375   :  { %603 = vmax.xlane.f32.xlu0 %v602_v33 }
 0x376   :  { %v1520_v38 = vpop.f32.mrb[18].mxu0 }
 0x377   :  { %v572_v42 = vpop.f32.mrb[19].mxu0  ;;  %v611_v52 = vsel %vm601_vm4, %v1520_v38, -inf }
 0x378   :  { %v608_v5 = vsel %vm601_vm4, %v572_v42, -inf }
 0x379   :  { %612 = vmax.xlane.f32.xlu0 %v611_v52 }
 0x37a   :  { %v2307_v54 = vpop.f32.mrb[20].mxu0 }
 0x37b   :  { %v582_v58 = vpop.f32.mrb[21].mxu0  ;;  %v617_v53 = vsel %vm601_vm4, %v2307_v54, -inf }
 0x37c   :  { %v614_v7 = vsel %vm601_vm4, %v582_v58, -inf }
 0x37d   :  { %609 = vmax.xlane.f32.xlu0 %v608_v5  ;;  %615 = vmax.xlane.f32.xlu1 %v614_v7 }
 0x37e   :  { %v2311_v9 = vpop.f32.mrb[22].mxu0 }
 0x37f   :  { %v2313_v18 = vpop.f32.mrb[23].mxu0  ;;  %v623_v56 = vsel %vm601_vm4, %v2311_v9, -inf }
 0x380   :  { %v620_v3 = vsel %vm601_vm4, %v2313_v18, -inf }
 0x381   :  { %618 = vmax.xlane.f32.xlu0 %v617_v53  ;;  %621 = vmax.xlane.f32.xlu1 %v620_v3 }
 0x385   :  { %624 = vmax.xlane.f32.xlu0 %v623_v56 }
 0x393   :  { %v2321_v26 = vpop.f32.mrb[24].mxu0 }
 0x394   :  { %v2323_v39 = vpop.f32.mrb[25].mxu0  ;;  %v1032_v47 = vsel %vm601_vm4, %v2321_v26, -inf }
 0x395   :  { %1033 = vmax.xlane.f32.xlu0 %v1032_v47  ;;  %v1029_v4 = vsel %vm601_vm4, %v2323_v39, -inf }
 0x396   :  { %1030 = vmax.xlane.f32.xlu1 %v1029_v4 }
 0x397   :  { %v2329_v40 = vpop.f32.mrb[26].mxu0 }
 0x398   :  { %v2331_v15 = vpop.f32.mrb[27].mxu0  ;;  %v1038_v59 = vsel %vm601_vm4, %v2329_v40, -inf }
 0x399   :  { %1039 = vmax.xlane.f32.xlu0 %v1038_v59  ;;  %v1035_v44 = vsel %vm601_vm4, %v2331_v15, -inf }
 0x39a   :  { %1036 = vmax.xlane.f32.xlu1 %v1035_v44 }
 0x39b   :  { %v2337_v6 = vpop.f32.mrb[28].mxu0 }
 0x39c   :  { %v2339_v8 = vpop.f32.mrb[29].mxu0  ;;  %v1044_v12 = vsel %vm601_vm4, %v2337_v6, -inf }
 0x39d   :  { %1045 = vmax.xlane.f32.xlu0 %v1044_v12  ;;  %v1041_v1 = vsel %vm601_vm4, %v2339_v8, -inf }
 0x39e   :  { %1042 = vmax.xlane.f32.xlu1 %v1041_v1 }
 0x39f   :  { %v2345_v45 = vpop.f32.mrb[30].mxu0 }
 0x3a0   :  { %v2347_v50 = vpop.f32.mrb[31].mxu0  ;;  %v1050_v62 = vsel %vm601_vm4, %v2345_v45, -inf }
 0x3a1   :  { %1051 = vmax.xlane.f32.xlu0 %v1050_v62  ;;  %v1047_v0 = vsel %vm601_vm4, %v2347_v50, -inf }
 0x3a2   :  { %1048 = vmax.xlane.f32.xlu1 %v1047_v0 }
 0x3b3   :  { %1765 = vrot.lane.b32.xlu1 %v2202_v61, %s1955_s11 }
 0x3b7   :  { %1760 = vrot.lane.b32.xlu0 %v2206_v2, %s1955_s11 }
 0x401   :  { %v607_v10 = vpop.xlane.xlu1 %606 }
 0x402   :  { %v627_v48 = vsub.f32 %v1517_v13, %v607_v10  ;;  %v604_v51 = vpop.xlane.xlu0 %603 }
 0x403   :  { %v626_v11 = vsub.f32 %v562_v24, %v604_v51 }
 0x404   :  { %v636_v30 = vmul.f32 1.442695, %v627_v48 }
 0x405   :  { %v634_v33 = vmul.f32 1.442695, %v626_v11 }
 0x406   :  { %1790 = vpow2.f32 %v636_v30  ;;  %v613_v52 = vpop.xlane.xlu0 %612 }
 0x407   :  { %1792 = vpow2.f32 %v634_v33  ;;  %v629_v5 = vsub.f32 %v1520_v38, %v613_v52 }
 0x409   :  { %v640_v7 = vmul.f32 1.442695, %v629_v5 }
 0x40a   :  { %v610_v53 = vpop.xlane.xlu0 %609  ;;  %v616_v3 = vpop.xlane.xlu1 %615 }
 0x40b   :  { %1794 = vpow2.f32 %v640_v7  ;;  %v628_v56 = vsub.f32 %v572_v42, %v610_v53  ;;  %v630_v47 = vsub.f32 %v582_v58, %v616_v3 }
 0x40d   :  { %v638_v61 = vmul.f32 1.442695, %v628_v56  ;;  %v642_v4 = vmul.f32 1.442695, %v630_v47 }
 0x40e   :  { %v619_v59 = vpop.xlane.xlu0 %618  ;;  %v622_v2 = vpop.xlane.xlu1 %621 }
 0x40f   :  { %1796 = vpow2.f32 %v638_v61  ;;  %v631_v13 = vsub.f32 %v2307_v54, %v619_v59  ;;  %v632_v38 = vsub.f32 %v2313_v18, %v622_v2 }
 0x410   :  { %v2358_v24 = vpop.eup %1790  ;;  %1798 = vpow2.f32 %v642_v4 }
 0x411   :  { %v2360_v44 = vpop.eup %1792  ;;  %v644_v12 = vmul.f32 1.442695, %v631_v13  ;;  %v653_v1 = vsel %vm601_vm4, %v2358_v24, 0.0  ;;  %v646_v0 = vmul.f32 1.442695, %v632_v38 }
 0x412   :  { %v625_v42 = vpop.xlane.xlu0 %624  ;;  %654 = vadd.xlane.f32.xlu0 %v653_v1  ;;  %v650_v58 = vsel %vm601_vm4, %v2360_v44, 0.0 }
 0x413   :  { %1800 = vpow2.f32 %v644_v12  ;;  %v633_v62 = vsub.f32 %v2311_v9, %v625_v42  ;;  %651 = vadd.xlane.f32.xlu1 %v650_v58 }
 0x415   :  { %v2368_v54 = vpop.eup %1794  ;;  %v648_v10 = vmul.f32 1.442695, %v633_v62 }
 0x416   :  { %v659_v48 = vsel %vm601_vm4, %v2368_v54, 0.0 }
 0x417   :  { %1802 = vpow2.f32 %v648_v10  ;;  %660 = vadd.xlane.f32.xlu0 %v659_v48 }
 0x418   :  { %1804 = vpow2.f32 %v646_v0 }
 0x419   :  { %v2372_v18 = vpop.eup %1796 }
 0x41a   :  { %v656_v51 = vsel %vm601_vm4, %v2372_v18, 0.0  ;;  %v2376_v11 = vpop.eup %1798 }
 0x41b   :  { %657 = vadd.xlane.f32.xlu1 %v656_v51  ;;  %v662_v33 = vsel %vm601_vm4, %v2376_v11, 0.0 }
 0x41d   :  { %v2378_v9 = vpop.eup %1800 }
 0x41e   :  { %v665_v30 = vsel %vm601_vm4, %v2378_v9, 0.0 }
 0x41f   :  { %666 = vadd.xlane.f32.xlu0 %v665_v30  ;;  %663 = vadd.xlane.f32.xlu1 %v662_v33 }
 0x421   :  { %v2384_v52 = vpop.eup %1802 }
 0x422   :  { %v1034_v5 = vpop.xlane.xlu0 %1033  ;;  %v671_v7 = vsel %vm601_vm4, %v2384_v52, 0.0  ;;  %v2388_v53 = vpop.eup %1804 }
 0x423   :  { %v1054_v3 = vsub.f32 %v2321_v26, %v1034_v5  ;;  %v1031_v56 = vpop.xlane.xlu1 %1030  ;;  %672 = vadd.xlane.f32.xlu0 %v671_v7  ;;  %v668_v2 = vsel %vm601_vm4, %v2388_v53, 0.0 }
 0x424   :  { %v1053_v47 = vsub.f32 %v2323_v39, %v1031_v56 }
 0x425   :  { %v1063_v61 = vmul.f32 1.442695, %v1054_v3 }
 0x426   :  { %v1061_v4 = vmul.f32 1.442695, %v1053_v47  ;;  %v1040_v59 = vpop.xlane.xlu0 %1039 }
 0x427   :  { %1806 = vpow2.f32 %v1063_v61  ;;  %v1056_v13 = vsub.f32 %v2329_v40, %v1040_v59  ;;  %v1037_v12 = vpop.xlane.xlu1 %1036  ;;  %669 = vadd.xlane.f32.xlu0 %v668_v2 }
 0x428   :  { %1808 = vpow2.f32 %v1061_v4  ;;  %v1055_v38 = vsub.f32 %v2331_v15, %v1037_v12 }
 0x429   :  { %v1067_v1 = vmul.f32 1.442695, %v1056_v13 }
 0x42a   :  { %v1065_v26 = vmul.f32 1.442695, %v1055_v38  ;;  %v1046_v42 = vpop.xlane.xlu0 %1045 }
 0x42b   :  { %1810 = vpow2.f32 %v1067_v1  ;;  %v1058_v39 = vsub.f32 %v2337_v6, %v1046_v42  ;;  %v1043_v58 = vpop.xlane.xlu1 %1042 }
 0x42c   :  { %v1057_v62 = vsub.f32 %v2339_v8, %v1043_v58  ;;  %1812 = vpow2.f32 %v1065_v26 }
 0x42d   :  { %v1071_v0 = vmul.f32 1.442695, %v1058_v39 }
 0x42e   :  { %v1069_v10 = vmul.f32 1.442695, %v1057_v62  ;;  %v1052_v48 = vpop.xlane.xlu0 %1051 }
 0x42f   :  { %1814 = vpow2.f32 %v1071_v0  ;;  %v1060_v40 = vsub.f32 %v2345_v45, %v1052_v48  ;;  %v1049_v51 = vpop.xlane.xlu1 %1048 }
 0x430   :  { %v1059_v30 = vsub.f32 %v2347_v50, %v1049_v51  ;;  %1816 = vpow2.f32 %v1069_v10 }
 0x431   :  { %v2400_v15 = vpop.eup %1806  ;;  %v1075_v33 = vmul.f32 1.442695, %v1060_v40 }
 0x432   :  { %v2402_v5 = vpop.eup %1808  ;;  %v1073_v6 = vmul.f32 1.442695, %v1059_v30  ;;  %v1761_v7 = vpop.permute.xlu0 %1760  ;;  %v1080_v8 = vsel %vm601_vm4, %v2400_v15, 0.0 }
 0x433   :  { %1818 = vpow2.f32 %v1075_v33  ;;  %v1763_v3 = vunpack.i.h.bf16 %v1761_v7  ;;  %v1762_v56 = vunpack.i.l.bf16 %v1761_v7  ;;  %1081 = vadd.xlane.f32.xlu0 %v1080_v8  ;;  %v1077_v45 = vsel %vm601_vm4, %v2402_v5, 0.0  ;;  %v1766_v58 = vpop.permute.xlu1 %1765 }
 0x434   :  { %1078 = vadd.xlane.f32.xlu1 %v1077_v45  ;;  %1820 = vpow2.f32 %v1073_v6  ;;  %v1768_v30 = vunpack.i.h.bf16 %v1766_v58  ;;  %v1767_v33 = vunpack.i.l.bf16 %v1766_v58 }
 0x435   :  { %v2408_v50 = vpop.eup %1810  ;;  %v1675_v47 = vpack.c.bf16 %v1763_v3, %v1762_v56 }
 0x436   :  { %v1086_v61 = vsel %vm601_vm4, %v2408_v50, 0.0  ;;  %v2412_v4 = vpop.eup %1812 }
 0x437   :  { %1676 = vmatprep.subr.bf16.mxu1 %v1675_v47  ;;  %1087 = vadd.xlane.f32.xlu0 %v1086_v61  ;;  %v1083_v13 = vsel %vm601_vm4, %v2412_v4, 0.0 }
 0x439   :  { %v2414_v59 = vpop.eup %1814 }
 0x43a   :  { %v1092_v2 = vsel %vm601_vm4, %v2414_v59, 0.0  ;;  %v2420_v12 = vpop.eup %1816 }
 0x43b   :  { %1093 = vadd.xlane.f32.xlu1 %v1092_v2  ;;  %1084 = vadd.xlane.f32.xlu0 %v1083_v13  ;;  %v1089_v26 = vsel %vm601_vm4, %v2420_v12, 0.0 }
 0x43d   :  { %v2422_v38 = vpop.eup %1818 }
 0x43e   :  { %v1098_v1 = vsel %vm601_vm4, %v2422_v38, 0.0  ;;  %v2428_v42 = vpop.eup %1820 }
 0x43f   :  { %1099 = vadd.xlane.f32.xlu1 %v1098_v1  ;;  %1090 = vadd.xlane.f32.xlu0 %v1089_v26  ;;  %v1095_v39 = vsel %vm601_vm4, %v2428_v42, 0.0 }
 0x443   :  { %1096 = vadd.xlane.f32.xlu0 %v1095_v39 }
 0x450   :  { %1775 = vrot.lane.b32.xlu1 %v2222_v25, %s1955_s11 }
 0x459   :  { %1770 = vrot.lane.b32.xlu0 %v2226_v28, %s1955_s11  ;;  %v1679_v28 = vpack.c.bf16 %v1768_v30, %v1767_v33 }
 0x49f   :  { %v655_v62 = vpop.xlane.xlu0 %654 }
 0x4a0   :  { %1822 = vrcp.f32 %v655_v62  ;;  %v652_v0 = vpop.xlane.xlu1 %651 }
 0x4a1   :  { %1824 = vrcp.f32 %v652_v0 }
 0x4a4   :  { %v661_v10 = vpop.xlane.xlu0 %660 }
 0x4a5   :  { %1826 = vrcp.f32 %v661_v10 }
 0x4a8   :  { %v658_v48 = vpop.xlane.xlu1 %657 }
 0x4a9   :  { %1828 = vrcp.f32 %v658_v48 }
 0x4aa   :  { %v1823_v40 = vpop.eup %1822 }
 0x4ab   :  { %v1825_v51 = vpop.eup %1824  ;;  %v683_v8 = vmul.f32 %v1823_v40, %v2358_v24 }
 0x4ac   :  { %v667_v6 = vpop.xlane.xlu0 %666  ;;  %v664_v7 = vpop.xlane.xlu1 %663  ;;  %v682_v25 = vmul.f32 %v1825_v51, %v2360_v44 }
 0x4ad   :  { %1830 = vrcp.f32 %v667_v6 }
 0x4ae   :  { %1832 = vrcp.f32 %v664_v7  ;;  %1543 = vmatprep.mubr.msk.f32.mxu1 %vm601_vm4, %v682_v25 }
 0x4af   :  { %1544 = vmatmul.mubr.msk.f32.vlgmr.msra.gmra.mrb[16].mxu1 %vm601_vm4, %v683_v8  ;;  %v1827_v56 = vpop.eup %1826 }
 0x4b0   :  { %1678 = vmatpush3.bf16.msra.mxu1 %v1675_v47  ;;  %v673_v3 = vpop.xlane.xlu0 %672  ;;  %v685_v24 = vmul.f32 %v1827_v56, %v2368_v54 }
 0x4b1   :  { %1680 = vmatprep.subr.bf16.mxu1 %v1679_v28  ;;  %1834 = vrcp.f32 %v673_v3 }
 0x4b3   :  { %v1829_v45 = vpop.eup %1828 }
 0x4b4   :  { %1682 = vmatpush3.bf16.msra.mxu1 %v1679_v28  ;;  %v670_v61 = vpop.xlane.xlu0 %669  ;;  %v684_v2 = vmul.f32 %v1829_v45, %v2372_v18 }
 0x4b5   :  { %1836 = vrcp.f32 %v670_v61 }
 0x4b6   :  { %1546 = vmatprep.mubr.msk.f32.mxu1 %vm601_vm4, %v684_v2 }
 0x4b7   :  { %v1831_v44 = vpop.eup %1830  ;;  %1547 = vmatmul.mubr.msk.f32.gmra.mrb[18].mxu1 %vm601_vm4, %v685_v24 }
 0x4b8   :  { %v1833_v13 = vpop.eup %1832  ;;  %v687_v47 = vmul.f32 %v1831_v44, %v2378_v9 }
 0x4b9   :  { %v686_v1 = vmul.f32 %v1833_v13, %v2376_v11 }
 0x4bb   :  { %1549 = vmatprep.mubr.msk.f32.mxu1 %vm601_vm4, %v686_v1  ;;  %v1835_v26 = vpop.eup %1834 }
 0x4bc   :  { %1550 = vmatmul.mubr.msk.f32.gmra.mrb[20].mxu1 %vm601_vm4, %v687_v47  ;;  %v689_v62 = vmul.f32 %v1835_v26, %v2384_v52 }
 0x4bf   :  { %v1837_v39 = vpop.eup %1836 }
 0x4c0   :  { %v1082_v18 = vpop.xlane.xlu0 %1081  ;;  %v688_v58 = vmul.f32 %v1837_v39, %v2388_v53 }
 0x4c1   :  { %v1079_v54 = vpop.xlane.xlu1 %1078 }
 0x4c2   :  { %1838 = vrcp.f32 %v1079_v54  ;;  %1552 = vmatprep.mubr.msk.f32.mxu1 %vm601_vm4, %v688_v58 }
 0x4c3   :  { %1553 = vmatmul.mubr.msk.f32.gmra.mrb[22].mxu1 %vm601_vm4, %v689_v62  ;;  %1840 = vrcp.f32 %v1082_v18 }
 0x4c4   :  { %v1088_v9 = vpop.xlane.xlu0 %1087 }
 0x4c8   :  { %v1085_v0 = vpop.xlane.xlu0 %1084  ;;  %v1094_v11 = vpop.xlane.xlu1 %1093 }
 0x4c9   :  { %1842 = vrcp.f32 %v1085_v0 }
 0x4ca   :  { %1844 = vrcp.f32 %v1088_v9 }
 0x4cc   :  { %v1839_v10 = vpop.eup %1838  ;;  %v1091_v48 = vpop.xlane.xlu0 %1090 }
 0x4cd   :  { %v1100_v40 = vpop.xlane.xlu1 %1099  ;;  %v1109_v51 = vmul.f32 %v1839_v10, %v2402_v5  ;;  %1846 = vrcp.f32 %v1091_v48  ;;  %v1841_v5 = vpop.eup %1840 }
 0x4ce   :  { %1848 = vrcp.f32 %v1094_v11  ;;  %v1110_v56 = vmul.f32 %v1841_v5, %v2400_v15 }
 0x4cf   :  { %1599 = vmatprep.mubr.msk.f32.mxu1 %vm601_vm4, %v1109_v51 }
 0x4d0   :  { %v1097_v30 = vpop.xlane.xlu0 %1096 }
 0x4d1   :  { %v1776_v53 = vpop.permute.xlu1 %1775  ;;  %1850 = vrcp.f32 %v1097_v30 }
 0x4d2   :  { %v1778_v33 = vunpack.i.h.bf16 %v1776_v53  ;;  %v1777_v6 = vunpack.i.l.bf16 %v1776_v53  ;;  %1852 = vrcp.f32 %v1100_v40 }
 0x4d3   :  { %v1843_v3 = vpop.eup %1842 }
 0x4d4   :  { %v1771_v52 = vpop.permute.xlu0 %1770  ;;  %v1687_v28 = vpack.c.bf16 %v1778_v33, %v1777_v6  ;;  %v1845_v45 = vpop.eup %1844  ;;  %v1111_v61 = vmul.f32 %v1843_v3, %v2412_v4 }
 0x4d5   :  { %v1773_v7 = vunpack.i.h.bf16 %v1771_v52  ;;  %v1772_v25 = vunpack.i.l.bf16 %v1771_v52  ;;  %v1112_v24 = vmul.f32 %v1845_v45, %v2408_v50  ;;  %v843_v50 = vstv %s2572_s5 }
 0x4d7   :  { %v1683_v8 = vpack.c.bf16 %v1773_v7, %v1772_v25  ;;  %v1847_v2 = vpop.eup %1846 }
 0x4d8   :  { %v1849_v44 = vpop.eup %1848  ;;  %v1113_v13 = vmul.f32 %v1847_v2, %v2420_v12 }
 0x4d9   :  { %1684 = vmatprep.subr.bf16.mxu1 %v1683_v8  ;;  %v1114_v15 = vmul.f32 %v1849_v44, %v2414_v59 }
 0x4da   :  { %1686 = vmatpush3.bf16.msra.mxu1 %v1683_v8 }
 0x4db   :  { %1688 = vmatprep.subr.bf16.mxu1 %v1687_v28  ;;  %v1851_v47 = vpop.eup %1850 }
 0x4dc   :  { %v1853_v1 = vpop.eup %1852  ;;  %v1115_v4 = vmul.f32 %v1851_v47, %v2428_v42 }
 0x4dd   :  { %v1116_v26 = vmul.f32 %v1853_v1, %v2422_v38 }
 0x4de   :  { %1690 = vmatpush3.bf16.msra.mxu1 %v1687_v28 }
 0x4e1   :  { %1600 = vmatmul.mubr.msk.f32.vlgmr.msra.gmra.mrb[24].mxu1 %vm601_vm4, %v1110_v56 }
 0x4e2   :  { %1602 = vmatprep.mubr.msk.f32.mxu1 %vm601_vm4, %v1111_v61 }
 0x4e5   :  { %1603 = vmatmul.mubr.msk.f32.gmra.mrb[26].mxu1 %vm601_vm4, %v1112_v24 }
 0x4e6   :  { %1605 = vmatprep.mubr.msk.f32.mxu1 %vm601_vm4, %v1113_v13 }
 0x4e9   :  { %1606 = vmatmul.mubr.msk.f32.gmra.mrb[28].mxu1 %vm601_vm4, %v1114_v15 }
 0x4ea   :  { %1608 = vmatprep.mubr.msk.f32.mxu1 %vm601_vm4, %v1115_v4 }
 0x4ed   :  { %1609 = vmatmul.mubr.msk.f32.gmra.mrb[30].mxu1 %vm601_vm4, %v1116_v26 }
 0x582   :  { %v1545_v12 = vpop.f32.mrb[16].mxu1 }
 0x583   :  { %v845_v39 = vmul.f32 %v1545_v12, %v843_v50  ;;  %v804_v18 = vpop.f32.mrb[17].mxu1 }
 0x584   :  { %v844_v58 = vmul.f32 %v843_v50, %v804_v18 }
 0x585   :  { %v853_v59 = vadd.f32 %v845_v39, %v270_v22 }
 0x586   :  { %v852_v42 = vadd.f32 %v844_v58, %v269_v21 }
 0x587   :  { %861 = vst.msk [vmem:[%s2573_s6 + $0x8] sm:$0xff] %vm316_vm1, %v853_v59 }
 0x588   :  { %860 = vst.msk [vmem:[%s2573_s6] sm:$0xff] %vm316_vm1, %v852_v42 }
 0x58a   :  { %v1548_v38 = vpop.f32.mrb[18].mxu1 }
 0x58b   :  { %v847_v54 = vmul.f32 %v1548_v38, %v843_v50  ;;  %v814_v62 = vpop.f32.mrb[19].mxu1 }
 0x58c   :  { %v846_v9 = vmul.f32 %v843_v50, %v814_v62 }
 0x58d   :  { %v855_v19 = vadd.f32 %v847_v54, %v272_v20 }
 0x58e   :  { %v854_v14 = vadd.f32 %v846_v9, %v271_v23 }
 0x58f   :  { %863 = vst.msk [vmem:[%s2573_s6 + $0x18] sm:$0xff] %vm316_vm1, %v855_v19  ;;  %v1551_v21 = vpop.f32.mrb[20].mxu1 }
 0x590   :  { %862 = vst.msk [vmem:[%s2573_s6 + $0x10] sm:$0xff] %vm316_vm1, %v854_v14  ;;  %v849_v22 = vmul.f32 %v1551_v21, %v843_v50  ;;  %v824_v0 = vpop.f32.mrb[21].mxu1 }
 0x591   :  { %v848_v11 = vmul.f32 %v843_v50, %v824_v0 }
 0x592   :  { %v857_v17 = vadd.f32 %v849_v22, %v274_v37 }
 0x593   :  { %v856_v16 = vadd.f32 %v848_v11, %v273_v34 }
 0x594   :  { %865 = vst.msk [vmem:[%s2573_s6 + $0x28] sm:$0xff] %vm316_vm1, %v857_v17 }
 0x595   :  { %864 = vst.msk [vmem:[%s2573_s6 + $0x20] sm:$0xff] %vm316_vm1, %v856_v16 }
 0x596   :  { %v1554_v20 = vpop.f32.mrb[22].mxu1 }
 0x597   :  { %v851_v23 = vmul.f32 %v1554_v20, %v843_v50  ;;  %v834_v10 = vpop.f32.mrb[23].mxu1 }
 0x598   :  { %v850_v48 = vmul.f32 %v843_v50, %v834_v10 }
 0x599   :  { %v859_v35 = vadd.f32 %v851_v23, %v276_v36 }
 0x59a   :  { %v858_v29 = vadd.f32 %v850_v48, %v275_v31 }
 0x59b   :  { %867 = vst.msk [vmem:[%s2573_s6 + $0x38] sm:$0xff] %vm316_vm1, %v859_v35 }
 0x59c   :  { %866 = vst.msk [vmem:[%s2573_s6 + $0x30] sm:$0xff] %vm316_vm1, %v858_v29 }
 0x5b4   :  { %v1601_v34 = vpop.f32.mrb[24].mxu1 }
 0x5b5   :  { %v1271_v37 = vmul.f32 %v1601_v34, %v843_v50  ;;  %v1231_v40 = vpop.f32.mrb[25].mxu1 }
 0x5b6   :  { %v1270_v51 = vmul.f32 %v1231_v40, %v843_v50 }
 0x5b7   :  { %v1279_v36 = vadd.f32 %v1271_v37, %v2584_v32 }
 0x5b8   :  { %v1278_v31 = vadd.f32 %v1270_v51, %v2585_v27  ;;  %v1604_v30 = vpop.f32.mrb[26].mxu1 }
 0x5b9   :  { %1287 = vst.msk [vmem:[%s2573_s6 + $0x48] sm:$0xff] %vm316_vm1, %v1279_v36  ;;  %v1273_v53 = vmul.f32 %v1604_v30, %v843_v50  ;;  %v1241_v52 = vpop.f32.mrb[27].mxu1 }
 0x5ba   :  { %1286 = vst.msk [vmem:[%s2573_s6 + $0x40] sm:$0xff] %vm316_vm1, %v1278_v31  ;;  %v1272_v33 = vmul.f32 %v1241_v52, %v843_v50 }
 0x5bb   :  { %v1281_v6 = vadd.f32 %v1273_v53, %v2586_v49 }
 0x5bc   :  { %v1280_v7 = vadd.f32 %v1272_v33, %v2587_v43  ;;  %v1607_v25 = vpop.f32.mrb[28].mxu1 }
 0x5bd   :  { %1289 = vst.msk [vmem:[%s2573_s6 + $0x58] sm:$0xff] %vm316_vm1, %v1281_v6  ;;  %v1275_v8 = vmul.f32 %v1607_v25, %v843_v50  ;;  %v1251_v28 = vpop.f32.mrb[29].mxu1 }
 0x5be   :  { %1288 = vst.msk [vmem:[%s2573_s6 + $0x50] sm:$0xff] %vm316_vm1, %v1280_v7  ;;  %v1274_v5 = vmul.f32 %v1251_v28, %v843_v50 }
 0x5bf   :  { %v1283_v3 = vadd.f32 %v1275_v8, %v2588_v46 }
 0x5c0   :  { %v1282_v56 = vadd.f32 %v1274_v5, %v2589_v41  ;;  %v1610_v45 = vpop.f32.mrb[30].mxu1 }
 0x5c1   :  { %1291 = vst.msk [vmem:[%s2573_s6 + $0x68] sm:$0xff] %vm316_vm1, %v1283_v3  ;;  %v1277_v61 = vmul.f32 %v1610_v45, %v843_v50  ;;  %v1261_v2 = vpop.f32.mrb[31].mxu1 }
 0x5c2   :  { %1290 = vst.msk [vmem:[%s2573_s6 + $0x60] sm:$0xff] %vm316_vm1, %v1282_v56  ;;  %v1276_v24 = vmul.f32 %v1261_v2, %v843_v50 }
 0x5c3   :  { %v1285_v44 = vadd.f32 %v1277_v61, %v2590_v63 }
 0x5c4   :  { %v1284_v13 = vadd.f32 %v1276_v24, %v2591_v57 }
 0x5c5   :  { %1293 = vst.msk [vmem:[%s2573_s6 + $0x78] sm:$0xff] %vm316_vm1, %v1285_v44 }
 0x5c6   :  { %1292 = vst.msk [vmem:[%s2573_s6 + $0x70] sm:$0xff] %vm316_vm1, %v1284_v13 }
 0x5c7   :  { %1298 = vsyncpa [#allocation4], 1 }
 0x5c8   :  { %1299 = vsyncpa [#allocation6], 1 }
 0x5c9   :  { %1300 = vsyncpa [#allocation9], 1 }

// kernel: vae_forward.10
= control target key start
LH: loop header
LB: loop body
LE: loop exit
PB: predicated region body
PF: predicated region fallthrough
CT: control target
= control target key end

     0   :  { %12 = vsyncpa [#allocation4], 0  ;;  %s1614_s0 = inlined_call_operand.vmem [shape: bf16[32,512], index: 0, kind: input, shape index: {}]   ;;  %s1615_s1 = inlined_call_operand.vmem [shape: bf16[512,64], index: 1, kind: input, shape index: {}]   ;;  %s1616_s2 = inlined_call_operand.hbm [shape: f32[1,64], index: 2, kind: input, shape index: {}]   ;;  %s1617_s3 = inlined_call_operand.hbm [shape: bf16[64,80], index: 3, kind: input, shape index: {}]   ;;  %s1618_s4 = inlined_call_operand.hbm [shape: f32[1,80], index: 4, kind: input, shape index: {}]   ;;  %s1619_s5 = inlined_call_operand.<no memory space> [shape: f32[1], index: 5, kind: input, shape index: {}]   ;;  %s1620_s6 = inlined_call_operand.vmem [shape: f32[32,64], index: 6, kind: output, shape index: {}]  }
   0x1   :  { %13 = vsyncpa [#allocation6], 0  ;;  %s1349_s21 = smov [#allocation5]   ;;  %s1279_s25 = scalar_lea.hbm %s1617_s3, 512 }
   0x2   :  { %s33_s22 = sshll.u32 %s1349_s21, 4  ;;  %p1280_p0 = scmp.ne.s32.totalorder %s1617_s3, %s1279_s25  ;;  %s34_s22 = int_to_ptr.vmem [resolvable:$true] %s33_s22 }
   0x3   :  { %p1283_p1 = scmp.lt.u32.totalorder %s1279_s25, %s1617_s3 }
   0x5   :  { %p1285_p2 = pnand %p1283_p1, %p1280_p0 }
   0x7   :  { %1288 = shalt.err (!%p1285_p2)
}
   0x8   :  { %s1289_s30 = scalar_lea.vmem %s34_s22, 512  ;;  %p1294_p4 = scmp.lt.s32.totalorder %s34_s22, %s34_s22 }
   0x9   :  { %p1290_p3 = scmp.ne.s32.totalorder %s34_s22, %s1289_s30  ;;  %p1295_p5 = scmp.lt.s32.totalorder %s1289_s30, %s1289_s30 }
   0xb   :  { %p1296_p6 = por %p1295_p5, %p1294_p4 }
   0xd   :  { %p1297_p7 = pnand %p1296_p6, %p1290_p3 }
   0xf   :  { %1300 = shalt.err (!%p1297_p7)
}
  0x10   :  { %s1350_s7 = smov 64   ;;  %s1351_s8 = smov 4  }
  0x11   :  { %39 = dma.hbm_to_vmem [thread:$0]  %s1617_s3, 512, %s34_s22, [#allocation6], %s1350_s7, %s1350_s7, %s1351_s8  }
  0x12   :  { %s1352_s11 = smov [#allocation3]   ;;  %s1353_s13 = smov [#allocation7]  }
  0x13   :  { %s24_s12 = sshll.u32 %s1352_s11, 4  ;;  %s46_s14 = sshll.u32 %s1353_s13, 4  ;;  %s25_s12 = int_to_ptr.vmem [resolvable:$true] %s24_s12  ;;  %s47_s14 = int_to_ptr.vmem [resolvable:$true] %s46_s14 }
  0x14   :  { %s1301_s17 = scalar_lea.hbm %s1616_s2, 16 }
  0x15   :  { %p1302_p8 = scmp.ne.s32.totalorder %s1616_s2, %s1301_s17  ;;  %p1305_p9 = scmp.lt.u32.totalorder %s1301_s17, %s1616_s2 }
  0x17   :  { %p1307_p10 = pnand %p1305_p9, %p1302_p8 }
  0x19   :  { %1310 = shalt.err (!%p1307_p10)
}
  0x1a   :  { %s1311_s3 = scalar_lea.vmem %s25_s12, 16  ;;  %s1315_s22 = scalar_lea.vmem %s25_s12, 32 }
  0x1b   :  { %p1312_p11 = scmp.ne.s32.totalorder %s25_s12, %s1311_s3  ;;  %p1316_p12 = scmp.lt.s32.totalorder %s25_s12, %s25_s12 }
  0x1c   :  { %p1317_p13 = scmp.lt.s32.totalorder %s1315_s22, %s1311_s3 }
  0x1e   :  { %p1318_p0 = por %p1317_p13, %p1316_p12 }
  0x20   :  { %p1319_p1 = pnand %p1318_p0, %p1312_p11 }
  0x22   :  { %1322 = shalt.err (!%p1319_p1)
}
  0x23   :  { %27 = dma.hbm_to_vmem [thread:$0]  %s1616_s2, 16, %s25_s12, [#allocation4]  }
  0x24   :  { %s1323_s27 = scalar_lea.hbm %s1618_s4, 16 }
  0x25   :  { %p1324_p2 = scmp.ne.s32.totalorder %s1618_s4, %s1323_s27  ;;  %p1327_p3 = scmp.lt.u32.totalorder %s1323_s27, %s1618_s4 }
  0x27   :  { %p1329_p4 = pnand %p1327_p3, %p1324_p2 }
  0x29   :  { %1332 = shalt.err (!%p1329_p4)
}
  0x2a   :  { %s1333_s8 = scalar_lea.vmem %s47_s14, 16  ;;  %s1337_s9 = scalar_lea.vmem %s47_s14, 32 }
  0x2b   :  { %p1334_p5 = scmp.ne.s32.totalorder %s47_s14, %s1333_s8  ;;  %p1338_p6 = scmp.lt.s32.totalorder %s47_s14, %s47_s14 }
  0x2c   :  { %p1339_p7 = scmp.lt.s32.totalorder %s1337_s9, %s1333_s8 }
  0x2e   :  { %p1340_p8 = por %p1339_p7, %p1338_p6 }
  0x30   :  { %p1341_p9 = pnand %p1340_p8, %p1334_p5 }
  0x32   :  { %1344 = shalt.err (!%p1341_p9)
}
  0x33   :  { %49 = dma.hbm_to_vmem [thread:$0]  %s1618_s4, 16, %s47_s14, [#allocation6]  }
  0x34   :  { %1345 = dma.done.wait [#allocation4], 16  }
  0x35   :  { %1346 = vsyncadd [#allocation4], 4294967280 }
  0x36   :  { %1347 = dma.done.wait [#allocation6], 528  }
  0x37   :  { %1348 = vsyncadd [#allocation6], 4294966768  ;;  %v1215_v0 = vld [vmem:[%s1615_s1 + $0x40] sm:$0xff]   ;;  %v1219_v4 = vld [vmem:[%s1615_s1 + $0x48] sm:$0xff]   ;;  %vm516_vm0 = vcmask 523264   ;;  %vm579_vm1 = vcmask 64512  }
  0x38   :  { %v1216_v1 = vld [vmem:[%s1615_s1 + $0xc0] sm:$0xff]   ;;  %1050 = vmatprep.subr.bf16.mxu0 %v1215_v0  ;;  %v1220_v5 = vld [vmem:[%s1615_s1 + $0xc8] sm:$0xff]   ;;  %v1223_v8 = vld [vmem:[%s1615_s1 + $0x50] sm:$0xff]   ;;  %vm663_vm3 = vcmask 130048   ;;  %s1355_s2 = smov 112  }
  0x39   :  { %v1217_v2 = vld [vmem:[%s1615_s1] sm:$0xff]   ;;  %1078 = vmatprep.subr.bf16.mxu1 %v1216_v1  ;;  %v1221_v6 = vld [vmem:[%s1615_s1 + $0x8] sm:$0xff]   ;;  %v1224_v9 = vld [vmem:[%s1615_s1 + $0xd0] sm:$0xff]  }
  0x3a   :  { %v1218_v3 = vld [vmem:[%s1615_s1 + $0x80] sm:$0xff]   ;;  %1051 = vmatpush3.bf16.msra.mxu0 %v1217_v2  ;;  %v1222_v7 = vld [vmem:[%s1615_s1 + $0x88] sm:$0xff]   ;;  %v1225_v10 = vld [vmem:[%s1615_s1 + $0x10] sm:$0xff]  }
  0x3b   :  { %1079 = vmatpush3.bf16.msra.mxu1 %v1218_v3  ;;  %1052 = vmatprep.subr.bf16.mxu0 %v1219_v4  ;;  %v1226_v11 = vld [vmem:[%s1615_s1 + $0x90] sm:$0xff]   ;;  %v1227_v12 = vld [vmem:[%s1615_s1 + $0x58] sm:$0xff]   ;;  %v1231_v16 = vld [vmem:[%s1615_s1 + $0x60] sm:$0xff]  }
  0x3c   :  { %1080 = vmatprep.subr.bf16.mxu1 %v1220_v5  ;;  %v1228_v13 = vld [vmem:[%s1615_s1 + $0xd8] sm:$0xff]   ;;  %v1232_v17 = vld [vmem:[%s1615_s1 + $0xe0] sm:$0xff]   ;;  %v1235_v20 = vld [vmem:[%s1615_s1 + $0x68] sm:$0xff]  }
  0x3d   :  { %v1229_v14 = vld [vmem:[%s1615_s1 + $0x18] sm:$0xff]   ;;  %v1233_v18 = vld [vmem:[%s1615_s1 + $0x20] sm:$0xff]   ;;  %v1236_v21 = vld [vmem:[%s1615_s1 + $0xe8] sm:$0xff]  }
  0x3e   :  { %1053 = vmatpush3.bf16.msra.mxu0 %v1221_v6  ;;  %v1230_v15 = vld [vmem:[%s1615_s1 + $0x98] sm:$0xff]   ;;  %v1234_v19 = vld [vmem:[%s1615_s1 + $0xa0] sm:$0xff]   ;;  %v1237_v22 = vld [vmem:[%s1615_s1 + $0x28] sm:$0xff]  }
  0x3f   :  { %1081 = vmatpush3.bf16.msra.mxu1 %v1222_v7  ;;  %1054 = vmatprep.subr.bf16.mxu0 %v1223_v8  ;;  %v1238_v23 = vld [vmem:[%s1615_s1 + $0xa8] sm:$0xff]   ;;  %v1239_v24 = vld [vmem:[%s1615_s1 + $0x70] sm:$0xff]   ;;  %v1243_v28 = vld [vmem:[%s1615_s1 + $0x78] sm:$0xff]  }
  0x40   :  { %1082 = vmatprep.subr.bf16.mxu1 %v1224_v9  ;;  %v1240_v25 = vld [vmem:[%s1615_s1 + $0xf0] sm:$0xff]   ;;  %v1244_v29 = vld [vmem:[%s1615_s1 + $0xf8] sm:$0xff]   ;;  %v1259_v40 = vld [vmem:[#allocation5] sm:$0xff]  }
  0x41   :  { %v1241_v26 = vld [vmem:[%s1615_s1 + $0x30] sm:$0xff]   ;;  %v1245_v30 = vld [vmem:[%s1615_s1 + $0x38] sm:$0xff]   ;;  %v990_v46 = vld [vmem:[#allocation3] ss:$0 sm:$0xff] }
  0x42   :  { %1055 = vmatpush3.bf16.msra.mxu0 %v1225_v10  ;;  %v1242_v27 = vld [vmem:[%s1615_s1 + $0xb0] sm:$0xff]   ;;  %v1246_v31 = vld [vmem:[%s1615_s1 + $0xb8] sm:$0xff]   ;;  %vm1169_vm2 = vmpackc.low %vm579_vm1, %vm579_vm1 }
  0x43   :  { %1083 = vmatpush3.bf16.msra.mxu1 %v1226_v11  ;;  %1056 = vmatprep.subr.bf16.mxu0 %v1227_v12  ;;  %v1247_v32 = vld [vmem:[%s1614_s0] ss:$16 sps:$4 sm:$0xff]   ;;  %v1249_v33 = vld [vmem:[%s1614_s0 + $0x4] ss:$16 sps:$4 sm:$0xff]   ;;  %v1250_v34 = vld [vmem:[%s1614_s0 + $0x8] ss:$16 sps:$4 sm:$0xff]  }
  0x44   :  { %1084 = vmatprep.subr.bf16.mxu1 %v1228_v13  ;;  %v1252_v35 = vld [vmem:[%s1614_s0 + $0xc] ss:$16 sps:$4 sm:$0xff]   ;;  %405 = vmatprep.mubr.bf16.mxu0 %v1249_v33  ;;  %v1253_v36 = vld [vmem:[%s1614_s0 + $0x24] ss:$16 sps:$4 sm:$0xff]   ;;  %v1257_v38 = vld [vmem:[%s1614_s0 + $0x20] ss:$16 sps:$4 sm:$0xff]  }
  0x45   :  { %454 = vmatprep.mubr.bf16.mxu1 %v1252_v35  ;;  %v1255_v37 = vld [vmem:[%s1614_s0 + $0x2c] ss:$16 sps:$4 sm:$0xff]   ;;  %v1258_v39 = vld [vmem:[%s1614_s0 + $0x28] ss:$16 sps:$4 sm:$0xff]   ;;  %s1354_s0 = smov 120  }
  0x46   :  { %1057 = vmatpush3.bf16.msra.mxu0 %v1229_v14  ;;  %v1260_v41 = vld [vmem:[#allocation5 + $0x8] sm:$0xff]   ;;  %v1261_v42 = vld [vmem:[#allocation5 + $0x10] sm:$0xff]   ;;  %v1262_v43 = vld [vmem:[#allocation5 + $0x18] sm:$0xff]  }
  0x47   :  { %1085 = vmatpush3.bf16.msra.mxu1 %v1230_v15  ;;  %1058 = vmatprep.subr.bf16.mxu0 %v1231_v16 }
  0x48   :  { %1086 = vmatprep.subr.bf16.mxu1 %v1232_v17 }
  0x4a   :  { %1059 = vmatpush3.bf16.msra.mxu0 %v1233_v18 }
  0x4b   :  { %1087 = vmatpush3.bf16.msra.mxu1 %v1234_v19  ;;  %1060 = vmatprep.subr.bf16.mxu0 %v1235_v20  ;;  %v1031_v19 = vld [vmem:[#allocation7] ss:$0 sm:$0xff] }
  0x4c   :  { %1088 = vmatprep.subr.bf16.mxu1 %v1236_v21 }
  0x4e   :  { %1061 = vmatpush3.bf16.msra.mxu0 %v1237_v22 }
  0x4f   :  { %1089 = vmatpush3.bf16.msra.mxu1 %v1238_v23  ;;  %1062 = vmatprep.subr.bf16.mxu0 %v1239_v24 }
  0x50   :  { %1090 = vmatprep.subr.bf16.mxu1 %v1240_v25 }
  0x52   :  { %1063 = vmatpush3.bf16.msra.mxu0 %v1241_v26 }
  0x53   :  { %1091 = vmatpush3.bf16.msra.mxu1 %v1242_v27  ;;  %1064 = vmatprep.subr.bf16.mxu0 %v1243_v28 }
  0x54   :  { %1092 = vmatprep.subr.bf16.mxu1 %v1244_v29 }
  0x56   :  { %1065 = vmatpush3.bf16.msra.mxu0 %v1245_v30 }
  0x57   :  { %1093 = vmatpush3.bf16.msra.mxu1 %v1246_v31  ;;  %1128 = vmatprep.subr.bf16.mxu0 %v1259_v40 }
  0x59   :  { %406 = vmatmul.mubr.bf16.vlgmr.msra.gmra.mrb[0].mxu0 %v1247_v32 }
  0x5a   :  { %455 = vmatmul.mubr.bf16.vlgmr.msra.gmra.mrb[0].mxu1 %v1250_v34  ;;  %413 = vmatprep.mubr.bf16.mxu0 %v1253_v36 }
  0x5b   :  { %462 = vmatprep.mubr.bf16.mxu1 %v1255_v37  ;;  %1129 = vmatpush3.bf16.msra.mxu0 %v1259_v40 }
  0x5c   :  { %1130 = vmatprep.subr.bf16.mxu0 %v1260_v41 }
  0x5f   :  { %1131 = vmatpush3.bf16.msra.mxu0 %v1260_v41 }
  0x60   :  { %1132 = vmatprep.subr.bf16.mxu0 %v1261_v42 }
  0x61   :  { %414 = vmatmul.mubr.bf16.gmra.mrb[4].mxu0 %v1257_v38 }
  0x62   :  { %463 = vmatmul.mubr.bf16.gmra.mrb[4].mxu1 %v1258_v39 }
  0x63   :  { %1133 = vmatpush3.bf16.msra.mxu0 %v1261_v42 }
  0x64   :  { %1134 = vmatprep.subr.bf16.mxu0 %v1262_v43 }
  0x67   :  { %1135 = vmatpush3.bf16.msra.mxu0 %v1262_v43 }
 0x12c   :  { %v1066_v44 = vpop.f32.mrb[0].mxu0 }
 0x12d   :  { %v1094_v45 = vpop.f32.mrb[0].mxu1  ;;  %v1067_v47 = vpop.f32.mrb[1].mxu0 }
 0x12e   :  { %v1068_v48 = vadd.f32 %v1067_v47, %v1066_v44  ;;  %v1095_v49 = vpop.f32.mrb[1].mxu1  ;;  %v1069_v50 = vpop.f32.mrb[2].mxu0 }
 0x12f   :  { %v1096_v51 = vadd.f32 %v1095_v49, %v1094_v45  ;;  %v1097_v52 = vpop.f32.mrb[2].mxu1  ;;  %v1070_v53 = vpop.f32.mrb[3].mxu0 }
 0x130   :  { %v408_v54 = vadd.f32 %v1068_v48, %v990_v46  ;;  %v1071_v55 = vadd.f32 %v1070_v53, %v1069_v50  ;;  %v1098_v56 = vpop.f32.mrb[3].mxu1 }
 0x131   :  { %v1099_v57 = vadd.f32 %v1098_v56, %v1097_v52 }
 0x132   :  { %v1547_v58 = vadd.f32 %v1096_v51, %v408_v54  ;;  %v411_v59 = vadd.f32 %v1071_v55, %v990_v46 }
 0x134   :  { %v1549_v60 = vadd.f32 %v1099_v57, %v411_v59  ;;  %v1072_v61 = vpop.f32.mrb[4].mxu0  ;;  %v471_v0 = vmax.f32 %v1547_v58, 0.0 }
 0x135   :  { %v1100_v62 = vpop.f32.mrb[4].mxu1  ;;  %v1073_v63 = vpop.f32.mrb[5].mxu0 }
 0x136   :  { %v472_v1 = vmax.f32 %v1549_v60, 0.0  ;;  %v1074_v2 = vadd.f32 %v1073_v63, %v1072_v61  ;;  %v1101_v3 = vpop.f32.mrb[5].mxu1  ;;  %v1075_v4 = vpop.f32.mrb[6].mxu0 }
 0x137   :  { %v1102_v5 = vadd.f32 %v1101_v3, %v1100_v62  ;;  %v1103_v6 = vpop.f32.mrb[6].mxu1  ;;  %v1076_v7 = vpop.f32.mrb[7].mxu0 }
 0x138   :  { %v475_v8 = vpack.c.bf16 %v472_v1, %v471_v0  ;;  %v416_v9 = vadd.f32 %v1074_v2, %v990_v46  ;;  %v1077_v10 = vadd.f32 %v1076_v7, %v1075_v4  ;;  %v1104_v11 = vpop.f32.mrb[7].mxu1 }
 0x139   :  { %v1105_v12 = vadd.f32 %v1104_v11, %v1103_v6 }
 0x13a   :  { %v1557_v13 = vadd.f32 %v1102_v5, %v416_v9  ;;  %v419_v14 = vadd.f32 %v1077_v10, %v990_v46  ;;  %1136 = vmatprep.mubr.msk.bf16.mxu0 %vm516_vm0, %v475_v8 }
 0x13c   :  { %v1560_v15 = vadd.f32 %v1105_v12, %v419_v14  ;;  %v473_v16 = vmax.f32 %v1557_v13, 0.0 }
 0x13e   :  { %v474_v17 = vmax.f32 %v1560_v15, 0.0 }
 0x140   :  { %v476_v18 = vpack.c.bf16 %v474_v17, %v473_v16 }
 0x142   :  { %1137 = vmatmul.mubr.msk.bf16.vlgmr.msra.gmra.mrb[8].mxu0 %vm516_vm0, %v476_v18 }
 0x215   :  { %v1138_v20 = vpop.f32.mrb[8].mxu0 }
 0x216   :  { %v566_v21 = vadd.f32 %v1138_v20, %v1031_v19  ;;  %v557_v22 = vpop.f32.mrb[9].mxu0 }
 0x217   :  { %v558_v23 = vadd.f32 %v1031_v19, %v557_v22  ;;  %v1139_v24 = vpop.f32.mrb[10].mxu0 }
 0x218   :  { %v560_v25 = vpop.f32.mrb[11].mxu0  ;;  %1158 = vmatprep.mubr.msk.f32.mxu0 %vm579_vm1, %v566_v21  ;;  %v569_v27 = vadd.f32 %v1139_v24, %v1031_v19 }
 0x219   :  { %v561_v26 = vadd.f32 %v1031_v19, %v560_v25  ;;  %1144 = vmatprep.mubr.msk.f32.mxu1 %vm579_vm1, %v558_v23 }
 0x21a   :  { %v1200_v29 = vpack.i.bf16 %v569_v27, %v566_v21 }
 0x21b   :  { %v1195_v28 = vpack.i.bf16 %v561_v26, %v558_v23 }
 0x21d   :  { %1196 = vrot.lane.b32.xlu0 %v1195_v28, %s1354_s0 }
 0x221   :  { %1201 = vrot.lane.b32.xlu0 %v1200_v29, %s1354_s0 }
 0x28f   :  { %v1197_v30 = vpop.permute.xlu0 %1196 }
 0x290   :  { %v1199_v31 = vunpack.i.h.bf16 %v1197_v30  ;;  %v1198_v32 = vunpack.i.l.bf16 %v1197_v30  ;;  %v773_v30 = vstv %s1619_s5 }
 0x292   :  { %v1168_v33 = vpack.c.bf16 %v1199_v31, %v1198_v32 }
 0x293   :  { %v1202_v34 = vpop.permute.xlu0 %1201 }
 0x294   :  { %v1204_v35 = vunpack.i.h.bf16 %v1202_v34  ;;  %v1203_v36 = vunpack.i.l.bf16 %v1202_v34  ;;  %1170 = vmatprep.subr.msk.bf16.mxu1 %vm1169_vm2, %v1168_v33 }
 0x295   :  { %1173 = vmatpush3.bf16.xpose.msk.msra.mxu1 %vm1169_vm2, %v1168_v33 }
 0x296   :  { %v1178_v37 = vpack.c.bf16 %v1204_v35, %v1203_v36 }
 0x298   :  { %1180 = vmatprep.subr.msk.bf16.mxu0 %vm1169_vm2, %v1178_v37 }
 0x299   :  { %1183 = vmatpush3.bf16.xpose.msk.msra.mxu0 %vm1169_vm2, %v1178_v37 }
 0x29c   :  { %1145 = vmatmul.mubr.msk.f32.vlgmr.msra.gmra.mrb[8].mxu1 %vm579_vm1, %v561_v26 }
 0x2a0   :  { %1159 = vmatmul.mubr.msk.f32.vlgmr.msra.gmra.mrb[12].mxu0 %vm579_vm1, %v569_v27 }
 0x36f   :  { %v1146_v38 = vpop.f32.mrb[8].mxu1 }
 0x370   :  { %v654_v39 = vpop.f32.mrb[9].mxu1  ;;  %v667_v44 = vsel %vm663_vm3, %v1146_v38, -inf }
 0x371   :  { %v664_v40 = vsel %vm663_vm3, %v654_v39, -inf }
 0x372   :  { %665 = vmax.xlane.f32.xlu1 %v664_v40 }
 0x373   :  { %v1160_v41 = vpop.f32.mrb[12].mxu0 }
 0x374   :  { %v860_v42 = vpop.f32.mrb[13].mxu0  ;;  %v872_v45 = vsel %vm663_vm3, %v1160_v41, -inf }
 0x375   :  { %v869_v43 = vsel %vm663_vm3, %v860_v42, -inf }
 0x376   :  { %870 = vmax.xlane.f32.xlu0 %v869_v43  ;;  %668 = vmax.xlane.f32.xlu1 %v667_v44 }
 0x37a   :  { %873 = vmax.xlane.f32.xlu1 %v872_v45 }
 0x38c   :  { %1211 = vrot.lane.b32.xlu0 %v1200_v29, %s1355_s2 }
 0x3ff   :  { %v666_v46 = vpop.xlane.xlu1 %665 }
 0x400   :  { %v670_v55 = vsub.f32 %v654_v39, %v666_v46 }
 0x402   :  { %v672_v57 = vmul.f32 1.442695, %v670_v55 }
 0x403   :  { %v669_v47 = vpop.xlane.xlu1 %668  ;;  %v871_v49 = vpop.xlane.xlu0 %870 }
 0x404   :  { %v671_v48 = vsub.f32 %v1146_v38, %v669_v47  ;;  %v875_v52 = vsub.f32 %v860_v42, %v871_v49 }
 0x406   :  { %v674_v53 = vmul.f32 1.442695, %v671_v48  ;;  %v877_v56 = vmul.f32 1.442695, %v875_v52 }
 0x407   :  { %v874_v50 = vpop.xlane.xlu1 %873  ;;  %v1212_v10 = vpop.permute.xlu0 %1211 }
 0x408   :  { %v876_v51 = vsub.f32 %v1160_v41, %v874_v50  ;;  %v1214_v12 = vunpack.i.h.bf16 %v1212_v10  ;;  %v1213_v14 = vunpack.i.l.bf16 %v1212_v10 }
 0x40a   :  { %v879_v54 = vmul.f32 1.442695, %v876_v51  ;;  %v1184_v22 = vpack.c.bf16 %v1214_v12, %v1213_v14 }
 0x40c   :  { %1263 = vpow2.f32 %v879_v54 }
 0x40d   :  { %1265 = vpow2.f32 %v674_v53 }
 0x40e   :  { %1267 = vpow2.f32 %v877_v56 }
 0x40f   :  { %1269 = vpow2.f32 %v672_v57 }
 0x416   :  { %v1264_v59 = vpop.eup %1263 }
 0x417   :  { %v884_v61 = vsel %vm663_vm3, %v1264_v59, 0.0  ;;  %v1266_v62 = vpop.eup %1265 }
 0x418   :  { %885 = vadd.xlane.f32.xlu1 %v884_v61  ;;  %v679_v63 = vsel %vm663_vm3, %v1266_v62, 0.0  ;;  %v1268_v2 = vpop.eup %1267 }
 0x419   :  { %v881_v3 = vsel %vm663_vm3, %v1268_v2, 0.0  ;;  %v1270_v4 = vpop.eup %1269 }
 0x41a   :  { %v676_v5 = vsel %vm663_vm3, %v1270_v4, 0.0 }
 0x41c   :  { %680 = vadd.xlane.f32.xlu1 %v679_v63 }
 0x420   :  { %882 = vadd.xlane.f32.xlu1 %v881_v3 }
 0x424   :  { %677 = vadd.xlane.f32.xlu1 %v676_v5 }
 0x435   :  { %1206 = vrot.lane.b32.xlu1 %v1195_v28, %s1355_s2 }
 0x4a5   :  { %v886_v6 = vpop.xlane.xlu1 %885 }
 0x4a9   :  { %v681_v7 = vpop.xlane.xlu1 %680 }
 0x4aa   :  { %1271 = vrcp.f32 %v681_v7 }
 0x4ad   :  { %v883_v8 = vpop.xlane.xlu1 %882 }
 0x4ae   :  { %1273 = vrcp.f32 %v883_v8 }
 0x4b1   :  { %v678_v9 = vpop.xlane.xlu1 %677 }
 0x4b2   :  { %1275 = vrcp.f32 %v678_v9 }
 0x4b3   :  { %1277 = vrcp.f32 %v886_v6 }
 0x4b4   :  { %v1272_v21 = vpop.eup %1271 }
 0x4b5   :  { %v1207_v11 = vpop.permute.xlu1 %1206  ;;  %v685_v26 = vmul.f32 %v1272_v21, %v1266_v62 }
 0x4b6   :  { %v1209_v18 = vunpack.i.h.bf16 %v1207_v11  ;;  %v1208_v19 = vunpack.i.l.bf16 %v1207_v11 }
 0x4b8   :  { %v1174_v20 = vpack.c.bf16 %v1209_v18, %v1208_v19  ;;  %v1274_v23 = vpop.eup %1273 }
 0x4b9   :  { %v889_v28 = vmul.f32 %v1274_v23, %v1268_v2 }
 0x4ba   :  { %1175 = vmatprep.subr.bf16.mxu1 %v1174_v20 }
 0x4bb   :  { %1177 = vmatpush3.bf16.msra.mxu1 %v1174_v20 }
 0x4bc   :  { %v1276_v24 = vpop.eup %1275  ;;  %1185 = vmatprep.subr.bf16.mxu1 %v1184_v22 }
 0x4bd   :  { %v684_v25 = vmul.f32 %v1276_v24, %v1270_v4  ;;  %v1278_v27 = vpop.eup %1277 }
 0x4be   :  { %v890_v29 = vmul.f32 %v1278_v27, %v1264_v59 }
 0x4bf   :  { %1151 = vmatprep.mubr.msk.f32.mxu1 %vm663_vm3, %v684_v25 }
 0x4c0   :  { %1152 = vmatmul.mubr.msk.f32.vlgmr.msra.gmra.mrb[10].mxu1 %vm663_vm3, %v685_v26 }
 0x4c1   :  { %1187 = vmatpush3.bf16.msra.mxu1 %v1184_v22  ;;  %1165 = vmatprep.mubr.msk.f32.mxu1 %vm663_vm3, %v889_v28 }
 0x4c4   :  { %1166 = vmatmul.mubr.msk.f32.vlgmr.msra.gmra.mrb[12].mxu1 %vm663_vm3, %v890_v29 }
 0x593   :  { %v1153_v31 = vpop.f32.mrb[10].mxu1 }
 0x594   :  { %v775_v32 = vmul.f32 %v1153_v31, %v773_v30  ;;  %v764_v33 = vpop.f32.mrb[11].mxu1 }
 0x595   :  { %v774_v34 = vmul.f32 %v773_v30, %v764_v33 }
 0x596   :  { %v777_v35 = vadd.f32 %v775_v32, %v472_v1 }
 0x597   :  { %v776_v36 = vadd.f32 %v774_v34, %v471_v0  ;;  %v1167_v37 = vpop.f32.mrb[12].mxu1 }
 0x598   :  { %779 = vst.msk [vmem:[%s1620_s6 + $0x8] sm:$0xff] %vm516_vm0, %v777_v35  ;;  %v979_v38 = vmul.f32 %v1167_v37, %v773_v30  ;;  %v969_v39 = vpop.f32.mrb[13].mxu1 }
 0x599   :  { %778 = vst.msk [vmem:[%s1620_s6] sm:$0xff] %vm516_vm0, %v776_v36  ;;  %v978_v40 = vmul.f32 %v969_v39, %v773_v30 }
 0x59a   :  { %v981_v60 = vadd.f32 %v979_v38, %v474_v17 }
 0x59b   :  { %v980_v58 = vadd.f32 %v978_v40, %v473_v16 }
 0x59c   :  { %983 = vst.msk [vmem:[%s1620_s6 + $0x18] sm:$0xff] %vm516_vm0, %v981_v60 }
 0x59d   :  { %982 = vst.msk [vmem:[%s1620_s6 + $0x10] sm:$0xff] %vm516_vm0, %v980_v58 }
 0x59e   :  { %988 = vsyncpa [#allocation4], 1 }
 0x59f   :  { %989 = vsyncpa [#allocation6], 1 }

// kernel: vae_forward.11
= control target key start
LH: loop header
LB: loop body
LE: loop exit
PB: predicated region body
PF: predicated region fallthrough
CT: control target
= control target key end

     0   :  { %vm1569_vm0 = vmmov 0   ;;  %s1570_s19 = smov 96   ;;  %s1571_s20 = smov 112   ;;  %vm891_vm1 = vcmask 130048   ;;  %vm983_vm2 = vcmask 785408   ;;  %vm989_vm3 = vcmask 1043456   ;;  %s1904_s1 = inlined_call_operand.vmem [shape: bf16[1024,128], index: 1, kind: input, shape index: {}]   ;;  %s1905_s0 = inlined_call_operand.vmem [shape: bf16[8,1024], index: 0, kind: input, shape index: {}]   ;;  %s1906_s3 = inlined_call_operand.vmem [shape: bf16[128,160], index: 3, kind: input, shape index: {}]   ;;  %s1907_s2 = inlined_call_operand.vmem [shape: f32[1,128], index: 2, kind: input, shape index: {}]   ;;  %s1908_s4 = inlined_call_operand.vmem [shape: f32[1,160], index: 4, kind: input, shape index: {}]   ;;  %s1909_s5 = inlined_call_operand.<no memory space> [shape: f32[1], index: 5, kind: input, shape index: {}]   ;;  %s1910_s6 = inlined_call_operand.vmem [shape: f32[8,128], index: 6, kind: output, shape index: {}]  }
   0x1   :  { %v1463_v0 = vld [vmem:[%s1904_s1 + $0x40] sm:$0xff]   ;;  %v1467_v4 = vld [vmem:[%s1904_s1 + $0x48] sm:$0xff]   ;;  %v1471_v8 = vld [vmem:[%s1904_s1 + $0x50] sm:$0xff]   ;;  %vm966_vm4 = vcmask 27648   ;;  %vm985_vm5 = vcmask 31744  }
   0x2   :  { %v1464_v1 = vld [vmem:[%s1904_s1 + $0xc0] sm:$0xff]   ;;  %1342 = vmatprep.subr.bf16.mxu0 %v1463_v0  ;;  %v1468_v5 = vld [vmem:[%s1904_s1 + $0xc8] sm:$0xff]   ;;  %v1472_v9 = vld [vmem:[%s1904_s1 + $0xd0] sm:$0xff]  }
   0x3   :  { %v1465_v2 = vld [vmem:[%s1904_s1] sm:$0xff]   ;;  %1364 = vmatprep.subr.bf16.mxu1 %v1464_v1  ;;  %v1469_v6 = vld [vmem:[%s1904_s1 + $0x8] sm:$0xff]   ;;  %v1473_v10 = vld [vmem:[%s1904_s1 + $0x10] sm:$0xff]  }
   0x4   :  { %v1466_v3 = vld [vmem:[%s1904_s1 + $0x80] sm:$0xff]   ;;  %1343 = vmatpush3.bf16.msra.mxu0 %v1465_v2  ;;  %v1470_v7 = vld [vmem:[%s1904_s1 + $0x88] sm:$0xff]   ;;  %v1474_v11 = vld [vmem:[%s1904_s1 + $0x90] sm:$0xff]  }
   0x5   :  { %1365 = vmatpush3.bf16.msra.mxu1 %v1466_v3  ;;  %1344 = vmatprep.subr.bf16.mxu0 %v1467_v4  ;;  %v1475_v12 = vld [vmem:[%s1904_s1 + $0x58] sm:$0xff]   ;;  %v1479_v16 = vld [vmem:[%s1904_s1 + $0x60] sm:$0xff]   ;;  %v1483_v20 = vld [vmem:[%s1904_s1 + $0x68] sm:$0xff]  }
   0x6   :  { %1366 = vmatprep.subr.bf16.mxu1 %v1468_v5  ;;  %v1476_v13 = vld [vmem:[%s1904_s1 + $0xd8] sm:$0xff]   ;;  %v1480_v17 = vld [vmem:[%s1904_s1 + $0xe0] sm:$0xff]   ;;  %v1484_v21 = vld [vmem:[%s1904_s1 + $0xe8] sm:$0xff]  }
   0x7   :  { %v1477_v14 = vld [vmem:[%s1904_s1 + $0x18] sm:$0xff]   ;;  %v1481_v18 = vld [vmem:[%s1904_s1 + $0x20] sm:$0xff]   ;;  %v1485_v22 = vld [vmem:[%s1904_s1 + $0x28] sm:$0xff]  }
   0x8   :  { %1345 = vmatpush3.bf16.msra.mxu0 %v1469_v6  ;;  %v1478_v15 = vld [vmem:[%s1904_s1 + $0x98] sm:$0xff]   ;;  %v1482_v19 = vld [vmem:[%s1904_s1 + $0xa0] sm:$0xff]   ;;  %v1486_v23 = vld [vmem:[%s1904_s1 + $0xa8] sm:$0xff]  }
   0x9   :  { %1367 = vmatpush3.bf16.msra.mxu1 %v1470_v7  ;;  %1346 = vmatprep.subr.bf16.mxu0 %v1471_v8  ;;  %v1487_v24 = vld [vmem:[%s1904_s1 + $0x70] sm:$0xff]   ;;  %v1491_v28 = vld [vmem:[%s1904_s1 + $0x78] sm:$0xff]   ;;  %v25_v32 = vld [vmem:[%s1905_s0] sm:$0xff] }
   0xa   :  { %1368 = vmatprep.subr.bf16.mxu1 %v1472_v9  ;;  %v1488_v25 = vld [vmem:[%s1904_s1 + $0xf0] sm:$0xff]   ;;  %v1492_v29 = vld [vmem:[%s1904_s1 + $0xf8] sm:$0xff]   ;;  %v26_v33 = vld [vmem:[%s1905_s0 + $0x8] sm:$0xff]  ;;  %v1246_v34 = vcombine.low %v25_v32, %v25_v32  ;;  %v1247_v35 = vcombine.high %v25_v32, %v25_v32 }
   0xb   :  { %v1489_v26 = vld [vmem:[%s1904_s1 + $0x30] sm:$0xff]   ;;  %v1493_v30 = vld [vmem:[%s1904_s1 + $0x38] sm:$0xff]   ;;  %v1248_v36 = vcombine.low %v26_v33, %v26_v33  ;;  %v1249_v37 = vcombine.high %v26_v33, %v26_v33  ;;  %v1499_v38 = vld [vmem:[%s1904_s1 + $0x140] sm:$0xff]  }
   0xc   :  { %1347 = vmatpush3.bf16.msra.mxu0 %v1473_v10  ;;  %v1490_v27 = vld [vmem:[%s1904_s1 + $0xb0] sm:$0xff]   ;;  %v1494_v31 = vld [vmem:[%s1904_s1 + $0xb8] sm:$0xff]   ;;  %v1500_v39 = vld [vmem:[%s1904_s1 + $0x1c0] sm:$0xff]   ;;  %608 = vmatprep.mubr.bf16.mxu0 %v1247_v35 }
   0xd   :  { %1369 = vmatpush3.bf16.msra.mxu1 %v1474_v11  ;;  %1348 = vmatprep.subr.bf16.mxu0 %v1475_v12  ;;  %v1501_v40 = vld [vmem:[%s1904_s1 + $0x100] sm:$0xff]   ;;  %v1503_v42 = vld [vmem:[%s1904_s1 + $0x148] sm:$0xff]   ;;  %v1507_v46 = vld [vmem:[%s1904_s1 + $0x150] sm:$0xff]  }
   0xe   :  { %1370 = vmatprep.subr.bf16.mxu1 %v1476_v13  ;;  %648 = vmatprep.mubr.bf16.mxu1 %v1249_v37  ;;  %v1502_v41 = vld [vmem:[%s1904_s1 + $0x180] sm:$0xff]   ;;  %v1504_v43 = vld [vmem:[%s1904_s1 + $0x1c8] sm:$0xff]   ;;  %v1508_v47 = vld [vmem:[%s1904_s1 + $0x1d0] sm:$0xff]  }
   0xf   :  { %v1505_v44 = vld [vmem:[%s1904_s1 + $0x108] sm:$0xff]   ;;  %v1509_v48 = vld [vmem:[%s1904_s1 + $0x110] sm:$0xff]   ;;  %v1511_v50 = vld [vmem:[%s1904_s1 + $0x158] sm:$0xff]  }
  0x10   :  { %1349 = vmatpush3.bf16.msra.mxu0 %v1477_v14  ;;  %v1506_v45 = vld [vmem:[%s1904_s1 + $0x188] sm:$0xff]   ;;  %v1510_v49 = vld [vmem:[%s1904_s1 + $0x190] sm:$0xff]   ;;  %v1512_v51 = vld [vmem:[%s1904_s1 + $0x1d8] sm:$0xff]  }
  0x11   :  { %1371 = vmatpush3.bf16.msra.mxu1 %v1478_v15  ;;  %1350 = vmatprep.subr.bf16.mxu0 %v1479_v16  ;;  %v1513_v52 = vld [vmem:[%s1904_s1 + $0x118] sm:$0xff]   ;;  %v1515_v54 = vld [vmem:[%s1904_s1 + $0x160] sm:$0xff]   ;;  %v1519_v58 = vld [vmem:[%s1904_s1 + $0x168] sm:$0xff]  }
  0x12   :  { %1372 = vmatprep.subr.bf16.mxu1 %v1480_v17  ;;  %v1514_v53 = vld [vmem:[%s1904_s1 + $0x198] sm:$0xff]   ;;  %v1516_v55 = vld [vmem:[%s1904_s1 + $0x1e0] sm:$0xff]   ;;  %v1520_v59 = vld [vmem:[%s1904_s1 + $0x1e8] sm:$0xff]  }
  0x13   :  { %v1517_v56 = vld [vmem:[%s1904_s1 + $0x120] sm:$0xff]   ;;  %v1521_v60 = vld [vmem:[%s1904_s1 + $0x128] sm:$0xff]   ;;  %v1523_v62 = vld [vmem:[%s1904_s1 + $0x170] sm:$0xff]  }
  0x14   :  { %1351 = vmatpush3.bf16.msra.mxu0 %v1481_v18  ;;  %v1518_v57 = vld [vmem:[%s1904_s1 + $0x1a0] sm:$0xff]   ;;  %v1522_v61 = vld [vmem:[%s1904_s1 + $0x1a8] sm:$0xff]   ;;  %v1524_v63 = vld [vmem:[%s1904_s1 + $0x1f0] sm:$0xff]  }
  0x15   :  { %1373 = vmatpush3.bf16.msra.mxu1 %v1482_v19  ;;  %1352 = vmatprep.subr.bf16.mxu0 %v1483_v20  ;;  %v1525_v0 = vld [vmem:[%s1904_s1 + $0x130] sm:$0xff]   ;;  %v1527_v2 = vld [vmem:[%s1904_s1 + $0x178] sm:$0xff]   ;;  %v1535_v12 = vld [vmem:[%s1906_s3] ss:$8 sps:$4 sm:$0xff]  }
  0x16   :  { %1374 = vmatprep.subr.bf16.mxu1 %v1484_v21  ;;  %v1526_v1 = vld [vmem:[%s1904_s1 + $0x1b0] sm:$0xff]   ;;  %v1528_v3 = vld [vmem:[%s1904_s1 + $0x1f8] sm:$0xff]   ;;  %v1537_v13 = vld [vmem:[%s1906_s3 + $0x4] ss:$8 sps:$4 sm:$0xff]  }
  0x17   :  { %v1529_v4 = vld [vmem:[%s1904_s1 + $0x138] sm:$0xff]   ;;  %v27_v6 = vld [vmem:[%s1905_s0 + $0x10] sm:$0xff]  ;;  %v1543_v16 = vld [vmem:[%s1906_s3 + $0x24] ss:$8 sps:$4 sm:$0xff]  }
  0x18   :  { %1353 = vmatpush3.bf16.msra.mxu0 %v1485_v22  ;;  %v1530_v5 = vld [vmem:[%s1904_s1 + $0x1b8] sm:$0xff]   ;;  %v1250_v7 = vcombine.low %v27_v6, %v27_v6  ;;  %v1251_v8 = vcombine.high %v27_v6, %v27_v6  ;;  %v1541_v17 = vld [vmem:[%s1906_s3 + $0x20] ss:$8 sps:$4 sm:$0xff]   ;;  %v1549_v20 = vld [vmem:[%s1906_s3 + $0x44] ss:$8 sps:$4 sm:$0xff]  }
  0x19   :  { %1375 = vmatpush3.bf16.msra.mxu1 %v1486_v23  ;;  %1354 = vmatprep.subr.bf16.mxu0 %v1487_v24  ;;  %v28_v9 = vld [vmem:[%s1905_s0 + $0x18] sm:$0xff]  ;;  %v1547_v21 = vld [vmem:[%s1906_s3 + $0x40] ss:$8 sps:$4 sm:$0xff]   ;;  %v1555_v24 = vld [vmem:[%s1906_s3 + $0x64] ss:$8 sps:$4 sm:$0xff]  }
  0x1a   :  { %1376 = vmatprep.subr.bf16.mxu1 %v1488_v25  ;;  %v1252_v10 = vcombine.low %v28_v9, %v28_v9  ;;  %v1253_v11 = vcombine.high %v28_v9, %v28_v9  ;;  %v1540_v14 = vld [vmem:[%s1906_s3 + $0x14] ss:$8 sps:$4 sm:$0xff]   ;;  %v1538_v15 = vld [vmem:[%s1906_s3 + $0x10] ss:$8 sps:$4 sm:$0xff]   ;;  %v1553_v25 = vld [vmem:[%s1906_s3 + $0x60] ss:$8 sps:$4 sm:$0xff]  }
  0x1b   :  { %v1546_v18 = vld [vmem:[%s1906_s3 + $0x34] ss:$8 sps:$4 sm:$0xff]   ;;  %v1544_v19 = vld [vmem:[%s1906_s3 + $0x30] ss:$8 sps:$4 sm:$0xff]  }
  0x1c   :  { %1355 = vmatpush3.bf16.msra.mxu0 %v1489_v26  ;;  %v1552_v22 = vld [vmem:[%s1906_s3 + $0x54] ss:$8 sps:$4 sm:$0xff]   ;;  %v1550_v23 = vld [vmem:[%s1906_s3 + $0x50] ss:$8 sps:$4 sm:$0xff]  }
  0x1d   :  { %1377 = vmatpush3.bf16.msra.mxu1 %v1490_v27  ;;  %1356 = vmatprep.subr.bf16.mxu0 %v1491_v28  ;;  %v1558_v26 = vld [vmem:[%s1906_s3 + $0x74] ss:$8 sps:$4 sm:$0xff]   ;;  %v1556_v27 = vld [vmem:[%s1906_s3 + $0x70] ss:$8 sps:$4 sm:$0xff]   ;;  %v1567_v28 = vmov 0  }
  0x1e   :  { %1378 = vmatprep.subr.bf16.mxu1 %v1492_v29 }
  0x20   :  { %1357 = vmatpush3.bf16.msra.mxu0 %v1493_v30 }
  0x21   :  { %1379 = vmatpush3.bf16.msra.mxu1 %v1494_v31  ;;  %1386 = vmatprep.subr.bf16.mxu0 %v1499_v38  ;;  %v1245_v31 = vld [vmem:[%s1907_s2] ss:$0 sm:$0xff] }
  0x22   :  { %1408 = vmatprep.subr.bf16.mxu1 %v1500_v39 }
  0x23   :  { %609 = vmatmul.mubr.bf16.vlgmr.msra.gmra.mrb[0].mxu0 %v1246_v34 }
  0x24   :  { %649 = vmatmul.mubr.bf16.vlgmr.msra.gmra.mrb[0].mxu1 %v1248_v36  ;;  %1387 = vmatpush3.bf16.msra.mxu0 %v1501_v40 }
  0x25   :  { %1409 = vmatpush3.bf16.msra.mxu1 %v1502_v41  ;;  %1388 = vmatprep.subr.bf16.mxu0 %v1503_v42 }
  0x26   :  { %1410 = vmatprep.subr.bf16.mxu1 %v1504_v43  ;;  %688 = vmatprep.mubr.bf16.mxu0 %v1251_v8 }
  0x27   :  { %728 = vmatprep.mubr.bf16.mxu1 %v1253_v11 }
  0x28   :  { %1389 = vmatpush3.bf16.msra.mxu0 %v1505_v44 }
  0x29   :  { %1411 = vmatpush3.bf16.msra.mxu1 %v1506_v45  ;;  %1390 = vmatprep.subr.bf16.mxu0 %v1507_v46 }
  0x2a   :  { %1412 = vmatprep.subr.bf16.mxu1 %v1508_v47 }
  0x2c   :  { %1391 = vmatpush3.bf16.msra.mxu0 %v1509_v48 }
  0x2d   :  { %1413 = vmatpush3.bf16.msra.mxu1 %v1510_v49  ;;  %1392 = vmatprep.subr.bf16.mxu0 %v1511_v50 }
  0x2e   :  { %1414 = vmatprep.subr.bf16.mxu1 %v1512_v51 }
  0x30   :  { %1393 = vmatpush3.bf16.msra.mxu0 %v1513_v52 }
  0x31   :  { %1415 = vmatpush3.bf16.msra.mxu1 %v1514_v53  ;;  %1394 = vmatprep.subr.bf16.mxu0 %v1515_v54 }
  0x32   :  { %1416 = vmatprep.subr.bf16.mxu1 %v1516_v55 }
  0x34   :  { %1395 = vmatpush3.bf16.msra.mxu0 %v1517_v56  ;;  %v1568_v56 = vmov 0.0  }
  0x35   :  { %1417 = vmatpush3.bf16.msra.mxu1 %v1518_v57  ;;  %1396 = vmatprep.subr.bf16.mxu0 %v1519_v58  ;;  %v756_v57 = vlaneseq }
  0x36   :  { %1418 = vmatprep.subr.bf16.mxu1 %v1520_v59 }
  0x37   :  { %v757_v58 = vshrl.u32 %v756_v57, 7 }
  0x38   :  { %1397 = vmatpush3.bf16.msra.mxu0 %v1521_v60  ;;  %v754_v60 = vld [vmem:[%s1908_s4] sm:$0x3] }
  0x39   :  { %1419 = vmatpush3.bf16.msra.mxu1 %v1522_v61  ;;  %1398 = vmatprep.subr.bf16.mxu0 %v1523_v62  ;;  %v758_v59 = vsub.s32 0, %v757_v58  ;;  %v762_v62 = vsub.s32 1, %v757_v58 }
  0x3a   :  { %1420 = vmatprep.subr.bf16.mxu1 %v1524_v63 }
  0x3b   :  { %v759_v61 = vrot.slane %v754_v60, %v758_v59 }
  0x3c   :  { %1399 = vmatpush3.bf16.msra.mxu0 %v1525_v0 }
  0x3d   :  { %1421 = vmatpush3.bf16.msra.mxu1 %v1526_v1  ;;  %1400 = vmatprep.subr.bf16.mxu0 %v1527_v2  ;;  %v763_v1 = vrot.slane %v754_v60, %v762_v62 }
  0x3e   :  { %1422 = vmatprep.subr.bf16.mxu1 %v1528_v3 }
  0x40   :  { %1401 = vmatpush3.bf16.msra.mxu0 %v1529_v4 }
  0x41   :  { %1423 = vmatpush3.bf16.msra.mxu1 %v1530_v5  ;;  %846 = vmatprep.subr.bf16.mxu0 %v1537_v13 }
  0x42   :  { %1438 = vmatprep.subr.mxu1 %v1568_v56 }
  0x43   :  { %689 = vmatmul.mubr.bf16.vlgmr.msra.gmra.mrb[4].mxu0 %v1250_v7 }
  0x44   :  { %729 = vmatmul.mubr.bf16.vlgmr.msra.gmra.mrb[4].mxu1 %v1252_v10  ;;  %847 = vmatpush1.bf16.msra.mxu0 %v1535_v12 }
  0x45   :  { %848 = vmatprep.subr.bf16.mxu0 %v1540_v14  ;;  %878 = vmatprep.mubr.bf16.mxu0 %v1567_v28 }
  0x46   :  { %1440 = vmatprep.mubr.msk.f32.mxu1 %vm1569_vm0, %v1568_v56 }
  0x48   :  { %849 = vmatpush1.bf16.msra.mxu0 %v1538_v15 }
  0x49   :  { %850 = vmatprep.subr.bf16.mxu0 %v1543_v16 }
  0x4c   :  { %851 = vmatpush1.bf16.msra.mxu0 %v1541_v17 }
  0x4d   :  { %852 = vmatprep.subr.bf16.mxu0 %v1546_v18 }
  0x50   :  { %853 = vmatpush1.bf16.msra.mxu0 %v1544_v19 }
  0x51   :  { %854 = vmatprep.subr.bf16.mxu0 %v1549_v20 }
  0x54   :  { %855 = vmatpush1.bf16.msra.mxu0 %v1547_v21 }
  0x55   :  { %856 = vmatprep.subr.bf16.mxu0 %v1552_v22 }
  0x58   :  { %857 = vmatpush1.bf16.msra.mxu0 %v1550_v23  ;;  %v1062_v23 = vstv %s1909_s5 }
  0x59   :  { %858 = vmatprep.subr.bf16.mxu0 %v1555_v24 }
  0x5c   :  { %859 = vmatpush1.bf16.msra.mxu0 %v1553_v25 }
  0x5d   :  { %860 = vmatprep.subr.bf16.mxu0 %v1558_v26 }
  0x60   :  { %861 = vmatpush1.bf16.msra.mxu0 %v1556_v27 }
  0xf6   :  { %v1358_v29 = vpop.f32.mrb[0].mxu0 }
  0xf7   :  { %v1380_v30 = vpop.f32.mrb[0].mxu1  ;;  %v1359_v32 = vpop.f32.mrb[1].mxu0 }
  0xf8   :  { %v1381_v33 = vpop.f32.mrb[1].mxu1  ;;  %v1360_v34 = vadd.f32 %v1359_v32, %v1358_v29  ;;  %v1361_v36 = vpop.f32.mrb[2].mxu0 }
  0xf9   :  { %v1382_v35 = vadd.f32 %v1381_v33, %v1380_v30  ;;  %v1383_v37 = vpop.f32.mrb[2].mxu1  ;;  %v1362_v38 = vpop.f32.mrb[3].mxu0 }
  0xfa   :  { %v1384_v39 = vpop.f32.mrb[3].mxu1  ;;  %v611_v40 = vadd.f32 %v1360_v34, %v1245_v31 }
  0xfc   :  { %v651_v41 = vadd.f32 %v1382_v35, %v611_v40 }
 0x116   :  { %v1402_v42 = vpop.f32.mrb[4].mxu0 }
 0x117   :  { %v1424_v43 = vpop.f32.mrb[4].mxu1  ;;  %v1403_v44 = vpop.f32.mrb[5].mxu0 }
 0x118   :  { %v1425_v45 = vpop.f32.mrb[5].mxu1  ;;  %v1404_v46 = vadd.f32 %v1403_v44, %v1402_v42  ;;  %v1405_v48 = vpop.f32.mrb[6].mxu0 }
 0x119   :  { %v1426_v47 = vadd.f32 %v1425_v45, %v1424_v43  ;;  %v1427_v49 = vpop.f32.mrb[6].mxu1  ;;  %v1406_v50 = vpop.f32.mrb[7].mxu0 }
 0x11a   :  { %v1428_v51 = vpop.f32.mrb[7].mxu1  ;;  %v691_v52 = vadd.f32 %v1404_v46, %v651_v41 }
 0x11c   :  { %v731_v53 = vadd.f32 %v1426_v47, %v691_v52 }
 0x11e   :  { %v1862_v54 = vmax.f32 %v731_v53, 0.0 }
 0x120   :  { %v737_v55 = vpack.c.bf16 %v1862_v54, %v1862_v54  ;;  %v1237_v45 = vrot.slane %v1862_v54, 4 }
 0x122   :  { %879 = vmatmul.mubr.bf16.vlgmr.msra.gmra.mrb[8].mxu0 %v737_v55 }
 0x1f5   :  { %v880_v63 = vpop.f32.mrb[8].mxu0 }
 0x1f6   :  { %v881_v0 = vadd.f32 %v880_v63, %v759_v61  ;;  %v882_v2 = vpop.f32.mrb[9].mxu0 }
 0x1f7   :  { %v884_v3 = vpop.f32.mrb[10].mxu0  ;;  %v883_v5 = vadd.f32 %v882_v2, %v763_v1 }
 0x1f8   :  { %v885_v4 = vpop.f32.mrb[11].mxu0  ;;  %979 = vrot.lane.b32.xlu1 %v881_v0, %s1570_s19  ;;  %889 = vrot.lane.b32.xlu0 %v881_v0, %s1571_s20  ;;  %v1066_v13 = vrot.slane %v881_v0, 4 }
 0x1f9   :  { %v1154_v36 = vrot.slane %v883_v5, 4 }
 0x1fc   :  { %981 = vrot.lane.b32.xlu1 %v883_v5, %s1570_s19 }
 0x26a   :  { %v980_v6 = vpop.permute.xlu1 %979  ;;  %v890_v7 = vpop.permute.xlu0 %889 }
 0x26b   :  { %1439 = vmatpush3.xpose.msk.msra.mxu1 %vm891_vm1, %v890_v7 }
 0x26c   :  { %1443 = vmatprep.subr.mxu1 %v1568_v56 }
 0x26e   :  { %v982_v8 = vpop.permute.xlu1 %981  ;;  %1441 = vmatmul.mubr.msk.f32.vlgmr.msra.gmra.mrb[8].mxu1 %vm891_vm1, %v881_v0 }
 0x26f   :  { %v984_v9 = vsel %vm983_vm2, %v980_v6, %v982_v8  ;;  %1445 = vmatprep.mubr.msk.f32.mxu1 %vm1569_vm0, %v1568_v56 }
 0x270   :  { %1444 = vmatpush3.msk.msra.mxu1 %vm989_vm3, %v984_v9 }
 0x271   :  { %1448 = vmatprep.subr.mxu1 %v1568_v56 }
 0x341   :  { %v962_v10 = vpop.f32.mrb[8].mxu1 }
 0x342   :  { %v1442_v11 = vpop.f32.mrb[9].mxu1  ;;  %v967_v12 = vsel %vm966_vm4, %v962_v10, -inf }
 0x343   :  { %968 = vmax.xlane.f32.xlu0 %v967_v12 }
 0x359   :  { %1155 = vrot.lane.b32.xlu0 %v1066_v13, %s1570_s19 }
 0x3d0   :  { %v969_v14 = vpop.xlane.xlu0 %968 }
 0x3d1   :  { %v970_v15 = vsub.f32 %v962_v10, %v969_v14 }
 0x3d3   :  { %v971_v16 = vmul.f32 1.442695, %v970_v15 }
 0x3d4   :  { %v1156_v37 = vpop.permute.xlu0 %1155 }
 0x3d5   :  { %1559 = vpow2.f32 %v971_v16 }
 0x3df   :  { %v1560_v17 = vpop.eup %1559 }
 0x3e0   :  { %v973_v18 = vsel %vm966_vm4, %v1560_v17, 0.0 }
 0x3e1   :  { %974 = vadd.xlane.f32.xlu1 %v973_v18 }
 0x3f2   :  { %1067 = vrot.lane.b32.xlu1 %v1066_v13, %s1571_s20 }
 0x46e   :  { %v975_v19 = vpop.xlane.xlu1 %974 }
 0x46f   :  { %1561 = vrcp.f32 %v975_v19 }
 0x472   :  { %v1068_v22 = vpop.permute.xlu1 %1067 }
 0x479   :  { %v1562_v20 = vpop.eup %1561 }
 0x47a   :  { %v977_v21 = vmul.f32 %v1562_v20, %v1560_v17 }
 0x47c   :  { %1446 = vmatmul.mubr.msk.f32.vlgmr.msra.gmra.mrb[10].mxu1 %vm985_vm5, %v977_v21 }
 0x47d   :  { %1449 = vmatpush3.xpose.msk.msra.mxu1 %vm891_vm1, %v1068_v22  ;;  %1450 = vmatprep.mubr.msk.f32.mxu1 %vm1569_vm0, %v1568_v56 }
 0x47e   :  { %1453 = vmatprep.subr.mxu1 %v1568_v56 }
 0x480   :  { %1451 = vmatmul.mubr.msk.f32.vlgmr.msra.gmra.mrb[12].mxu1 %vm891_vm1, %v1066_v13 }
 0x481   :  { %1455 = vmatprep.mubr.msk.f32.mxu1 %vm1569_vm0, %v1568_v56 }
 0x54f   :  { %v1058_v24 = vpop.f32.mrb[10].mxu1 }
 0x550   :  { %v1063_v25 = vmul.f32 %v1062_v23, %v1058_v24  ;;  %v1447_v26 = vpop.f32.mrb[11].mxu1 }
 0x552   :  { %v1064_v27 = vadd.f32 %v1063_v25, %v1862_v54 }
 0x553   :  { %v1139_v28 = vpop.f32.mrb[12].mxu1 }
 0x554   :  { %1065 = vst [vmem:[%s1910_s6] sm:$0xf] %v1064_v27  ;;  %v1452_v29 = vpop.f32.mrb[13].mxu1  ;;  %v1143_v30 = vsel %vm966_vm4, %v1139_v28, -inf }
 0x555   :  { %1144 = vmax.xlane.f32.xlu1 %v1143_v30 }
 0x5e2   :  { %v1145_v31 = vpop.xlane.xlu1 %1144 }
 0x5e3   :  { %v1146_v32 = vsub.f32 %v1139_v28, %v1145_v31 }
 0x5e5   :  { %v1147_v33 = vmul.f32 1.442695, %v1146_v32 }
 0x5e7   :  { %1563 = vpow2.f32 %v1147_v33 }
 0x5f1   :  { %v1564_v34 = vpop.eup %1563 }
 0x5f2   :  { %v1149_v35 = vsel %vm966_vm4, %v1564_v34, 0.0 }
 0x5f3   :  { %1150 = vadd.xlane.f32.xlu0 %v1149_v35 }
 0x609   :  { %1157 = vrot.lane.b32.xlu0 %v1154_v36, %s1570_s19 }
 0x680   :  { %v1151_v38 = vpop.xlane.xlu0 %1150 }
 0x681   :  { %1565 = vrcp.f32 %v1151_v38 }
 0x684   :  { %v1158_v39 = vpop.permute.xlu0 %1157 }
 0x685   :  { %v1159_v40 = vsel %vm983_vm2, %v1156_v37, %v1158_v39 }
 0x686   :  { %1454 = vmatpush3.msk.msra.mxu1 %vm989_vm3, %v1159_v40 }
 0x68b   :  { %v1566_v41 = vpop.eup %1565 }
 0x68c   :  { %v1153_v42 = vmul.f32 %v1566_v41, %v1564_v34 }
 0x68e   :  { %1456 = vmatmul.mubr.msk.f32.vlgmr.msra.gmra.mrb[14].mxu1 %vm985_vm5, %v1153_v42 }
 0x761   :  { %v1231_v43 = vpop.f32.mrb[14].mxu1 }
 0x762   :  { %v1235_v44 = vmul.f32 %v1231_v43, %v1062_v23  ;;  %v1457_v46 = vpop.f32.mrb[15].mxu1 }
 0x764   :  { %v1239_v47 = vadd.f32 %v1237_v45, %v1235_v44 }
 0x766   :  { %1240 = vst [vmem:[%s1910_s6 + $0x4] sm:$0xf] %v1239_v47 }

// kernel: vae_forward.12
= control target key start
LH: loop header
LB: loop body
LE: loop exit
PB: predicated region body
PF: predicated region fallthrough
CT: control target
= control target key end

     0   :  { %14 = vsyncpa [#allocation3], 0  ;;  %v113_v30 = vlaneseq  ;;  %v786_v34 = vmov 1966171168   ;;  %s988_s0 = inlined_call_operand.vmem [shape: bf16[2,512], index: 0, kind: input, shape index: {}]   ;;  %s989_s1 = inlined_call_operand.vmem [shape: bf16[512,16], index: 1, kind: input, shape index: {}]   ;;  %s990_s2 = inlined_call_operand.vmem [shape: f32[1,16], index: 2, kind: input, shape index: {}]   ;;  %s991_s3 = inlined_call_operand.vmem [shape: f32[2,8], index: 3, kind: input, shape index: {}]   ;;  %s992_s4 = inlined_call_operand.vmem [shape: bf16[8,512], index: 4, kind: input, shape index: {}]   ;;  %s993_s5 = inlined_call_operand.vmem [shape: f32[1,512], index: 5, kind: input, shape index: {}]   ;;  %s994_s6 = inlined_call_operand.hbm [shape: f32[2,8], index: 6, kind: output, shape index: {0}]   ;;  %s995_s7 = inlined_call_operand.hbm [shape: f32[2,8], index: 7, kind: output, shape index: {1}]   ;;  %s996_s8 = inlined_call_operand.vmem [shape: f32[2,512], index: 8, kind: output, shape index: {2}]  }
   0x1   :  { %v700_v0 = vld [vmem:[%s989_s1 + $0x40] sm:$0xff]   ;;  %v704_v4 = vld [vmem:[%s989_s1 + $0x48] sm:$0xff]   ;;  %v708_v8 = vld [vmem:[%s989_s1 + $0x50] sm:$0xff]   ;;  %v111_v35 = vunpack.c.l.s4 %v786_v34 }
   0x2   :  { %v701_v1 = vld [vmem:[%s989_s1 + $0xc0] sm:$0xff]   ;;  %650 = vmatprep.subr.bf16.mxu0 %v700_v0  ;;  %v705_v5 = vld [vmem:[%s989_s1 + $0xc8] sm:$0xff]   ;;  %v709_v9 = vld [vmem:[%s989_s1 + $0xd0] sm:$0xff]   ;;  %v936_v36 = vshrl.u32 %v113_v30, 7 }
   0x3   :  { %v702_v2 = vld [vmem:[%s989_s1] sm:$0xff]   ;;  %672 = vmatprep.subr.bf16.mxu1 %v701_v1  ;;  %v706_v6 = vld [vmem:[%s989_s1 + $0x8] sm:$0xff]   ;;  %v710_v10 = vld [vmem:[%s989_s1 + $0x10] sm:$0xff]  }
   0x4   :  { %v703_v3 = vld [vmem:[%s989_s1 + $0x80] sm:$0xff]   ;;  %651 = vmatpush3.bf16.msra.mxu0 %v702_v2  ;;  %v707_v7 = vld [vmem:[%s989_s1 + $0x88] sm:$0xff]   ;;  %v711_v11 = vld [vmem:[%s989_s1 + $0x90] sm:$0xff]  }
   0x5   :  { %673 = vmatpush3.bf16.msra.mxu1 %v703_v3  ;;  %652 = vmatprep.subr.bf16.mxu0 %v704_v4  ;;  %v712_v12 = vld [vmem:[%s989_s1 + $0x58] sm:$0xff]   ;;  %v716_v16 = vld [vmem:[%s989_s1 + $0x60] sm:$0xff]   ;;  %v720_v20 = vld [vmem:[%s989_s1 + $0x68] sm:$0xff]  }
   0x6   :  { %674 = vmatprep.subr.bf16.mxu1 %v705_v5  ;;  %v713_v13 = vld [vmem:[%s989_s1 + $0xd8] sm:$0xff]   ;;  %v717_v17 = vld [vmem:[%s989_s1 + $0xe0] sm:$0xff]   ;;  %v721_v21 = vld [vmem:[%s989_s1 + $0xe8] sm:$0xff]  }
   0x7   :  { %v714_v14 = vld [vmem:[%s989_s1 + $0x18] sm:$0xff]   ;;  %v718_v18 = vld [vmem:[%s989_s1 + $0x20] sm:$0xff]   ;;  %v722_v22 = vld [vmem:[%s989_s1 + $0x28] sm:$0xff]  }
   0x8   :  { %653 = vmatpush3.bf16.msra.mxu0 %v706_v6  ;;  %v715_v15 = vld [vmem:[%s989_s1 + $0x98] sm:$0xff]   ;;  %v719_v19 = vld [vmem:[%s989_s1 + $0xa0] sm:$0xff]   ;;  %v723_v23 = vld [vmem:[%s989_s1 + $0xa8] sm:$0xff]  }
   0x9   :  { %675 = vmatpush3.bf16.msra.mxu1 %v707_v7  ;;  %654 = vmatprep.subr.bf16.mxu0 %v708_v8  ;;  %v724_v24 = vld [vmem:[%s989_s1 + $0x70] sm:$0xff]   ;;  %v728_v28 = vld [vmem:[%s989_s1 + $0x78] sm:$0xff]   ;;  %v609_v33 = vld.sshfl [vmem:[%s988_s0] sm:$0x33 pattern:$0x75316420] }
   0xa   :  { %676 = vmatprep.subr.bf16.mxu1 %v709_v9  ;;  %v725_v25 = vld [vmem:[%s989_s1 + $0xf0] sm:$0xff]   ;;  %v729_v29 = vld [vmem:[%s989_s1 + $0xf8] sm:$0xff]  }
   0xb   :  { %v726_v26 = vld [vmem:[%s989_s1 + $0x30] sm:$0xff]   ;;  %v730_v31 = vld [vmem:[%s989_s1 + $0x38] sm:$0xff]  }
   0xc   :  { %655 = vmatpush3.bf16.msra.mxu0 %v710_v10  ;;  %v727_v27 = vld [vmem:[%s989_s1 + $0xb0] sm:$0xff]   ;;  %v731_v32 = vld [vmem:[%s989_s1 + $0xb8] sm:$0xff]  }
   0xd   :  { %677 = vmatpush3.bf16.msra.mxu1 %v711_v11  ;;  %656 = vmatprep.subr.bf16.mxu0 %v712_v12 }
   0xe   :  { %678 = vmatprep.subr.bf16.mxu1 %v713_v13 }
  0x10   :  { %657 = vmatpush3.bf16.msra.mxu0 %v714_v14 }
  0x11   :  { %679 = vmatpush3.bf16.msra.mxu1 %v715_v15  ;;  %658 = vmatprep.subr.bf16.mxu0 %v716_v16 }
  0x12   :  { %680 = vmatprep.subr.bf16.mxu1 %v717_v17 }
  0x14   :  { %659 = vmatpush3.bf16.msra.mxu0 %v718_v18 }
  0x15   :  { %681 = vmatpush3.bf16.msra.mxu1 %v719_v19  ;;  %660 = vmatprep.subr.bf16.mxu0 %v720_v20 }
  0x16   :  { %682 = vmatprep.subr.bf16.mxu1 %v721_v21 }
  0x18   :  { %661 = vmatpush3.bf16.msra.mxu0 %v722_v22 }
  0x19   :  { %683 = vmatpush3.bf16.msra.mxu1 %v723_v23  ;;  %662 = vmatprep.subr.bf16.mxu0 %v724_v24 }
  0x1a   :  { %684 = vmatprep.subr.bf16.mxu1 %v725_v25 }
  0x1c   :  { %663 = vmatpush3.bf16.msra.mxu0 %v726_v26 }
  0x1d   :  { %685 = vmatpush3.bf16.msra.mxu1 %v727_v27  ;;  %664 = vmatprep.subr.bf16.mxu0 %v728_v28 }
  0x1e   :  { %686 = vmatprep.subr.bf16.mxu1 %v729_v29 }
  0x20   :  { %665 = vmatpush3.bf16.msra.mxu0 %v730_v31 }
  0x21   :  { %687 = vmatpush3.bf16.msra.mxu1 %v731_v32 }
  0x22   :  { %15 = vsyncpa [#allocation5], 0  ;;  %v109_v37 = vcombine.high %v609_v33, %v609_v33  ;;  %v112_v38 = vunpack.c.0.s8 %v111_v35  ;;  %v413_v44 = vld [vmem:[%s992_s4] sm:$0xff]  ;;  %vm451_vm0 = vcmask 1043456   ;;  %v414_v45 = vld [vmem:[%s992_s4 + $0x8] sm:$0xff]  ;;  %vm546_vm1 = vcmask 58368  }
  0x23   :  { %v643_v46 = vcombine.high %v413_v44, %v413_v44  ;;  %v645_v47 = vcombine.high %v414_v45, %v414_v45  ;;  %v642_v48 = vcombine.low %v413_v44, %v413_v44  ;;  %v644_v49 = vcombine.low %v414_v45, %v414_v45  ;;  %v608_v53 = vld [vmem:[%s990_s2] ss:$0 sm:$0xff]  ;;  %s788_s2 = smov 120   ;;  %s789_s10 = smov [#allocation2]  }
  0x24   :  { %v115_v39 = vsub.s32 %v112_v38, %v936_v36  ;;  %v787_v3 = vmov 0   ;;  %v402_v5 = vld [vmem:[%s991_s3] sm:$0x3]  ;;  %vm447_vm2 = vcmask 64512   ;;  %s582_s11 = sshll.u32 %s789_s10, 4  ;;  %s790_s12 = smov [#allocation4]   ;;  %s583_s11 = int_to_ptr.vmem [resolvable:$true] %s582_s11 }
  0x25   :  { %646 = vmatprep.subr.msk.bf16.mxu0 %vm451_vm0, %v643_v46  ;;  %648 = vmatprep.subr.msk.bf16.mxu1 %vm451_vm0, %v645_v47  ;;  %v453_v50 = vsel %vm451_vm0, %v642_v48, 0  ;;  %v459_v51 = vsel %vm451_vm0, %v644_v49, 0  ;;  %s592_s13 = sshll.u32 %s790_s12, 4  ;;  %s738_s14 = scalar_lea.vmem %s583_s11, 32  ;;  %s593_s13 = int_to_ptr.vmem [resolvable:$true] %s592_s13 }
  0x26   :  { %v123_v40 = vrot.slane %v109_v37, %v115_v39  ;;  %v116_v41 = vrot.slane %v609_v33, %v115_v39  ;;  %p739_p0 = scmp.ne.s32.totalorder %s583_s11, %s738_s14  ;;  %p743_p1 = scmp.lt.s32.totalorder %s583_s11, %s583_s11 }
  0x27   :  { %p744_p2 = scmp.lt.s32.totalorder %s738_s14, %s738_s14 }
  0x28   :  { %354 = vmatprep.mubr.bf16.mxu0 %v123_v40  ;;  %v125_v42 = vcombine.high %v123_v40, %v123_v40  ;;  %v124_v43 = vcombine.high %v116_v41, %v116_v41 }
  0x29   :  { %355 = vmatmul.mubr.bf16.vlgmr.msra.gmra.mrb[0].mxu0 %v116_v41  ;;  %p745_p3 = por %p744_p2, %p743_p1 }
  0x2a   :  { %394 = vmatprep.mubr.bf16.mxu1 %v125_v42  ;;  %465 = vmatpush1.bf16.msra.mxu0 %v453_v50 }
  0x2b   :  { %395 = vmatmul.mubr.bf16.vlgmr.msra.gmra.mrb[0].mxu1 %v124_v43  ;;  %496 = vmatprep.mubr.bf16.mxu0 %v787_v3  ;;  %p746_p4 = pnand %p745_p3, %p739_p0 }
  0x2c   :  { %506 = vmatpush1.bf16.msra.mxu1 %v459_v51  ;;  %537 = vmatprep.mubr.bf16.mxu1 %v787_v3 }
  0xfc   :  { %v666_v52 = vpop.f32.mrb[0].mxu0 }
  0xfd   :  { %v667_v54 = vpop.f32.mrb[1].mxu0 }
  0xfe   :  { %v688_v55 = vpop.f32.mrb[0].mxu1  ;;  %v668_v56 = vadd.f32 %v667_v54, %v666_v52  ;;  %v669_v57 = vpop.f32.mrb[2].mxu0 }
  0xff   :  { %v689_v58 = vpop.f32.mrb[1].mxu1  ;;  %v670_v59 = vpop.f32.mrb[3].mxu0 }
 0x100   :  { %v357_v60 = vadd.f32 %v668_v56, %v608_v53  ;;  %v690_v61 = vadd.f32 %v689_v58, %v688_v55  ;;  %v691_v62 = vpop.f32.mrb[2].mxu1 }
 0x101   :  { %v692_v63 = vpop.f32.mrb[3].mxu1 }
 0x102   :  { %v397_v0 = vadd.f32 %v690_v61, %v357_v60 }
 0x104   :  { %v403_v1 = vmul.f32 0.5, %v397_v0  ;;  %547 = vst.msk [vmem:[#allocation2] sm:$0x3] %vm546_vm1, %v397_v0 }
 0x106   :  { %v404_v2 = vmul.f32 1.442695, %v403_v1 }
 0x108   :  { %736 = vpow2.f32 %v404_v2 }
 0x112   :  { %v737_v4 = vpop.eup %736 }
 0x113   :  { %407 = vrot.lane.b32.xlu0 %v737_v4, %s788_s2 }
 0x117   :  { %549 = vrot.lane.b32.xlu0 %v397_v0, %s788_s2 }
 0x185   :  { %v408_v6 = vpop.permute.xlu0 %407 }
 0x186   :  { %v410_v7 = vmul.f32 %v408_v6, %v402_v5 }
 0x188   :  { %v411_v8 = vadd.f32 %v410_v7, %v397_v0 }
 0x189   :  { %v550_v9 = vpop.permute.xlu0 %549 }
 0x18a   :  { %v412_v10 = vpack.c.bf16 %v411_v8, %v411_v8  ;;  %552 = vst.msk [vmem:[#allocation4] sm:$0x3] %vm546_vm1, %v550_v9 }
 0x18c   :  { %647 = vmatmul.mubr.msk.bf16.vlgmr.msra.gmra.mrb[4].mxu0 %vm447_vm2, %v412_v10  ;;  %649 = vmatmul.mubr.msk.bf16.vlgmr.msra.gmra.mrb[4].mxu1 %vm447_vm2, %v412_v10 }
 0x18d   :  { %749 = shalt.err (!%p746_p4)
}
 0x18e   :  { %s750_s16 = scalar_lea.hbm %s994_s6, 32 }
 0x18f   :  { %p751_p5 = scmp.ne.s32.totalorder %s994_s6, %s750_s16  ;;  %p754_p6 = scmp.lt.u32.totalorder %s750_s16, %s994_s6 }
 0x191   :  { %p756_p7 = pnand %p754_p6, %p751_p5 }
 0x193   :  { %759 = shalt.err (!%p756_p7)
}
 0x194   :  { %585 = dma.vmem_to_hbm [thread:$0]  %s583_s11, 32, %s994_s6, [#allocation3]  }
 0x195   :  { %s760_s23 = scalar_lea.vmem %s593_s13, 32  ;;  %p765_p9 = scmp.lt.s32.totalorder %s593_s13, %s593_s13 }
 0x196   :  { %p761_p8 = scmp.ne.s32.totalorder %s593_s13, %s760_s23  ;;  %p766_p10 = scmp.lt.s32.totalorder %s760_s23, %s760_s23 }
 0x198   :  { %p767_p11 = por %p766_p10, %p765_p9 }
 0x19a   :  { %p768_p12 = pnand %p767_p11, %p761_p8 }
 0x19c   :  { %771 = shalt.err (!%p768_p12)
}
 0x19d   :  { %s772_s26 = scalar_lea.hbm %s995_s7, 32 }
 0x19e   :  { %p773_p13 = scmp.ne.s32.totalorder %s995_s7, %s772_s26  ;;  %p776_p0 = scmp.lt.u32.totalorder %s772_s26, %s995_s7 }
 0x1a0   :  { %p778_p1 = pnand %p776_p0, %p773_p13 }
 0x1a2   :  { %781 = shalt.err (!%p778_p1)
}
 0x1a3   :  { %595 = dma.vmem_to_hbm [thread:$0]  %s593_s13, 32, %s995_s7, [#allocation5]   ;;  %v419_v11 = vsub.s32 0, %v936_v36  ;;  %v427_v12 = vsub.s32 2, %v936_v36  ;;  %v415_v13 = vld [vmem:[%s993_s5] sm:$0xf] }
 0x1a4   :  { %v423_v14 = vsub.s32 1, %v936_v36  ;;  %v791_v15 = vmov 1983009808   ;;  %v431_v17 = vsub.s32 3, %v936_v36 }
 0x1a5   :  { %v560_v16 = vunpack.c.l.s4 %v791_v15  ;;  %v420_v18 = vrot.slane %v415_v13, %v419_v11  ;;  %v428_v19 = vrot.slane %v415_v13, %v427_v12 }
 0x1a6   :  { %v424_v20 = vrot.slane %v415_v13, %v423_v14  ;;  %v432_v22 = vrot.slane %v415_v13, %v431_v17 }
 0x1a7   :  { %v561_v21 = vunpack.c.0.s8 %v560_v16 }
 0x1a9   :  { %v564_v30 = vsub.s32 %v561_v21, %v936_v36 }
 0x25f   :  { %v498_v23 = vpop.f32.mrb[4].mxu0  ;;  %v539_v24 = vpop.f32.mrb[4].mxu1 }
 0x260   :  { %v499_v25 = vadd.f32 %v498_v23, %v420_v18  ;;  %v540_v26 = vadd.f32 %v539_v24, %v428_v19  ;;  %v500_v27 = vpop.f32.mrb[5].mxu0  ;;  %v541_v28 = vpop.f32.mrb[5].mxu1 }
 0x261   :  { %v501_v29 = vadd.f32 %v500_v27, %v424_v20  ;;  %v542_v31 = vadd.f32 %v541_v28, %v432_v22  ;;  %v502_v32 = vpop.f32.mrb[6].mxu0  ;;  %v543_v33 = vpop.f32.mrb[6].mxu1 }
 0x262   :  { %v503_v34 = vpop.f32.mrb[7].mxu0  ;;  %v544_v35 = vpop.f32.mrb[7].mxu1 }
 0x263   :  { %v557_v37 = vcombine.low %v499_v25, %v501_v29  ;;  %v558_v38 = vcombine.low %v540_v26, %v542_v31 }
 0x265   :  { %v565_v39 = vrot.slane %v557_v37, %v564_v30  ;;  %v572_v40 = vrot.slane %v558_v38, %v564_v30 }
 0x267   :  { %v573_v41 = vcombine.low %v565_v39, %v572_v40 }
 0x269   :  { %575 = vst [vmem:[%s996_s8] sm:$0xff] %v573_v41 }
 0x26a   :  { %782 = dma.done.wait [#allocation3], 32  }
 0x26b   :  { %783 = vsyncadd [#allocation3], 4294967264 }
 0x26c   :  { %784 = dma.done.wait [#allocation5], 32  }
 0x26d   :  { %785 = vsyncadd [#allocation5], 4294967264 }
 0x26e   :  { %606 = vsyncpa [#allocation3], 1 }
 0x26f   :  { %607 = vsyncpa [#allocation5], 1 }

// kernel: vae_forward.15
= control target key start
LH: loop header
LB: loop body
LE: loop exit
PB: predicated region body
PF: predicated region fallthrough
CT: control target
= control target key end

     0   :  { %vm2144_vm0 = vcmask 523264   ;;  %s3465_s0 = inlined_call_operand.vmem [shape: bf16[2048,64], index: 0, kind: input, shape index: {}]   ;;  %s3466_s1 = inlined_call_operand.vmem [shape: f32[1,64], index: 1, kind: input, shape index: {}]   ;;  %s3467_s2 = inlined_call_operand.vmem [shape: bf16[4,8,16,128], index: 2, kind: input, shape index: {}]   ;;  %s3468_s3 = inlined_call_operand.vmem [shape: f32[32,64], index: 3, kind: output, shape index: {}]  }
   0x1   :  { %v2787_v0 = vld [vmem:[%s3465_s0 + $0x40] sm:$0xff]   ;;  %v2791_v4 = vld [vmem:[%s3465_s0 + $0x48] sm:$0xff]   ;;  %v2795_v8 = vld [vmem:[%s3465_s0 + $0x50] sm:$0xff]  }
   0x2   :  { %v2788_v1 = vld [vmem:[%s3465_s0 + $0xc0] sm:$0xff]   ;;  %2563 = vmatprep.subr.bf16.mxu0 %v2787_v0  ;;  %v2792_v5 = vld [vmem:[%s3465_s0 + $0xc8] sm:$0xff]   ;;  %v2796_v9 = vld [vmem:[%s3465_s0 + $0xd0] sm:$0xff]  }
   0x3   :  { %v2789_v2 = vld [vmem:[%s3465_s0] sm:$0xff]   ;;  %2591 = vmatprep.subr.bf16.mxu1 %v2788_v1  ;;  %v2793_v6 = vld [vmem:[%s3465_s0 + $0x8] sm:$0xff]   ;;  %v2797_v10 = vld [vmem:[%s3465_s0 + $0x10] sm:$0xff]  }
   0x4   :  { %v2790_v3 = vld [vmem:[%s3465_s0 + $0x80] sm:$0xff]   ;;  %2564 = vmatpush3.bf16.msra.mxu0 %v2789_v2  ;;  %v2794_v7 = vld [vmem:[%s3465_s0 + $0x88] sm:$0xff]   ;;  %v2798_v11 = vld [vmem:[%s3465_s0 + $0x90] sm:$0xff]  }
   0x5   :  { %2592 = vmatpush3.bf16.msra.mxu1 %v2790_v3  ;;  %2565 = vmatprep.subr.bf16.mxu0 %v2791_v4  ;;  %v2799_v12 = vld [vmem:[%s3465_s0 + $0x58] sm:$0xff]   ;;  %v2803_v16 = vld [vmem:[%s3465_s0 + $0x60] sm:$0xff]   ;;  %v2807_v20 = vld [vmem:[%s3465_s0 + $0x68] sm:$0xff]  }
   0x6   :  { %2593 = vmatprep.subr.bf16.mxu1 %v2792_v5  ;;  %v2800_v13 = vld [vmem:[%s3465_s0 + $0xd8] sm:$0xff]   ;;  %v2804_v17 = vld [vmem:[%s3465_s0 + $0xe0] sm:$0xff]   ;;  %v2808_v21 = vld [vmem:[%s3465_s0 + $0xe8] sm:$0xff]  }
   0x7   :  { %v2801_v14 = vld [vmem:[%s3465_s0 + $0x18] sm:$0xff]   ;;  %v2805_v18 = vld [vmem:[%s3465_s0 + $0x20] sm:$0xff]   ;;  %v2809_v22 = vld [vmem:[%s3465_s0 + $0x28] sm:$0xff]  }
   0x8   :  { %2566 = vmatpush3.bf16.msra.mxu0 %v2793_v6  ;;  %v2802_v15 = vld [vmem:[%s3465_s0 + $0x98] sm:$0xff]   ;;  %v2806_v19 = vld [vmem:[%s3465_s0 + $0xa0] sm:$0xff]   ;;  %v2810_v23 = vld [vmem:[%s3465_s0 + $0xa8] sm:$0xff]  }
   0x9   :  { %2594 = vmatpush3.bf16.msra.mxu1 %v2794_v7  ;;  %2567 = vmatprep.subr.bf16.mxu0 %v2795_v8  ;;  %v2811_v24 = vld [vmem:[%s3465_s0 + $0x70] sm:$0xff]   ;;  %v2815_v28 = vld [vmem:[%s3465_s0 + $0x78] sm:$0xff]   ;;  %v14_v32 = vld [vmem:[%s3467_s2] sm:$0xff]  }
   0xa   :  { %2595 = vmatprep.subr.bf16.mxu1 %v2796_v9  ;;  %v2812_v25 = vld [vmem:[%s3465_s0 + $0xf0] sm:$0xff]   ;;  %v2816_v29 = vld [vmem:[%s3465_s0 + $0xf8] sm:$0xff]   ;;  %19 = vst [vmem:[#allocation2] sm:$0xff] %v14_v32   ;;  %v2819_v33 = vld [vmem:[%s3467_s2 + $0x40] sm:$0xff]  }
   0xb   :  { %v2813_v26 = vld [vmem:[%s3465_s0 + $0x30] sm:$0xff]   ;;  %v2817_v30 = vld [vmem:[%s3465_s0 + $0x38] sm:$0xff]   ;;  %v2820_v34 = vld [vmem:[%s3467_s2 + $0x8] sm:$0xff]  }
   0xc   :  { %2568 = vmatpush3.bf16.msra.mxu0 %v2797_v10  ;;  %v2814_v27 = vld [vmem:[%s3465_s0 + $0xb0] sm:$0xff]   ;;  %v2818_v31 = vld [vmem:[%s3465_s0 + $0xb8] sm:$0xff]   ;;  %v2821_v35 = vld [vmem:[%s3467_s2 + $0x48] sm:$0xff]  }
   0xd   :  { %2596 = vmatpush3.bf16.msra.mxu1 %v2798_v11  ;;  %2569 = vmatprep.subr.bf16.mxu0 %v2799_v12  ;;  %v2822_v36 = vld [vmem:[%s3465_s0 + $0x140] sm:$0xff]   ;;  %v2219_v37 = vcombine.low %v2820_v34, %v2821_v35  ;;  %v2220_v38 = vcombine.high %v2820_v34, %v2821_v35  ;;  %v2827_v45 = vld [vmem:[%s3465_s0 + $0x1c8] sm:$0xff]   ;;  %v2831_v49 = vld [vmem:[%s3465_s0 + $0x1d0] sm:$0xff]  }
   0xe   :  { %2597 = vmatprep.subr.bf16.mxu1 %v2800_v13  ;;  %v2823_v39 = vld [vmem:[%s3465_s0 + $0x1c0] sm:$0xff]   ;;  %v2826_v46 = vld [vmem:[%s3465_s0 + $0x148] sm:$0xff]   ;;  %v2830_v50 = vld [vmem:[%s3465_s0 + $0x150] sm:$0xff]  }
   0xf   :  { %1829 = vmatprep.mubr.bf16.mxu1 %v2220_v38  ;;  %v2825_v40 = vld [vmem:[%s3465_s0 + $0x180] sm:$0xff]   ;;  %v2829_v47 = vld [vmem:[%s3465_s0 + $0x188] sm:$0xff]   ;;  %v2833_v51 = vld [vmem:[%s3465_s0 + $0x190] sm:$0xff]  }
  0x10   :  { %2570 = vmatpush3.bf16.msra.mxu0 %v2801_v14  ;;  %v2824_v42 = vld [vmem:[%s3465_s0 + $0x100] sm:$0xff]   ;;  %v2828_v48 = vld [vmem:[%s3465_s0 + $0x108] sm:$0xff]   ;;  %v2832_v52 = vld [vmem:[%s3465_s0 + $0x110] sm:$0xff]  }
  0x11   :  { %2598 = vmatpush3.bf16.msra.mxu1 %v2802_v15  ;;  %2571 = vmatprep.subr.bf16.mxu0 %v2803_v16  ;;  %v525_v41 = vld [vmem:[#allocation2] sm:$0xff]  ;;  %v2835_v53 = vld [vmem:[%s3465_s0 + $0x1d8] sm:$0xff]   ;;  %v2842_v61 = vld [vmem:[%s3465_s0 + $0x168] sm:$0xff]  }
  0x12   :  { %2599 = vmatprep.subr.bf16.mxu1 %v2804_v17  ;;  %v2217_v43 = vcombine.low %v525_v41, %v2819_v33  ;;  %v2218_v44 = vcombine.high %v525_v41, %v2819_v33  ;;  %v2834_v54 = vld [vmem:[%s3465_s0 + $0x158] sm:$0xff]   ;;  %v2839_v57 = vld [vmem:[%s3465_s0 + $0x1e0] sm:$0xff]   ;;  %v2843_v62 = vld [vmem:[%s3465_s0 + $0x1e8] sm:$0xff]  }
  0x13   :  { %v2837_v55 = vld [vmem:[%s3465_s0 + $0x198] sm:$0xff]   ;;  %v2838_v58 = vld [vmem:[%s3465_s0 + $0x160] sm:$0xff]   ;;  %v2846_v1 = vld [vmem:[%s3465_s0 + $0x128] sm:$0xff]  }
  0x14   :  { %2572 = vmatpush3.bf16.msra.mxu0 %v2805_v18  ;;  %1780 = vmatprep.mubr.bf16.mxu0 %v2218_v44  ;;  %v2836_v56 = vld [vmem:[%s3465_s0 + $0x118] sm:$0xff]   ;;  %v2840_v59 = vld [vmem:[%s3465_s0 + $0x120] sm:$0xff]   ;;  %v2847_v3 = vld [vmem:[%s3465_s0 + $0x1a8] sm:$0xff]  }
  0x15   :  { %2600 = vmatpush3.bf16.msra.mxu1 %v2806_v19  ;;  %2573 = vmatprep.subr.bf16.mxu0 %v2807_v20  ;;  %v2841_v60 = vld [vmem:[%s3465_s0 + $0x1a0] sm:$0xff]   ;;  %v2848_v5 = vld [vmem:[%s3467_s2 + $0x88] sm:$0xff]   ;;  %v2850_v7 = vld [vmem:[%s3465_s0 + $0x170] sm:$0xff]  }
  0x16   :  { %2601 = vmatprep.subr.bf16.mxu1 %v2808_v21  ;;  %v2844_v63 = vld [vmem:[%s3467_s2 + $0x80] sm:$0xff]   ;;  %v2849_v6 = vld [vmem:[%s3467_s2 + $0xc8] sm:$0xff]   ;;  %v2851_v10 = vld [vmem:[%s3465_s0 + $0x1f0] sm:$0xff]  }
  0x17   :  { %v2845_v0 = vld [vmem:[%s3467_s2 + $0xc0] sm:$0xff]   ;;  %v2236_v8 = vcombine.high %v2848_v5, %v2849_v6  ;;  %v2235_v9 = vcombine.low %v2848_v5, %v2849_v6  ;;  %v2852_v11 = vld [vmem:[%s3465_s0 + $0x130] sm:$0xff]   ;;  %v2854_v13 = vld [vmem:[%s3465_s0 + $0x178] sm:$0xff]  }
  0x18   :  { %2574 = vmatpush3.bf16.msra.mxu0 %v2809_v22  ;;  %v2234_v2 = vcombine.high %v2844_v63, %v2845_v0  ;;  %v2233_v4 = vcombine.low %v2844_v63, %v2845_v0  ;;  %v2853_v12 = vld [vmem:[%s3465_s0 + $0x1b0] sm:$0xff]   ;;  %v2855_v14 = vld [vmem:[%s3465_s0 + $0x1f8] sm:$0xff]   ;;  %v2869_v32 = vld [vmem:[%s3465_s0 + $0x288] sm:$0xff]  }
  0x19   :  { %2602 = vmatpush3.bf16.msra.mxu1 %v2810_v23  ;;  %2575 = vmatprep.subr.bf16.mxu0 %v2811_v24  ;;  %v2856_v15 = vld [vmem:[%s3465_s0 + $0x138] sm:$0xff]   ;;  %v2858_v17 = vld [vmem:[%s3467_s2 + $0x10] sm:$0xff]   ;;  %v2862_v23 = vld [vmem:[%s3465_s0 + $0x240] sm:$0xff]  }
  0x1a   :  { %2603 = vmatprep.subr.bf16.mxu1 %v2812_v25  ;;  %v2857_v16 = vld [vmem:[%s3465_s0 + $0x1b8] sm:$0xff]   ;;  %v2859_v18 = vld [vmem:[%s3467_s2 + $0x50] sm:$0xff]   ;;  %v2901_v6 = vld [vmem:[%s3467_s2 + $0x68] sm:$0xff]  }
  0x1b   :  { %v2860_v19 = vld [vmem:[%s3467_s2 + $0x18] sm:$0xff]   ;;  %v2221_v20 = vcombine.low %v2858_v17, %v2859_v18  ;;  %v2222_v21 = vcombine.high %v2858_v17, %v2859_v18  ;;  %v2870_v33 = vld [vmem:[%s3467_s2 + $0x90] sm:$0xff]   ;;  %v2910_v17 = vld [vmem:[%s3467_s2 + $0xa0] sm:$0xff]  }
  0x1c   :  { %2576 = vmatpush3.bf16.msra.mxu0 %v2813_v26  ;;  %v2861_v22 = vld [vmem:[%s3467_s2 + $0x58] sm:$0xff]   ;;  %v2863_v26 = vld [vmem:[%s3465_s0 + $0x2c0] sm:$0xff]   ;;  %v2871_v34 = vld [vmem:[%s3467_s2 + $0xd0] sm:$0xff]  }
  0x1d   :  { %2604 = vmatpush3.bf16.msra.mxu1 %v2814_v27  ;;  %2577 = vmatprep.subr.bf16.mxu0 %v2815_v28  ;;  %v2223_v24 = vcombine.low %v2860_v19, %v2861_v22  ;;  %v2224_v25 = vcombine.high %v2860_v19, %v2861_v22  ;;  %v2864_v27 = vld [vmem:[%s3465_s0 + $0x200] sm:$0xff]   ;;  %v2872_v35 = vld [vmem:[%s3465_s0 + $0x250] sm:$0xff]   ;;  %v2896_v63 = vld [vmem:[%s3465_s0 + $0x238] sm:$0xff]  }
  0x1e   :  { %2605 = vmatprep.subr.bf16.mxu1 %v2816_v29  ;;  %v2865_v28 = vld [vmem:[%s3465_s0 + $0x280] sm:$0xff]   ;;  %v2866_v29 = vld [vmem:[%s3465_s0 + $0x248] sm:$0xff]   ;;  %v2873_v38 = vld [vmem:[%s3465_s0 + $0x2d0] sm:$0xff]  }
  0x1f   :  { %v2876_v41 = vld [vmem:[%s3465_s0 + $0x210] sm:$0xff]   ;;  %v2897_v0 = vld [vmem:[%s3465_s0 + $0x2b8] sm:$0xff]   ;;  %v2911_v18 = vld [vmem:[%s3467_s2 + $0xe0] sm:$0xff]  }
  0x20   :  { %2578 = vmatpush3.bf16.msra.mxu0 %v2817_v30  ;;  %v2867_v30 = vld [vmem:[%s3465_s0 + $0x2c8] sm:$0xff]   ;;  %v2912_v19 = vld [vmem:[%s3465_s0 + $0x350] sm:$0xff]  }
  0x21   :  { %2606 = vmatpush3.bf16.msra.mxu1 %v2818_v31  ;;  %2619 = vmatprep.subr.bf16.mxu0 %v2822_v36  ;;  %v2868_v31 = vld [vmem:[%s3465_s0 + $0x208] sm:$0xff]   ;;  %v2238_v36 = vcombine.high %v2870_v33, %v2871_v34  ;;  %v2913_v22 = vld [vmem:[%s3465_s0 + $0x3d0] sm:$0xff]  }
  0x22   :  { %2647 = vmatprep.subr.bf16.mxu1 %v2823_v39  ;;  %v2874_v39 = vld [vmem:[%s3467_s2 + $0x98] sm:$0xff]  }
  0x23   :  { %1781 = vmatmul.mubr.bf16.vlgmr.msra.gmra.mrb[0].mxu0 %v2217_v43  ;;  %v2877_v43 = vld [vmem:[%s3465_s0 + $0x290] sm:$0xff]  }
  0x24   :  { %1830 = vmatmul.mubr.bf16.vlgmr.msra.gmra.mrb[0].mxu1 %v2219_v37  ;;  %2620 = vmatpush3.bf16.msra.mxu0 %v2824_v42  ;;  %v2237_v37 = vcombine.low %v2870_v33, %v2871_v34  ;;  %v2922_v33 = vld [vmem:[%s3465_s0 + $0x360] sm:$0xff]  }
  0x25   :  { %2648 = vmatpush3.bf16.msra.mxu1 %v2825_v40  ;;  %2621 = vmatprep.subr.bf16.mxu0 %v2826_v46  ;;  %v2875_v40 = vld [vmem:[%s3467_s2 + $0xd8] sm:$0xff]   ;;  %v2923_v34 = vld [vmem:[%s3465_s0 + $0x3e0] sm:$0xff]  }
  0x26   :  { %2649 = vmatprep.subr.bf16.mxu1 %v2827_v45  ;;  %1788 = vmatprep.mubr.bf16.mxu0 %v2234_v2  ;;  %v2240_v42 = vcombine.high %v2874_v39, %v2875_v40  ;;  %v2239_v44 = vcombine.low %v2874_v39, %v2875_v40  ;;  %v2878_v45 = vld [vmem:[%s3465_s0 + $0x258] sm:$0xff]   ;;  %v2899_v2 = vld [vmem:[%s3467_s2 + $0x60] sm:$0xff]   ;;  %v2928_v39 = vld [vmem:[%s3465_s0 + $0x328] sm:$0xff]  }
  0x27   :  { %1837 = vmatprep.mubr.bf16.mxu1 %v2236_v8  ;;  %v2879_v46 = vld [vmem:[%s3465_s0 + $0x2d8] sm:$0xff]   ;;  %v2929_v40 = vld [vmem:[%s3465_s0 + $0x3a8] sm:$0xff]  }
  0x28   :  { %2622 = vmatpush3.bf16.msra.mxu0 %v2828_v48  ;;  %v2881_v48 = vld [vmem:[%s3465_s0 + $0x298] sm:$0xff]  }
  0x29   :  { %2650 = vmatpush3.bf16.msra.mxu1 %v2829_v47  ;;  %2623 = vmatprep.subr.bf16.mxu0 %v2830_v50  ;;  %v2880_v47 = vld [vmem:[%s3465_s0 + $0x218] sm:$0xff]   ;;  %v2883_v50 = vld [vmem:[%s3465_s0 + $0x2e0] sm:$0xff]  }
  0x2a   :  { %2651 = vmatprep.subr.bf16.mxu1 %v2831_v49  ;;  %v2882_v49 = vld [vmem:[%s3465_s0 + $0x260] sm:$0xff]  }
  0x2b   :  { %1789 = vmatmul.mubr.bf16.gmra.mrb[4].mxu0 %v2233_v4 }
  0x2c   :  { %2624 = vmatpush3.bf16.msra.mxu0 %v2832_v52  ;;  %1838 = vmatmul.mubr.bf16.gmra.mrb[4].mxu1 %v2235_v9  ;;  %v2885_v52 = vld [vmem:[%s3465_s0 + $0x2a0] sm:$0xff]  }
  0x2d   :  { %2652 = vmatpush3.bf16.msra.mxu1 %v2833_v51  ;;  %2625 = vmatprep.subr.bf16.mxu0 %v2834_v54  ;;  %v2884_v51 = vld [vmem:[%s3465_s0 + $0x220] sm:$0xff]   ;;  %v2887_v54 = vld [vmem:[%s3465_s0 + $0x2e8] sm:$0xff]  }
  0x2e   :  { %2653 = vmatprep.subr.bf16.mxu1 %v2835_v53  ;;  %1878 = vmatprep.mubr.bf16.mxu0 %v2222_v21  ;;  %v2886_v53 = vld [vmem:[%s3465_s0 + $0x268] sm:$0xff]   ;;  %v2241_v21 = vcombine.low %v2910_v17, %v2911_v18 }
  0x2f   :  { %1927 = vmatprep.mubr.bf16.mxu1 %v2224_v25  ;;  %v2916_v25 = vld [vmem:[%s3465_s0 + $0x310] sm:$0xff]  }
  0x30   :  { %2626 = vmatpush3.bf16.msra.mxu0 %v2836_v56  ;;  %v2889_v56 = vld [vmem:[%s3465_s0 + $0x2a8] sm:$0xff]  }
  0x31   :  { %2654 = vmatpush3.bf16.msra.mxu1 %v2837_v55  ;;  %2627 = vmatprep.subr.bf16.mxu0 %v2838_v58  ;;  %v2888_v55 = vld [vmem:[%s3465_s0 + $0x228] sm:$0xff]   ;;  %v2891_v58 = vld [vmem:[%s3465_s0 + $0x2f0] sm:$0xff]  }
  0x32   :  { %2655 = vmatprep.subr.bf16.mxu1 %v2839_v57  ;;  %v2890_v57 = vld [vmem:[%s3465_s0 + $0x270] sm:$0xff]  }
  0x34   :  { %2628 = vmatpush3.bf16.msra.mxu0 %v2840_v59  ;;  %v2892_v59 = vld [vmem:[%s3465_s0 + $0x230] sm:$0xff]  }
  0x35   :  { %2656 = vmatpush3.bf16.msra.mxu1 %v2841_v60  ;;  %2629 = vmatprep.subr.bf16.mxu0 %v2842_v61  ;;  %v2893_v60 = vld [vmem:[%s3465_s0 + $0x2b0] sm:$0xff]   ;;  %v2894_v61 = vld [vmem:[%s3465_s0 + $0x278] sm:$0xff]  }
  0x36   :  { %2657 = vmatprep.subr.bf16.mxu1 %v2843_v62  ;;  %v2895_v62 = vld [vmem:[%s3465_s0 + $0x2f8] sm:$0xff]  }
  0x38   :  { %2630 = vmatpush3.bf16.msra.mxu0 %v2846_v1  ;;  %v2898_v1 = vld [vmem:[%s3467_s2 + $0x20] sm:$0xff]  }
  0x39   :  { %2658 = vmatpush3.bf16.msra.mxu1 %v2847_v3  ;;  %2631 = vmatprep.subr.bf16.mxu0 %v2850_v7  ;;  %v2900_v3 = vld [vmem:[%s3467_s2 + $0x28] sm:$0xff]   ;;  %v2225_v4 = vcombine.low %v2898_v1, %v2899_v2  ;;  %v2226_v5 = vcombine.high %v2898_v1, %v2899_v2  ;;  %v2902_v7 = vld [vmem:[%s3465_s0 + $0x340] sm:$0xff]  }
  0x3a   :  { %2659 = vmatprep.subr.bf16.mxu1 %v2851_v10  ;;  %v2227_v8 = vcombine.low %v2900_v3, %v2901_v6  ;;  %v2228_v9 = vcombine.high %v2900_v3, %v2901_v6  ;;  %v2903_v10 = vld [vmem:[%s3465_s0 + $0x3c0] sm:$0xff]  }
  0x3c   :  { %2632 = vmatpush3.bf16.msra.mxu0 %v2852_v11  ;;  %v2904_v11 = vld [vmem:[%s3465_s0 + $0x300] sm:$0xff]  }
  0x3d   :  { %2660 = vmatpush3.bf16.msra.mxu1 %v2853_v12  ;;  %2633 = vmatprep.subr.bf16.mxu0 %v2854_v13  ;;  %v2905_v12 = vld [vmem:[%s3465_s0 + $0x380] sm:$0xff]   ;;  %v2906_v13 = vld [vmem:[%s3465_s0 + $0x348] sm:$0xff]  }
  0x3e   :  { %2661 = vmatprep.subr.bf16.mxu1 %v2855_v14  ;;  %v2907_v14 = vld [vmem:[%s3465_s0 + $0x3c8] sm:$0xff]  }
  0x40   :  { %2634 = vmatpush3.bf16.msra.mxu0 %v2856_v15  ;;  %v2908_v15 = vld [vmem:[%s3465_s0 + $0x308] sm:$0xff]  }
  0x41   :  { %2662 = vmatpush3.bf16.msra.mxu1 %v2857_v16  ;;  %2675 = vmatprep.subr.bf16.mxu0 %v2862_v23  ;;  %v2909_v16 = vld [vmem:[%s3465_s0 + $0x388] sm:$0xff]  }
  0x42   :  { %2703 = vmatprep.subr.bf16.mxu1 %v2863_v26  ;;  %v2914_v23 = vld [vmem:[%s3467_s2 + $0xa8] sm:$0xff]  }
  0x43   :  { %1879 = vmatmul.mubr.bf16.vlgmr.msra.gmra.mrb[8].mxu0 %v2221_v20  ;;  %v2242_v20 = vcombine.high %v2910_v17, %v2911_v18 }
  0x44   :  { %1928 = vmatmul.mubr.bf16.vlgmr.msra.gmra.mrb[8].mxu1 %v2223_v24  ;;  %2676 = vmatpush3.bf16.msra.mxu0 %v2864_v27  ;;  %v2915_v24 = vld [vmem:[%s3467_s2 + $0xe8] sm:$0xff]   ;;  %v2917_v27 = vld [vmem:[%s3465_s0 + $0x390] sm:$0xff]  }
  0x45   :  { %2704 = vmatpush3.bf16.msra.mxu1 %v2865_v28  ;;  %2677 = vmatprep.subr.bf16.mxu0 %v2866_v29  ;;  %v2244_v26 = vcombine.high %v2914_v23, %v2915_v24  ;;  %v2243_v28 = vcombine.low %v2914_v23, %v2915_v24  ;;  %v2918_v29 = vld [vmem:[%s3465_s0 + $0x358] sm:$0xff]  }
  0x46   :  { %2705 = vmatprep.subr.bf16.mxu1 %v2867_v30  ;;  %1886 = vmatprep.mubr.bf16.mxu0 %v2238_v36  ;;  %v2919_v30 = vld [vmem:[%s3465_s0 + $0x3d8] sm:$0xff]   ;;  %v2925_v36 = vld [vmem:[%s3465_s0 + $0x3a0] sm:$0xff]  }
  0x47   :  { %1935 = vmatprep.mubr.bf16.mxu1 %v2240_v42  ;;  %v2931_v42 = vld [vmem:[%s3465_s0 + $0x3f0] sm:$0xff]  }
  0x48   :  { %2678 = vmatpush3.bf16.msra.mxu0 %v2868_v31  ;;  %v2920_v31 = vld [vmem:[%s3465_s0 + $0x318] sm:$0xff]  }
  0x49   :  { %2706 = vmatpush3.bf16.msra.mxu1 %v2869_v32  ;;  %2679 = vmatprep.subr.bf16.mxu0 %v2872_v35  ;;  %v2921_v32 = vld [vmem:[%s3465_s0 + $0x398] sm:$0xff]   ;;  %v2924_v35 = vld [vmem:[%s3465_s0 + $0x320] sm:$0xff]  }
  0x4a   :  { %2707 = vmatprep.subr.bf16.mxu1 %v2873_v38  ;;  %v2927_v38 = vld [vmem:[%s3465_s0 + $0x3e8] sm:$0xff]  }
  0x4b   :  { %1887 = vmatmul.mubr.bf16.gmra.mrb[12].mxu0 %v2237_v37  ;;  %v2926_v37 = vld [vmem:[%s3465_s0 + $0x368] sm:$0xff]  }
  0x4c   :  { %2680 = vmatpush3.bf16.msra.mxu0 %v2876_v41  ;;  %1936 = vmatmul.mubr.bf16.gmra.mrb[12].mxu1 %v2239_v44  ;;  %v2930_v41 = vld [vmem:[%s3465_s0 + $0x370] sm:$0xff]  }
  0x4d   :  { %2708 = vmatpush3.bf16.msra.mxu1 %v2877_v43  ;;  %2681 = vmatprep.subr.bf16.mxu0 %v2878_v45  ;;  %v2932_v43 = vld [vmem:[%s3465_s0 + $0x330] sm:$0xff]   ;;  %v2934_v45 = vld [vmem:[%s3465_s0 + $0x378] sm:$0xff]  }
  0x4e   :  { %2709 = vmatprep.subr.bf16.mxu1 %v2879_v46  ;;  %1976 = vmatprep.mubr.bf16.mxu0 %v2226_v5  ;;  %v2933_v44 = vld [vmem:[%s3465_s0 + $0x3b0] sm:$0xff]   ;;  %v2935_v46 = vld [vmem:[%s3465_s0 + $0x3f8] sm:$0xff]  }
  0x4f   :  { %2025 = vmatprep.mubr.bf16.mxu1 %v2228_v9 }
  0x50   :  { %2682 = vmatpush3.bf16.msra.mxu0 %v2880_v47  ;;  %v2936_v47 = vld [vmem:[%s3465_s0 + $0x338] sm:$0xff]  }
  0x51   :  { %2710 = vmatpush3.bf16.msra.mxu1 %v2881_v48  ;;  %2683 = vmatprep.subr.bf16.mxu0 %v2882_v49  ;;  %v2937_v48 = vld [vmem:[%s3465_s0 + $0x3b8] sm:$0xff]   ;;  %v2938_v49 = vld [vmem:[%s3467_s2 + $0x30] sm:$0xff]  }
  0x52   :  { %2711 = vmatprep.subr.bf16.mxu1 %v2883_v50  ;;  %v2939_v50 = vld [vmem:[%s3467_s2 + $0x70] sm:$0xff]  }
  0x54   :  { %2684 = vmatpush3.bf16.msra.mxu0 %v2884_v51  ;;  %v2940_v51 = vld [vmem:[%s3467_s2 + $0x38] sm:$0xff]  }
  0x55   :  { %2712 = vmatpush3.bf16.msra.mxu1 %v2885_v52  ;;  %2685 = vmatprep.subr.bf16.mxu0 %v2886_v53  ;;  %v2229_v52 = vcombine.low %v2938_v49, %v2939_v50  ;;  %v2230_v53 = vcombine.high %v2938_v49, %v2939_v50 }
  0x56   :  { %2713 = vmatprep.subr.bf16.mxu1 %v2887_v54  ;;  %v2941_v54 = vld [vmem:[%s3467_s2 + $0x78] sm:$0xff]  }
  0x58   :  { %2686 = vmatpush3.bf16.msra.mxu0 %v2888_v55  ;;  %v2942_v55 = vld [vmem:[%s3467_s2 + $0xb0] sm:$0xff]  }
  0x59   :  { %2714 = vmatpush3.bf16.msra.mxu1 %v2889_v56  ;;  %2687 = vmatprep.subr.bf16.mxu0 %v2890_v57  ;;  %v2231_v56 = vcombine.low %v2940_v51, %v2941_v54  ;;  %v2232_v57 = vcombine.high %v2940_v51, %v2941_v54 }
  0x5a   :  { %2715 = vmatprep.subr.bf16.mxu1 %v2891_v58  ;;  %v2943_v58 = vld [vmem:[%s3467_s2 + $0xf0] sm:$0xff]  }
  0x5c   :  { %2688 = vmatpush3.bf16.msra.mxu0 %v2892_v59  ;;  %v2944_v59 = vld [vmem:[%s3467_s2 + $0xb8] sm:$0xff]  }
  0x5d   :  { %2716 = vmatpush3.bf16.msra.mxu1 %v2893_v60  ;;  %2689 = vmatprep.subr.bf16.mxu0 %v2894_v61  ;;  %v2246_v60 = vcombine.high %v2942_v55, %v2943_v58  ;;  %v2945_v61 = vld [vmem:[%s3467_s2 + $0xf8] sm:$0xff]  }
  0x5e   :  { %2717 = vmatprep.subr.bf16.mxu1 %v2895_v62  ;;  %v2248_v62 = vcombine.high %v2944_v59, %v2945_v61 }
  0x60   :  { %2690 = vmatpush3.bf16.msra.mxu0 %v2896_v63  ;;  %v2245_v63 = vcombine.low %v2942_v55, %v2943_v58 }
  0x61   :  { %2718 = vmatpush3.bf16.msra.mxu1 %v2897_v0  ;;  %2731 = vmatprep.subr.bf16.mxu0 %v2902_v7  ;;  %v2247_v0 = vcombine.low %v2944_v59, %v2945_v61 }
  0x62   :  { %2759 = vmatprep.subr.bf16.mxu1 %v2903_v10 }
  0x63   :  { %1977 = vmatmul.mubr.bf16.vlgmr.msra.gmra.mrb[16].mxu0 %v2225_v4 }
  0x64   :  { %2026 = vmatmul.mubr.bf16.vlgmr.msra.gmra.mrb[16].mxu1 %v2227_v8  ;;  %2732 = vmatpush3.bf16.msra.mxu0 %v2904_v11  ;;  %v2216_v8 = vld [vmem:[%s3466_s1] ss:$0 sm:$0xff] }
  0x65   :  { %2760 = vmatpush3.bf16.msra.mxu1 %v2905_v12  ;;  %2733 = vmatprep.subr.bf16.mxu0 %v2906_v13 }
  0x66   :  { %2761 = vmatprep.subr.bf16.mxu1 %v2907_v14  ;;  %1984 = vmatprep.mubr.bf16.mxu0 %v2242_v20 }
  0x67   :  { %2033 = vmatprep.mubr.bf16.mxu1 %v2244_v26 }
  0x68   :  { %2734 = vmatpush3.bf16.msra.mxu0 %v2908_v15 }
  0x69   :  { %2762 = vmatpush3.bf16.msra.mxu1 %v2909_v16  ;;  %2735 = vmatprep.subr.bf16.mxu0 %v2912_v19 }
  0x6a   :  { %2763 = vmatprep.subr.bf16.mxu1 %v2913_v22 }
  0x6b   :  { %1985 = vmatmul.mubr.bf16.gmra.mrb[20].mxu0 %v2241_v21 }
  0x6c   :  { %2736 = vmatpush3.bf16.msra.mxu0 %v2916_v25  ;;  %2034 = vmatmul.mubr.bf16.gmra.mrb[20].mxu1 %v2243_v28 }
  0x6d   :  { %2764 = vmatpush3.bf16.msra.mxu1 %v2917_v27  ;;  %2737 = vmatprep.subr.bf16.mxu0 %v2918_v29 }
  0x6e   :  { %2765 = vmatprep.subr.bf16.mxu1 %v2919_v30  ;;  %2074 = vmatprep.mubr.bf16.mxu0 %v2230_v53 }
  0x6f   :  { %2123 = vmatprep.mubr.bf16.mxu1 %v2232_v57 }
  0x70   :  { %2738 = vmatpush3.bf16.msra.mxu0 %v2920_v31 }
  0x71   :  { %2766 = vmatpush3.bf16.msra.mxu1 %v2921_v32  ;;  %2739 = vmatprep.subr.bf16.mxu0 %v2922_v33 }
  0x72   :  { %2767 = vmatprep.subr.bf16.mxu1 %v2923_v34 }
  0x74   :  { %2740 = vmatpush3.bf16.msra.mxu0 %v2924_v35 }
  0x75   :  { %2768 = vmatpush3.bf16.msra.mxu1 %v2925_v36  ;;  %2741 = vmatprep.subr.bf16.mxu0 %v2926_v37 }
  0x76   :  { %2769 = vmatprep.subr.bf16.mxu1 %v2927_v38 }
  0x78   :  { %2742 = vmatpush3.bf16.msra.mxu0 %v2928_v39 }
  0x79   :  { %2770 = vmatpush3.bf16.msra.mxu1 %v2929_v40  ;;  %2743 = vmatprep.subr.bf16.mxu0 %v2930_v41 }
  0x7a   :  { %2771 = vmatprep.subr.bf16.mxu1 %v2931_v42 }
  0x7c   :  { %2744 = vmatpush3.bf16.msra.mxu0 %v2932_v43 }
  0x7d   :  { %2772 = vmatpush3.bf16.msra.mxu1 %v2933_v44  ;;  %2745 = vmatprep.subr.bf16.mxu0 %v2934_v45 }
  0x7e   :  { %2773 = vmatprep.subr.bf16.mxu1 %v2935_v46 }
  0x80   :  { %2746 = vmatpush3.bf16.msra.mxu0 %v2936_v47 }
  0x81   :  { %2774 = vmatpush3.bf16.msra.mxu1 %v2937_v48 }
  0x83   :  { %2075 = vmatmul.mubr.bf16.vlgmr.msra.gmra.mrb[24].mxu0 %v2229_v52 }
  0x84   :  { %2124 = vmatmul.mubr.bf16.vlgmr.msra.gmra.mrb[24].mxu1 %v2231_v56  ;;  %2082 = vmatprep.mubr.bf16.mxu0 %v2246_v60 }
  0x85   :  { %2131 = vmatprep.mubr.bf16.mxu1 %v2248_v62 }
  0x8b   :  { %2083 = vmatmul.mubr.bf16.gmra.mrb[28].mxu0 %v2245_v63 }
  0x8c   :  { %2132 = vmatmul.mubr.bf16.gmra.mrb[28].mxu1 %v2247_v0 }
  0xf6   :  { %v2579_v6 = vpop.f32.mrb[0].mxu0 }
  0xf7   :  { %v2607_v1 = vpop.f32.mrb[0].mxu1  ;;  %v2580_v9 = vpop.f32.mrb[1].mxu0 }
  0xf8   :  { %v2608_v2 = vpop.f32.mrb[1].mxu1  ;;  %v2581_v10 = vadd.f32 %v2580_v9, %v2579_v6  ;;  %v2582_v11 = vpop.f32.mrb[2].mxu0 }
  0xf9   :  { %v2609_v3 = vadd.f32 %v2608_v2, %v2607_v1  ;;  %v2610_v4 = vpop.f32.mrb[2].mxu1  ;;  %v2583_v12 = vpop.f32.mrb[3].mxu0 }
  0xfa   :  { %v2611_v5 = vpop.f32.mrb[3].mxu1  ;;  %v1783_v13 = vadd.f32 %v2581_v10, %v2216_v8  ;;  %v2584_v14 = vadd.f32 %v2583_v12, %v2582_v11 }
  0xfb   :  { %v2612_v7 = vadd.f32 %v2611_v5, %v2610_v4 }
  0xfc   :  { %v1832_v15 = vadd.f32 %v2609_v3, %v1783_v13  ;;  %v1786_v16 = vadd.f32 %v2584_v14, %v2216_v8 }
  0xfe   :  { %v1835_v17 = vadd.f32 %v2612_v7, %v1786_v16  ;;  %v2585_v18 = vpop.f32.mrb[4].mxu0 }
  0xff   :  { %v2586_v19 = vpop.f32.mrb[5].mxu0  ;;  %v2613_v24 = vpop.f32.mrb[4].mxu1 }
 0x100   :  { %v2587_v20 = vadd.f32 %v2586_v19, %v2585_v18  ;;  %v2588_v21 = vpop.f32.mrb[6].mxu0  ;;  %v2614_v26 = vpop.f32.mrb[5].mxu1 }
 0x101   :  { %v2589_v22 = vpop.f32.mrb[7].mxu0  ;;  %v2615_v28 = vadd.f32 %v2614_v26, %v2613_v24  ;;  %v2616_v29 = vpop.f32.mrb[6].mxu1 }
 0x102   :  { %v1791_v23 = vadd.f32 %v2587_v20, %v2216_v8  ;;  %v2590_v25 = vadd.f32 %v2589_v22, %v2588_v21  ;;  %v2617_v30 = vpop.f32.mrb[7].mxu1 }
 0x103   :  { %v2618_v32 = vadd.f32 %v2617_v30, %v2616_v29 }
 0x104   :  { %v1794_v27 = vadd.f32 %v2590_v25, %v2216_v8  ;;  %v1840_v31 = vadd.f32 %v2615_v28, %v1791_v23 }
 0x106   :  { %v1843_v33 = vadd.f32 %v2618_v32, %v1794_v27 }
 0x116   :  { %v2635_v34 = vpop.f32.mrb[8].mxu0 }
 0x117   :  { %v2636_v35 = vpop.f32.mrb[9].mxu0  ;;  %v2663_v36 = vpop.f32.mrb[8].mxu1 }
 0x118   :  { %v2637_v37 = vadd.f32 %v2636_v35, %v2635_v34  ;;  %v2638_v38 = vpop.f32.mrb[10].mxu0  ;;  %v2664_v39 = vpop.f32.mrb[9].mxu1 }
 0x119   :  { %v2639_v40 = vpop.f32.mrb[11].mxu0  ;;  %v2665_v42 = vadd.f32 %v2664_v39, %v2663_v36  ;;  %v2666_v43 = vpop.f32.mrb[10].mxu1 }
 0x11a   :  { %v1881_v41 = vadd.f32 %v2637_v37, %v1832_v15  ;;  %v2640_v44 = vadd.f32 %v2639_v40, %v2638_v38  ;;  %v2667_v45 = vpop.f32.mrb[11].mxu1 }
 0x11b   :  { %v2668_v48 = vadd.f32 %v2667_v45, %v2666_v43 }
 0x11c   :  { %v1930_v46 = vadd.f32 %v2665_v42, %v1881_v41  ;;  %v1884_v47 = vadd.f32 %v2640_v44, %v1835_v17 }
 0x11e   :  { %v1933_v49 = vadd.f32 %v2668_v48, %v1884_v47  ;;  %v2641_v50 = vpop.f32.mrb[12].mxu0 }
 0x11f   :  { %v2642_v51 = vpop.f32.mrb[13].mxu0  ;;  %v2669_v56 = vpop.f32.mrb[12].mxu1 }
 0x120   :  { %v2643_v52 = vadd.f32 %v2642_v51, %v2641_v50  ;;  %v2644_v53 = vpop.f32.mrb[14].mxu0  ;;  %v2670_v58 = vpop.f32.mrb[13].mxu1 }
 0x121   :  { %v2645_v54 = vpop.f32.mrb[15].mxu0  ;;  %v2671_v60 = vadd.f32 %v2670_v58, %v2669_v56  ;;  %v2672_v61 = vpop.f32.mrb[14].mxu1 }
 0x122   :  { %v1889_v55 = vadd.f32 %v2643_v52, %v1840_v31  ;;  %v2646_v57 = vadd.f32 %v2645_v54, %v2644_v53  ;;  %v2673_v62 = vpop.f32.mrb[15].mxu1 }
 0x123   :  { %v2674_v0 = vadd.f32 %v2673_v62, %v2672_v61 }
 0x124   :  { %v1892_v59 = vadd.f32 %v2646_v57, %v1843_v33  ;;  %v1938_v63 = vadd.f32 %v2671_v60, %v1889_v55 }
 0x126   :  { %v1941_v1 = vadd.f32 %v2674_v0, %v1892_v59 }
 0x136   :  { %v2691_v2 = vpop.f32.mrb[16].mxu0 }
 0x137   :  { %v2692_v3 = vpop.f32.mrb[17].mxu0  ;;  %v2719_v4 = vpop.f32.mrb[16].mxu1 }
 0x138   :  { %v2693_v5 = vadd.f32 %v2692_v3, %v2691_v2  ;;  %v2694_v6 = vpop.f32.mrb[18].mxu0  ;;  %v2720_v7 = vpop.f32.mrb[17].mxu1 }
 0x139   :  { %v2695_v8 = vpop.f32.mrb[19].mxu0  ;;  %v2721_v10 = vadd.f32 %v2720_v7, %v2719_v4  ;;  %v2722_v11 = vpop.f32.mrb[18].mxu1 }
 0x13a   :  { %v1979_v9 = vadd.f32 %v2693_v5, %v1930_v46  ;;  %v2696_v12 = vadd.f32 %v2695_v8, %v2694_v6  ;;  %v2723_v13 = vpop.f32.mrb[19].mxu1 }
 0x13b   :  { %v2724_v16 = vadd.f32 %v2723_v13, %v2722_v11 }
 0x13c   :  { %v2028_v14 = vadd.f32 %v2721_v10, %v1979_v9  ;;  %v1982_v15 = vadd.f32 %v2696_v12, %v1933_v49 }
 0x13e   :  { %v2031_v17 = vadd.f32 %v2724_v16, %v1982_v15  ;;  %v2697_v18 = vpop.f32.mrb[20].mxu0 }
 0x13f   :  { %v2698_v19 = vpop.f32.mrb[21].mxu0  ;;  %v2725_v24 = vpop.f32.mrb[20].mxu1 }
 0x140   :  { %v2699_v20 = vadd.f32 %v2698_v19, %v2697_v18  ;;  %v2700_v21 = vpop.f32.mrb[22].mxu0  ;;  %v2726_v26 = vpop.f32.mrb[21].mxu1 }
 0x141   :  { %v2701_v22 = vpop.f32.mrb[23].mxu0  ;;  %v2727_v28 = vadd.f32 %v2726_v26, %v2725_v24  ;;  %v2728_v29 = vpop.f32.mrb[22].mxu1 }
 0x142   :  { %v1987_v23 = vadd.f32 %v2699_v20, %v1938_v63  ;;  %v2702_v25 = vadd.f32 %v2701_v22, %v2700_v21  ;;  %v2729_v30 = vpop.f32.mrb[23].mxu1 }
 0x143   :  { %v2730_v32 = vadd.f32 %v2729_v30, %v2728_v29 }
 0x144   :  { %v1990_v27 = vadd.f32 %v2702_v25, %v1941_v1  ;;  %v2036_v31 = vadd.f32 %v2727_v28, %v1987_v23 }
 0x146   :  { %v2039_v33 = vadd.f32 %v2730_v32, %v1990_v27 }
 0x156   :  { %v2747_v34 = vpop.f32.mrb[24].mxu0 }
 0x157   :  { %v2748_v35 = vpop.f32.mrb[25].mxu0  ;;  %v2775_v36 = vpop.f32.mrb[24].mxu1 }
 0x158   :  { %v2749_v37 = vadd.f32 %v2748_v35, %v2747_v34  ;;  %v2750_v38 = vpop.f32.mrb[26].mxu0  ;;  %v2776_v39 = vpop.f32.mrb[25].mxu1 }
 0x159   :  { %v2751_v40 = vpop.f32.mrb[27].mxu0  ;;  %v2777_v42 = vadd.f32 %v2776_v39, %v2775_v36  ;;  %v2778_v43 = vpop.f32.mrb[26].mxu1 }
 0x15a   :  { %v2077_v41 = vadd.f32 %v2749_v37, %v2028_v14  ;;  %v2752_v44 = vadd.f32 %v2751_v40, %v2750_v38  ;;  %v2779_v45 = vpop.f32.mrb[27].mxu1 }
 0x15b   :  { %v2780_v48 = vadd.f32 %v2779_v45, %v2778_v43 }
 0x15c   :  { %v2126_v46 = vadd.f32 %v2777_v42, %v2077_v41  ;;  %v2080_v47 = vadd.f32 %v2752_v44, %v2031_v17 }
 0x15e   :  { %v2140_v49 = vmax.f32 %v2126_v46, 0.0  ;;  %v2129_v50 = vadd.f32 %v2780_v48, %v2080_v47  ;;  %v2753_v51 = vpop.f32.mrb[28].mxu0 }
 0x15f   :  { %v2754_v52 = vpop.f32.mrb[29].mxu0  ;;  %v2781_v54 = vpop.f32.mrb[28].mxu1 }
 0x160   :  { %2145 = vst.msk [vmem:[%s3468_s3] sm:$0xff] %vm2144_vm0, %v2140_v49  ;;  %v2141_v53 = vmax.f32 %v2129_v50, 0.0  ;;  %v2755_v55 = vadd.f32 %v2754_v52, %v2753_v51  ;;  %v2756_v56 = vpop.f32.mrb[30].mxu0  ;;  %v2782_v57 = vpop.f32.mrb[29].mxu1 }
 0x161   :  { %v2757_v58 = vpop.f32.mrb[31].mxu0  ;;  %v2783_v60 = vadd.f32 %v2782_v57, %v2781_v54  ;;  %v2784_v61 = vpop.f32.mrb[30].mxu1 }
 0x162   :  { %2146 = vst.msk [vmem:[%s3468_s3 + $0x8] sm:$0xff] %vm2144_vm0, %v2141_v53  ;;  %v2085_v59 = vadd.f32 %v2755_v55, %v2036_v31  ;;  %v2758_v62 = vadd.f32 %v2757_v58, %v2756_v56  ;;  %v2785_v63 = vpop.f32.mrb[31].mxu1 }
 0x163   :  { %v2786_v2 = vadd.f32 %v2785_v63, %v2784_v61 }
 0x164   :  { %v2134_v0 = vadd.f32 %v2783_v60, %v2085_v59  ;;  %v2088_v1 = vadd.f32 %v2758_v62, %v2039_v33 }
 0x166   :  { %v2142_v3 = vmax.f32 %v2134_v0, 0.0  ;;  %v2137_v4 = vadd.f32 %v2786_v2, %v2088_v1 }
 0x168   :  { %2147 = vst.msk [vmem:[%s3468_s3 + $0x10] sm:$0xff] %vm2144_vm0, %v2142_v3  ;;  %v2143_v5 = vmax.f32 %v2137_v4, 0.0 }
 0x16a   :  { %2148 = vst.msk [vmem:[%s3468_s3 + $0x18] sm:$0xff] %vm2144_vm0, %v2143_v5 }

// kernel: vae_forward.13
= control target key start
LH: loop header
LB: loop body
LE: loop exit
PB: predicated region body
PF: predicated region fallthrough
CT: control target
= control target key end

     0   :  { %vm1322_vm0 = vcmask 261120   ;;  %s2329_s1 = inlined_call_operand.vmem [shape: bf16[1024,32], index: 1, kind: input, shape index: {}]   ;;  %s2330_s0 = inlined_call_operand.vmem [shape: bf16[128,1024], index: 0, kind: input, shape index: {}]   ;;  %s2331_s2 = inlined_call_operand.vmem [shape: f32[1,32], index: 2, kind: input, shape index: {}]   ;;  %s2332_s3 = inlined_call_operand.vmem [shape: f32[128,32], index: 3, kind: output, shape index: {}]  }
   0x1   :  { %v1728_v0 = vld [vmem:[%s2329_s1 + $0x40] sm:$0xff]   ;;  %v1732_v4 = vld [vmem:[%s2329_s1 + $0x48] sm:$0xff]   ;;  %v1736_v8 = vld [vmem:[%s2329_s1 + $0x50] sm:$0xff]  }
   0x2   :  { %v1729_v1 = vld [vmem:[%s2329_s1 + $0xc0] sm:$0xff]   ;;  %1472 = vmatprep.subr.bf16.mxu0 %v1728_v0  ;;  %v1733_v5 = vld [vmem:[%s2329_s1 + $0xc8] sm:$0xff]   ;;  %v1737_v9 = vld [vmem:[%s2329_s1 + $0xd0] sm:$0xff]  }
   0x3   :  { %v1730_v2 = vld [vmem:[%s2329_s1] sm:$0xff]   ;;  %1536 = vmatprep.subr.bf16.mxu1 %v1729_v1  ;;  %v1734_v6 = vld [vmem:[%s2329_s1 + $0x8] sm:$0xff]   ;;  %v1738_v10 = vld [vmem:[%s2329_s1 + $0x10] sm:$0xff]  }
   0x4   :  { %v1731_v3 = vld [vmem:[%s2329_s1 + $0x80] sm:$0xff]   ;;  %1473 = vmatpush3.bf16.msra.mxu0 %v1730_v2  ;;  %v1735_v7 = vld [vmem:[%s2329_s1 + $0x88] sm:$0xff]   ;;  %v1739_v11 = vld [vmem:[%s2329_s1 + $0x90] sm:$0xff]  }
   0x5   :  { %1537 = vmatpush3.bf16.msra.mxu1 %v1731_v3  ;;  %1474 = vmatprep.subr.bf16.mxu0 %v1732_v4  ;;  %v1740_v12 = vld [vmem:[%s2329_s1 + $0x58] sm:$0xff]   ;;  %v1744_v16 = vld [vmem:[%s2329_s1 + $0x60] sm:$0xff]   ;;  %v1748_v20 = vld [vmem:[%s2329_s1 + $0x68] sm:$0xff]  }
   0x6   :  { %1538 = vmatprep.subr.bf16.mxu1 %v1733_v5  ;;  %v1741_v13 = vld [vmem:[%s2329_s1 + $0xd8] sm:$0xff]   ;;  %v1745_v17 = vld [vmem:[%s2329_s1 + $0xe0] sm:$0xff]   ;;  %v1749_v21 = vld [vmem:[%s2329_s1 + $0xe8] sm:$0xff]  }
   0x7   :  { %v1742_v14 = vld [vmem:[%s2329_s1 + $0x18] sm:$0xff]   ;;  %v1746_v18 = vld [vmem:[%s2329_s1 + $0x20] sm:$0xff]   ;;  %v1750_v22 = vld [vmem:[%s2329_s1 + $0x28] sm:$0xff]  }
   0x8   :  { %1475 = vmatpush3.bf16.msra.mxu0 %v1734_v6  ;;  %v1743_v15 = vld [vmem:[%s2329_s1 + $0x98] sm:$0xff]   ;;  %v1747_v19 = vld [vmem:[%s2329_s1 + $0xa0] sm:$0xff]   ;;  %v1751_v23 = vld [vmem:[%s2329_s1 + $0xa8] sm:$0xff]  }
   0x9   :  { %1539 = vmatpush3.bf16.msra.mxu1 %v1735_v7  ;;  %1476 = vmatprep.subr.bf16.mxu0 %v1736_v8  ;;  %v1752_v24 = vld [vmem:[%s2329_s1 + $0x70] sm:$0xff]   ;;  %v1756_v28 = vld [vmem:[%s2329_s1 + $0x78] sm:$0xff]   ;;  %v15_v32 = vld [vmem:[%s2330_s0] sm:$0xff] }
   0xa   :  { %1540 = vmatprep.subr.bf16.mxu1 %v1737_v9  ;;  %v1753_v25 = vld [vmem:[%s2329_s1 + $0xf0] sm:$0xff]   ;;  %v1757_v29 = vld [vmem:[%s2329_s1 + $0xf8] sm:$0xff]   ;;  %v19_v33 = vld [vmem:[%s2330_s0 + $0x20] sm:$0xff] }
   0xb   :  { %v1754_v26 = vld [vmem:[%s2329_s1 + $0x30] sm:$0xff]   ;;  %v1758_v30 = vld [vmem:[%s2329_s1 + $0x38] sm:$0xff]   ;;  %v16_v34 = vld [vmem:[%s2330_s0 + $0x8] sm:$0xff]  ;;  %v1344_v35 = vcombine.low %v15_v32, %v19_v33  ;;  %v1345_v36 = vcombine.high %v15_v32, %v19_v33 }
   0xc   :  { %1477 = vmatpush3.bf16.msra.mxu0 %v1738_v10  ;;  %v1755_v27 = vld [vmem:[%s2329_s1 + $0xb0] sm:$0xff]   ;;  %v1759_v31 = vld [vmem:[%s2329_s1 + $0xb8] sm:$0xff]   ;;  %v20_v37 = vld [vmem:[%s2330_s0 + $0x28] sm:$0xff] }
   0xd   :  { %1541 = vmatpush3.bf16.msra.mxu1 %v1739_v11  ;;  %1478 = vmatprep.subr.bf16.mxu0 %v1740_v12  ;;  %v1346_v38 = vcombine.low %v16_v34, %v20_v37  ;;  %v1347_v39 = vcombine.high %v16_v34, %v20_v37  ;;  %v1760_v40 = vld [vmem:[%s2329_s1 + $0x140] sm:$0xff]   ;;  %v24_v47 = vld [vmem:[%s2330_s0 + $0x48] sm:$0xff]  ;;  %v1768_v62 = vld [vmem:[%s2329_s1 + $0x150] sm:$0xff]  }
   0xe   :  { %1542 = vmatprep.subr.bf16.mxu1 %v1741_v13  ;;  %950 = vmatprep.mubr.bf16.mxu0 %v1345_v36  ;;  %v1761_v41 = vld [vmem:[%s2329_s1 + $0x100] sm:$0xff]   ;;  %v28_v48 = vld [vmem:[%s2330_s0 + $0x68] sm:$0xff]  ;;  %v1769_v63 = vld [vmem:[%s2329_s1 + $0x110] sm:$0xff]  }
   0xf   :  { %1047 = vmatprep.mubr.bf16.mxu1 %v1347_v39  ;;  %v1762_v42 = vld [vmem:[%s2329_s1 + $0x1c0] sm:$0xff]   ;;  %v1355_v49 = vcombine.high %v24_v47, %v28_v48  ;;  %v1764_v50 = vld [vmem:[%s2329_s1 + $0x148] sm:$0xff]   ;;  %v1354_v53 = vcombine.low %v24_v47, %v28_v48  ;;  %v1770_v0 = vld [vmem:[%s2329_s1 + $0x1d0] sm:$0xff]  }
  0x10   :  { %1479 = vmatpush3.bf16.msra.mxu0 %v1742_v14  ;;  %v1763_v43 = vld [vmem:[%s2329_s1 + $0x180] sm:$0xff]   ;;  %v1765_v52 = vld [vmem:[%s2329_s1 + $0x108] sm:$0xff]   ;;  %v1771_v1 = vld [vmem:[%s2329_s1 + $0x190] sm:$0xff]  }
  0x11   :  { %1543 = vmatpush3.bf16.msra.mxu1 %v1743_v15  ;;  %1480 = vmatprep.subr.bf16.mxu0 %v1744_v16  ;;  %v23_v44 = vld [vmem:[%s2330_s0 + $0x40] sm:$0xff]  ;;  %v1766_v54 = vld [vmem:[%s2329_s1 + $0x1c8] sm:$0xff]   ;;  %v1772_v10 = vld [vmem:[%s2329_s1 + $0x158] sm:$0xff]  }
  0x12   :  { %1544 = vmatprep.subr.bf16.mxu1 %v1745_v17  ;;  %v27_v45 = vld [vmem:[%s2330_s0 + $0x60] sm:$0xff]  ;;  %v1767_v55 = vld [vmem:[%s2329_s1 + $0x188] sm:$0xff]   ;;  %v1773_v11 = vld [vmem:[%s2329_s1 + $0x118] sm:$0xff]  }
  0x13   :  { %v1353_v46 = vcombine.high %v23_v44, %v27_v45  ;;  %v1352_v51 = vcombine.low %v23_v44, %v27_v45  ;;  %v31_v56 = vld [vmem:[%s2330_s0 + $0x80] sm:$0xff]  ;;  %v32_v58 = vld [vmem:[%s2330_s0 + $0x88] sm:$0xff]  ;;  %v1774_v12 = vld [vmem:[%s2329_s1 + $0x1d8] sm:$0xff]  }
  0x14   :  { %1481 = vmatpush3.bf16.msra.mxu0 %v1746_v18  ;;  %v35_v57 = vld [vmem:[%s2330_s0 + $0xa0] sm:$0xff]  ;;  %v36_v59 = vld [vmem:[%s2330_s0 + $0xa8] sm:$0xff]  ;;  %v1775_v13 = vld [vmem:[%s2329_s1 + $0x198] sm:$0xff]  }
  0x15   :  { %1545 = vmatpush3.bf16.msra.mxu1 %v1747_v19  ;;  %1482 = vmatprep.subr.bf16.mxu0 %v1748_v20  ;;  %v1361_v60 = vcombine.high %v31_v56, %v35_v57  ;;  %v1363_v61 = vcombine.high %v32_v58, %v36_v59  ;;  %v1360_v2 = vcombine.low %v31_v56, %v35_v57  ;;  %v39_v3 = vld [vmem:[%s2330_s0 + $0xc0] sm:$0xff]  ;;  %v40_v5 = vld [vmem:[%s2330_s0 + $0xc8] sm:$0xff]  ;;  %v1785_v39 = vld [vmem:[%s2329_s1 + $0x130] sm:$0xff]  }
  0x16   :  { %1546 = vmatprep.subr.bf16.mxu1 %v1749_v21  ;;  %v43_v4 = vld [vmem:[%s2330_s0 + $0xe0] sm:$0xff]  ;;  %v1362_v6 = vcombine.low %v32_v58, %v36_v59  ;;  %v44_v8 = vld [vmem:[%s2330_s0 + $0xe8] sm:$0xff]  ;;  %v1789_v48 = vld [vmem:[%s2329_s1 + $0x138] sm:$0xff]  }
  0x17   :  { %v1369_v7 = vcombine.high %v39_v3, %v43_v4  ;;  %v1371_v9 = vcombine.high %v40_v5, %v44_v8  ;;  %v47_v14 = vld [vmem:[%s2330_s0 + $0x100] sm:$0xff]  ;;  %v48_v16 = vld [vmem:[%s2330_s0 + $0x108] sm:$0xff]  ;;  %v1368_v19 = vcombine.low %v39_v3, %v43_v4  ;;  %v1370_v21 = vcombine.low %v40_v5, %v44_v8  ;;  %v26_v8 = vld [vmem:[%s2330_s0 + $0x58] sm:$0xff] }
  0x18   :  { %1483 = vmatpush3.bf16.msra.mxu0 %v1750_v22  ;;  %v51_v15 = vld [vmem:[%s2330_s0 + $0x120] sm:$0xff]  ;;  %v52_v17 = vld [vmem:[%s2330_s0 + $0x128] sm:$0xff] }
  0x19   :  { %1547 = vmatpush3.bf16.msra.mxu1 %v1751_v23  ;;  %1484 = vmatprep.subr.bf16.mxu0 %v1752_v24  ;;  %v1776_v18 = vld [vmem:[%s2329_s1 + $0x160] sm:$0xff]   ;;  %v1377_v22 = vcombine.high %v47_v14, %v51_v15  ;;  %v1379_v24 = vcombine.high %v48_v16, %v52_v17  ;;  %v1782_v32 = vld [vmem:[%s2329_s1 + $0x1e8] sm:$0xff]   ;;  %v1376_v34 = vcombine.low %v47_v14, %v51_v15  ;;  %v33_v14 = vld [vmem:[%s2330_s0 + $0x90] sm:$0xff] }
  0x1a   :  { %1548 = vmatprep.subr.bf16.mxu1 %v1753_v25  ;;  %v1777_v20 = vld [vmem:[%s2329_s1 + $0x120] sm:$0xff]   ;;  %v1783_v33 = vld [vmem:[%s2329_s1 + $0x1a8] sm:$0xff]   ;;  %v37_v15 = vld [vmem:[%s2330_s0 + $0xb0] sm:$0xff] }
  0x1b   :  { %v1778_v23 = vld [vmem:[%s2329_s1 + $0x1e0] sm:$0xff]   ;;  %v64_v44 = vld [vmem:[%s2330_s0 + $0x188] sm:$0xff] }
  0x1c   :  { %1485 = vmatpush3.bf16.msra.mxu0 %v1754_v26  ;;  %v1779_v25 = vld [vmem:[%s2329_s1 + $0x1a0] sm:$0xff]   ;;  %v68_v45 = vld [vmem:[%s2330_s0 + $0x1a8] sm:$0xff] }
  0x1d   :  { %1549 = vmatpush3.bf16.msra.mxu1 %v1755_v27  ;;  %1486 = vmatprep.subr.bf16.mxu0 %v1756_v28  ;;  %v55_v26 = vld [vmem:[%s2330_s0 + $0x140] sm:$0xff]  ;;  %v1780_v28 = vld [vmem:[%s2329_s1 + $0x168] sm:$0xff]   ;;  %v1394_v59 = vcombine.low %v64_v44, %v68_v45 }
  0x1e   :  { %1550 = vmatprep.subr.bf16.mxu1 %v1757_v29  ;;  %v59_v27 = vld [vmem:[%s2330_s0 + $0x160] sm:$0xff]  ;;  %v56_v29 = vld [vmem:[%s2330_s0 + $0x148] sm:$0xff] }
  0x1f   :  { %v1385_v36 = vcombine.high %v55_v26, %v59_v27  ;;  %v1384_v47 = vcombine.low %v55_v26, %v59_v27  ;;  %v72_v56 = vld [vmem:[%s2330_s0 + $0x1c8] sm:$0xff]  ;;  %v1364_v26 = vcombine.low %v33_v14, %v37_v15 }
  0x20   :  { %1487 = vmatpush3.bf16.msra.mxu0 %v1758_v30  ;;  %v60_v30 = vld [vmem:[%s2330_s0 + $0x168] sm:$0xff] }
  0x21   :  { %1551 = vmatpush3.bf16.msra.mxu1 %v1759_v31  ;;  %1600 = vmatprep.subr.bf16.mxu0 %v1760_v40  ;;  %v1781_v31 = vld [vmem:[%s2329_s1 + $0x128] sm:$0xff]   ;;  %v1387_v37 = vcombine.high %v56_v29, %v60_v30  ;;  %v1786_v40 = vld [vmem:[%s2329_s1 + $0x1f0] sm:$0xff]  }
  0x22   :  { %1664 = vmatprep.subr.bf16.mxu1 %v1762_v42  ;;  %v67_v42 = vld [vmem:[%s2330_s0 + $0x1a0] sm:$0xff]  ;;  %v76_v57 = vld [vmem:[%s2330_s0 + $0x1e8] sm:$0xff] }
  0x23   :  { %951 = vmatmul.mubr.bf16.vlgmr.msra.gmra.mrb[0].mxu0 %v1344_v35  ;;  %v1378_v35 = vcombine.low %v48_v16, %v52_v17  ;;  %v1402_v3 = vcombine.low %v72_v56, %v76_v57  ;;  %v34_v16 = vld [vmem:[%s2330_s0 + $0x98] sm:$0xff] }
  0x24   :  { %1048 = vmatmul.mubr.bf16.vlgmr.msra.gmra.mrb[0].mxu1 %v1346_v38  ;;  %1601 = vmatpush3.bf16.msra.mxu0 %v1761_v41  ;;  %v1784_v38 = vld [vmem:[%s2329_s1 + $0x170] sm:$0xff]   ;;  %v63_v41 = vld [vmem:[%s2330_s0 + $0x180] sm:$0xff]  ;;  %v38_v17 = vld [vmem:[%s2330_s0 + $0xb8] sm:$0xff] }
  0x25   :  { %1665 = vmatpush3.bf16.msra.mxu1 %v1763_v43  ;;  %958 = vmatprep.mubr.bf16.mxu0 %v1353_v46  ;;  %v1787_v43 = vld [vmem:[%s2329_s1 + $0x1b0] sm:$0xff]   ;;  %v1788_v46 = vld [vmem:[%s2329_s1 + $0x178] sm:$0xff]   ;;  %v1392_v58 = vcombine.low %v63_v41, %v67_v42  ;;  %v1366_v27 = vcombine.low %v34_v16, %v38_v17 }
  0x26   :  { %1055 = vmatprep.mubr.bf16.mxu1 %v1355_v49  ;;  %1602 = vmatprep.subr.bf16.mxu0 %v1764_v50  ;;  %v1386_v49 = vcombine.low %v56_v29, %v60_v30  ;;  %v1393_v50 = vcombine.high %v63_v41, %v67_v42  ;;  %v49_v30 = vld [vmem:[%s2330_s0 + $0x110] sm:$0xff]  ;;  %v62_v41 = vld [vmem:[%s2330_s0 + $0x178] sm:$0xff] }
  0x27   :  { %1666 = vmatprep.subr.bf16.mxu1 %v1766_v54  ;;  %v71_v54 = vld [vmem:[%s2330_s0 + $0x1c0] sm:$0xff] }
  0x28   :  { %1603 = vmatpush3.bf16.msra.mxu0 %v1765_v52  ;;  %v1395_v52 = vcombine.high %v64_v44, %v68_v45 }
  0x29   :  { %1667 = vmatpush3.bf16.msra.mxu1 %v1767_v55  ;;  %1604 = vmatprep.subr.bf16.mxu0 %v1768_v62  ;;  %v75_v55 = vld [vmem:[%s2330_s0 + $0x1e0] sm:$0xff]  ;;  %v17_v62 = vld [vmem:[%s2330_s0 + $0x10] sm:$0xff] }
  0x2a   :  { %1668 = vmatprep.subr.bf16.mxu1 %v1770_v0  ;;  %v18_v0 = vld [vmem:[%s2330_s0 + $0x18] sm:$0xff] }
  0x2b   :  { %959 = vmatmul.mubr.bf16.gmra.mrb[4].mxu0 %v1352_v51  ;;  %v1790_v51 = vld [vmem:[%s2329_s1 + $0x1f8] sm:$0xff]  }
  0x2c   :  { %1056 = vmatmul.mubr.bf16.gmra.mrb[4].mxu1 %v1354_v53  ;;  %966 = vmatprep.mubr.bf16.mxu0 %v1361_v60  ;;  %v1791_v53 = vld [vmem:[%s2329_s1 + $0x1b8] sm:$0xff]   ;;  %v1401_v60 = vcombine.high %v71_v54, %v75_v55 }
  0x2d   :  { %1063 = vmatprep.mubr.bf16.mxu1 %v1363_v61  ;;  %1605 = vmatpush3.bf16.msra.mxu0 %v1769_v63  ;;  %v1403_v61 = vcombine.high %v72_v56, %v76_v57  ;;  %v21_v63 = vld [vmem:[%s2330_s0 + $0x30] sm:$0xff]  ;;  %v74_v56 = vld [vmem:[%s2330_s0 + $0x1d8] sm:$0xff] }
  0x2e   :  { %1669 = vmatpush3.bf16.msra.mxu1 %v1771_v1  ;;  %1606 = vmatprep.subr.bf16.mxu0 %v1772_v10  ;;  %v22_v1 = vld [vmem:[%s2330_s0 + $0x38] sm:$0xff]  ;;  %v1349_v4 = vcombine.high %v17_v62, %v21_v63  ;;  %v1348_v10 = vcombine.low %v17_v62, %v21_v63 }
  0x2f   :  { %1670 = vmatprep.subr.bf16.mxu1 %v1774_v12  ;;  %v1351_v5 = vcombine.high %v18_v0, %v22_v1  ;;  %v78_v57 = vld [vmem:[%s2330_s0 + $0x1f8] sm:$0xff] }
  0x30   :  { %v1406_v63 = vcombine.low %v74_v56, %v78_v57 }
  0x31   :  { %1607 = vmatpush3.bf16.msra.mxu0 %v1773_v11  ;;  %v1350_v11 = vcombine.low %v18_v0, %v22_v1 }
  0x32   :  { %1671 = vmatpush3.bf16.msra.mxu1 %v1775_v13  ;;  %1608 = vmatprep.subr.bf16.mxu0 %v1776_v18 }
  0x33   :  { %967 = vmatmul.mubr.bf16.gmra.mrb[8].mxu0 %v1360_v2  ;;  %1672 = vmatprep.subr.bf16.mxu1 %v1778_v23  ;;  %v1400_v2 = vcombine.low %v71_v54, %v75_v55  ;;  %v45_v23 = vld [vmem:[%s2330_s0 + $0xf0] sm:$0xff] }
  0x34   :  { %1064 = vmatmul.mubr.bf16.gmra.mrb[8].mxu1 %v1362_v6  ;;  %974 = vmatprep.mubr.bf16.mxu0 %v1369_v7  ;;  %v25_v6 = vld [vmem:[%s2330_s0 + $0x50] sm:$0xff] }
  0x35   :  { %1071 = vmatprep.mubr.bf16.mxu1 %v1371_v9  ;;  %1609 = vmatpush3.bf16.msra.mxu0 %v1777_v20  ;;  %v29_v7 = vld [vmem:[%s2330_s0 + $0x70] sm:$0xff]  ;;  %v30_v9 = vld [vmem:[%s2330_s0 + $0x78] sm:$0xff]  ;;  %v1365_v20 = vcombine.high %v33_v14, %v37_v15 }
  0x36   :  { %1673 = vmatpush3.bf16.msra.mxu1 %v1779_v25  ;;  %1610 = vmatprep.subr.bf16.mxu0 %v1780_v28  ;;  %v1357_v12 = vcombine.high %v25_v6, %v29_v7  ;;  %v1359_v13 = vcombine.high %v26_v8, %v30_v9  ;;  %v1356_v18 = vcombine.low %v25_v6, %v29_v7  ;;  %v46_v25 = vld [vmem:[%s2330_s0 + $0xf8] sm:$0xff]  ;;  %v73_v54 = vld [vmem:[%s2330_s0 + $0x1d0] sm:$0xff] }
  0x37   :  { %1674 = vmatprep.subr.bf16.mxu1 %v1782_v32  ;;  %v50_v32 = vld [vmem:[%s2330_s0 + $0x118] sm:$0xff]  ;;  %v77_v55 = vld [vmem:[%s2330_s0 + $0x1f0] sm:$0xff] }
  0x38   :  { %v1404_v62 = vcombine.low %v73_v54, %v77_v55 }
  0x39   :  { %1611 = vmatpush3.bf16.msra.mxu0 %v1781_v31  ;;  %v53_v31 = vld [vmem:[%s2330_s0 + $0x130] sm:$0xff] }
  0x3a   :  { %1675 = vmatpush3.bf16.msra.mxu1 %v1783_v33  ;;  %1612 = vmatprep.subr.bf16.mxu0 %v1784_v38  ;;  %v54_v33 = vld [vmem:[%s2330_s0 + $0x138] sm:$0xff]  ;;  %v57_v38 = vld [vmem:[%s2330_s0 + $0x150] sm:$0xff]  ;;  %v1380_v42 = vcombine.low %v49_v30, %v53_v31 }
  0x3b   :  { %975 = vmatmul.mubr.bf16.gmra.mrb[12].mxu0 %v1368_v19  ;;  %1676 = vmatprep.subr.bf16.mxu1 %v1786_v40  ;;  %v1358_v19 = vcombine.low %v26_v8, %v30_v9  ;;  %v58_v40 = vld [vmem:[%s2330_s0 + $0x158] sm:$0xff] }
  0x3c   :  { %1072 = vmatmul.mubr.bf16.gmra.mrb[12].mxu1 %v1370_v21  ;;  %982 = vmatprep.mubr.bf16.mxu0 %v1377_v22  ;;  %v1367_v21 = vcombine.high %v34_v16, %v38_v17  ;;  %v41_v22 = vld [vmem:[%s2330_s0 + $0xd0] sm:$0xff]  ;;  %v1391_v45 = vcombine.high %v58_v40, %v62_v41 }
  0x3d   :  { %1079 = vmatprep.mubr.bf16.mxu1 %v1379_v24  ;;  %1613 = vmatpush3.bf16.msra.mxu0 %v1785_v39  ;;  %v42_v24 = vld [vmem:[%s2330_s0 + $0xd8] sm:$0xff]  ;;  %v1373_v28 = vcombine.high %v41_v22, %v45_v23  ;;  %v61_v39 = vld [vmem:[%s2330_s0 + $0x170] sm:$0xff] }
  0x3e   :  { %1677 = vmatpush3.bf16.msra.mxu1 %v1787_v43  ;;  %1614 = vmatprep.subr.bf16.mxu0 %v1788_v46  ;;  %v1375_v29 = vcombine.high %v42_v24, %v46_v25  ;;  %v1382_v43 = vcombine.low %v50_v32, %v54_v33  ;;  %v1389_v44 = vcombine.high %v57_v38, %v61_v39  ;;  %v65_v46 = vld [vmem:[%s2330_s0 + $0x190] sm:$0xff] }
  0x3f   :  { %1678 = vmatprep.subr.bf16.mxu1 %v1790_v51  ;;  %v1390_v51 = vcombine.low %v58_v40, %v62_v41 }
  0x41   :  { %1615 = vmatpush3.bf16.msra.mxu0 %v1789_v48  ;;  %v66_v48 = vld [vmem:[%s2330_s0 + $0x198] sm:$0xff] }
  0x42   :  { %1679 = vmatpush3.bf16.msra.mxu1 %v1791_v53 }
  0x43   :  { %983 = vmatmul.mubr.bf16.gmra.mrb[16].mxu0 %v1376_v34  ;;  %v1372_v34 = vcombine.low %v41_v22, %v45_v23 }
  0x44   :  { %1080 = vmatmul.mubr.bf16.gmra.mrb[16].mxu1 %v1378_v35  ;;  %990 = vmatprep.mubr.bf16.mxu0 %v1385_v36  ;;  %v1374_v35 = vcombine.low %v42_v24, %v46_v25  ;;  %v1381_v36 = vcombine.high %v49_v30, %v53_v31 }
  0x45   :  { %1087 = vmatprep.mubr.bf16.mxu1 %v1387_v37  ;;  %v1383_v37 = vcombine.high %v50_v32, %v54_v33 }
  0x4b   :  { %991 = vmatmul.mubr.bf16.gmra.mrb[20].mxu0 %v1384_v47  ;;  %v69_v47 = vld [vmem:[%s2330_s0 + $0x1b0] sm:$0xff] }
  0x4c   :  { %1088 = vmatmul.mubr.bf16.gmra.mrb[20].mxu1 %v1386_v49  ;;  %998 = vmatprep.mubr.bf16.mxu0 %v1393_v50  ;;  %v70_v49 = vld [vmem:[%s2330_s0 + $0x1b8] sm:$0xff]  ;;  %v1388_v50 = vcombine.low %v57_v38, %v61_v39 }
  0x4d   :  { %1095 = vmatprep.mubr.bf16.mxu1 %v1395_v52  ;;  %v1397_v52 = vcombine.high %v65_v46, %v69_v47  ;;  %v1399_v53 = vcombine.high %v66_v48, %v70_v49 }
  0x53   :  { %999 = vmatmul.mubr.bf16.gmra.mrb[24].mxu0 %v1392_v58  ;;  %v1396_v58 = vcombine.low %v65_v46, %v69_v47 }
  0x54   :  { %1096 = vmatmul.mubr.bf16.gmra.mrb[24].mxu1 %v1394_v59  ;;  %1006 = vmatprep.mubr.bf16.mxu0 %v1401_v60  ;;  %v1398_v59 = vcombine.low %v66_v48, %v70_v49  ;;  %v1405_v60 = vcombine.high %v73_v54, %v77_v55 }
  0x55   :  { %1103 = vmatprep.mubr.bf16.mxu1 %v1403_v61  ;;  %v1407_v61 = vcombine.high %v74_v56, %v78_v57 }
  0x5b   :  { %1007 = vmatmul.mubr.bf16.gmra.mrb[28].mxu0 %v1400_v2  ;;  %v2199_v2 = vld [vmem:[%s2331_s2] ss:$0 sm:$0xff] }
  0x5c   :  { %1104 = vmatmul.mubr.bf16.gmra.mrb[28].mxu1 %v1402_v3  ;;  %1144 = vmatprep.mubr.bf16.mxu0 %v1349_v4 }
  0x5d   :  { %1241 = vmatprep.mubr.bf16.mxu1 %v1351_v5 }
  0x63   :  { %1145 = vmatmul.mubr.bf16.vlgmr.msra.gmra.mrb[32].mxu0 %v1348_v10 }
  0x64   :  { %1242 = vmatmul.mubr.bf16.vlgmr.msra.gmra.mrb[32].mxu1 %v1350_v11  ;;  %1152 = vmatprep.mubr.bf16.mxu0 %v1357_v12 }
  0x65   :  { %1249 = vmatprep.mubr.bf16.mxu1 %v1359_v13 }
  0x6b   :  { %1153 = vmatmul.mubr.bf16.gmra.mrb[36].mxu0 %v1356_v18 }
  0x6c   :  { %1250 = vmatmul.mubr.bf16.gmra.mrb[36].mxu1 %v1358_v19  ;;  %1160 = vmatprep.mubr.bf16.mxu0 %v1365_v20 }
  0x6d   :  { %1257 = vmatprep.mubr.bf16.mxu1 %v1367_v21 }
  0x73   :  { %1161 = vmatmul.mubr.bf16.gmra.mrb[40].mxu0 %v1364_v26 }
  0x74   :  { %1258 = vmatmul.mubr.bf16.gmra.mrb[40].mxu1 %v1366_v27  ;;  %1168 = vmatprep.mubr.bf16.mxu0 %v1373_v28 }
  0x75   :  { %1265 = vmatprep.mubr.bf16.mxu1 %v1375_v29 }
  0x7b   :  { %1169 = vmatmul.mubr.bf16.gmra.mrb[44].mxu0 %v1372_v34 }
  0x7c   :  { %1266 = vmatmul.mubr.bf16.gmra.mrb[44].mxu1 %v1374_v35  ;;  %1176 = vmatprep.mubr.bf16.mxu0 %v1381_v36 }
  0x7d   :  { %1273 = vmatprep.mubr.bf16.mxu1 %v1383_v37 }
  0x83   :  { %1177 = vmatmul.mubr.bf16.gmra.mrb[48].mxu0 %v1380_v42 }
  0x84   :  { %1274 = vmatmul.mubr.bf16.gmra.mrb[48].mxu1 %v1382_v43  ;;  %1184 = vmatprep.mubr.bf16.mxu0 %v1389_v44 }
  0x85   :  { %1281 = vmatprep.mubr.bf16.mxu1 %v1391_v45 }
  0x8b   :  { %1185 = vmatmul.mubr.bf16.gmra.mrb[52].mxu0 %v1388_v50 }
  0x8c   :  { %1282 = vmatmul.mubr.bf16.gmra.mrb[52].mxu1 %v1390_v51  ;;  %1192 = vmatprep.mubr.bf16.mxu0 %v1397_v52 }
  0x8d   :  { %1289 = vmatprep.mubr.bf16.mxu1 %v1399_v53 }
  0x93   :  { %1193 = vmatmul.mubr.bf16.gmra.mrb[56].mxu0 %v1396_v58 }
  0x94   :  { %1290 = vmatmul.mubr.bf16.gmra.mrb[56].mxu1 %v1398_v59  ;;  %1200 = vmatprep.mubr.bf16.mxu0 %v1405_v60 }
  0x95   :  { %1297 = vmatprep.mubr.bf16.mxu1 %v1407_v61 }
  0x9b   :  { %1201 = vmatmul.mubr.bf16.gmra.mrb[60].mxu0 %v1404_v62 }
  0x9c   :  { %1298 = vmatmul.mubr.bf16.gmra.mrb[60].mxu1 %v1406_v63 }
  0xf6   :  { %v1488_v0 = vpop.f32.mrb[0].mxu0 }
  0xf7   :  { %v1552_v1 = vpop.f32.mrb[0].mxu1  ;;  %v1489_v3 = vpop.f32.mrb[1].mxu0 }
  0xf8   :  { %v1490_v4 = vadd.f32 %v1489_v3, %v1488_v0  ;;  %v1553_v5 = vpop.f32.mrb[1].mxu1  ;;  %v1491_v6 = vpop.f32.mrb[2].mxu0 }
  0xf9   :  { %v1554_v7 = vadd.f32 %v1553_v5, %v1552_v1  ;;  %v1555_v8 = vpop.f32.mrb[2].mxu1  ;;  %v1492_v9 = vpop.f32.mrb[3].mxu0 }
  0xfa   :  { %v953_v10 = vadd.f32 %v1490_v4, %v2199_v2  ;;  %v1493_v11 = vadd.f32 %v1492_v9, %v1491_v6  ;;  %v1556_v12 = vpop.f32.mrb[3].mxu1 }
  0xfb   :  { %v1557_v13 = vadd.f32 %v1556_v12, %v1555_v8 }
  0xfc   :  { %v2202_v14 = vadd.f32 %v1554_v7, %v953_v10  ;;  %v956_v15 = vadd.f32 %v1493_v11, %v2199_v2 }
  0xfe   :  { %v2205_v16 = vadd.f32 %v1557_v13, %v956_v15  ;;  %v1494_v17 = vpop.f32.mrb[4].mxu0 }
  0xff   :  { %v1558_v18 = vpop.f32.mrb[4].mxu1  ;;  %v1495_v19 = vpop.f32.mrb[5].mxu0 }
 0x100   :  { %v1496_v20 = vadd.f32 %v1495_v19, %v1494_v17  ;;  %v1559_v21 = vpop.f32.mrb[5].mxu1  ;;  %v1497_v22 = vpop.f32.mrb[6].mxu0 }
 0x101   :  { %v1560_v23 = vadd.f32 %v1559_v21, %v1558_v18  ;;  %v1561_v24 = vpop.f32.mrb[6].mxu1  ;;  %v1498_v25 = vpop.f32.mrb[7].mxu0 }
 0x102   :  { %v961_v26 = vadd.f32 %v1496_v20, %v2199_v2  ;;  %v1499_v27 = vadd.f32 %v1498_v25, %v1497_v22  ;;  %v1562_v28 = vpop.f32.mrb[7].mxu1 }
 0x103   :  { %v1563_v29 = vadd.f32 %v1562_v28, %v1561_v24 }
 0x104   :  { %v2208_v30 = vadd.f32 %v1560_v23, %v961_v26  ;;  %v964_v31 = vadd.f32 %v1499_v27, %v2199_v2 }
 0x106   :  { %v2211_v32 = vadd.f32 %v1563_v29, %v964_v31  ;;  %v1500_v33 = vpop.f32.mrb[8].mxu0 }
 0x107   :  { %v1564_v34 = vpop.f32.mrb[8].mxu1  ;;  %v1501_v35 = vpop.f32.mrb[9].mxu0 }
 0x108   :  { %v1502_v36 = vadd.f32 %v1501_v35, %v1500_v33  ;;  %v1565_v37 = vpop.f32.mrb[9].mxu1  ;;  %v1503_v38 = vpop.f32.mrb[10].mxu0 }
 0x109   :  { %v1566_v39 = vadd.f32 %v1565_v37, %v1564_v34  ;;  %v1567_v40 = vpop.f32.mrb[10].mxu1  ;;  %v1504_v41 = vpop.f32.mrb[11].mxu0 }
 0x10a   :  { %v969_v42 = vadd.f32 %v1502_v36, %v2199_v2  ;;  %v1505_v43 = vadd.f32 %v1504_v41, %v1503_v38  ;;  %v1568_v44 = vpop.f32.mrb[11].mxu1 }
 0x10b   :  { %v1569_v45 = vadd.f32 %v1568_v44, %v1567_v40 }
 0x10c   :  { %v2214_v46 = vadd.f32 %v1566_v39, %v969_v42  ;;  %v972_v47 = vadd.f32 %v1505_v43, %v2199_v2 }
 0x10e   :  { %v2217_v48 = vadd.f32 %v1569_v45, %v972_v47  ;;  %v1506_v49 = vpop.f32.mrb[12].mxu0 }
 0x10f   :  { %v1570_v50 = vpop.f32.mrb[12].mxu1  ;;  %v1507_v51 = vpop.f32.mrb[13].mxu0 }
 0x110   :  { %v1508_v52 = vadd.f32 %v1507_v51, %v1506_v49  ;;  %v1571_v53 = vpop.f32.mrb[13].mxu1  ;;  %v1509_v54 = vpop.f32.mrb[14].mxu0 }
 0x111   :  { %v1572_v55 = vadd.f32 %v1571_v53, %v1570_v50  ;;  %v1573_v56 = vpop.f32.mrb[14].mxu1  ;;  %v1510_v57 = vpop.f32.mrb[15].mxu0 }
 0x112   :  { %v977_v58 = vadd.f32 %v1508_v52, %v2199_v2  ;;  %v1511_v59 = vadd.f32 %v1510_v57, %v1509_v54  ;;  %v1574_v60 = vpop.f32.mrb[15].mxu1 }
 0x113   :  { %v1575_v61 = vadd.f32 %v1574_v60, %v1573_v56 }
 0x114   :  { %v2220_v62 = vadd.f32 %v1572_v55, %v977_v58  ;;  %v980_v63 = vadd.f32 %v1511_v59, %v2199_v2 }
 0x116   :  { %v2223_v0 = vadd.f32 %v1575_v61, %v980_v63  ;;  %v1512_v1 = vpop.f32.mrb[16].mxu0 }
 0x117   :  { %v1576_v3 = vpop.f32.mrb[16].mxu1  ;;  %v1513_v4 = vpop.f32.mrb[17].mxu0 }
 0x118   :  { %v1514_v5 = vadd.f32 %v1513_v4, %v1512_v1  ;;  %v1577_v6 = vpop.f32.mrb[17].mxu1  ;;  %v1515_v7 = vpop.f32.mrb[18].mxu0 }
 0x119   :  { %v1578_v8 = vadd.f32 %v1577_v6, %v1576_v3  ;;  %v1579_v9 = vpop.f32.mrb[18].mxu1  ;;  %v1516_v10 = vpop.f32.mrb[19].mxu0 }
 0x11a   :  { %v985_v11 = vadd.f32 %v1514_v5, %v2199_v2  ;;  %v1517_v12 = vadd.f32 %v1516_v10, %v1515_v7  ;;  %v1580_v13 = vpop.f32.mrb[19].mxu1 }
 0x11b   :  { %v1581_v15 = vadd.f32 %v1580_v13, %v1579_v9 }
 0x11c   :  { %v2226_v17 = vadd.f32 %v1578_v8, %v985_v11  ;;  %v988_v18 = vadd.f32 %v1517_v12, %v2199_v2 }
 0x11e   :  { %v2229_v19 = vadd.f32 %v1581_v15, %v988_v18  ;;  %v1518_v20 = vpop.f32.mrb[20].mxu0 }
 0x11f   :  { %v1582_v21 = vpop.f32.mrb[20].mxu1  ;;  %v1519_v22 = vpop.f32.mrb[21].mxu0 }
 0x120   :  { %v1520_v23 = vadd.f32 %v1519_v22, %v1518_v20  ;;  %v1583_v24 = vpop.f32.mrb[21].mxu1  ;;  %v1521_v25 = vpop.f32.mrb[22].mxu0 }
 0x121   :  { %v1584_v26 = vadd.f32 %v1583_v24, %v1582_v21  ;;  %v1585_v27 = vpop.f32.mrb[22].mxu1  ;;  %v1522_v28 = vpop.f32.mrb[23].mxu0 }
 0x122   :  { %v993_v29 = vadd.f32 %v1520_v23, %v2199_v2  ;;  %v1523_v31 = vadd.f32 %v1522_v28, %v1521_v25  ;;  %v1586_v33 = vpop.f32.mrb[23].mxu1 }
 0x123   :  { %v1587_v34 = vadd.f32 %v1586_v33, %v1585_v27 }
 0x124   :  { %v2232_v35 = vadd.f32 %v1584_v26, %v993_v29  ;;  %v996_v36 = vadd.f32 %v1523_v31, %v2199_v2 }
 0x126   :  { %v2235_v37 = vadd.f32 %v1587_v34, %v996_v36  ;;  %v1524_v38 = vpop.f32.mrb[24].mxu0 }
 0x127   :  { %v1588_v39 = vpop.f32.mrb[24].mxu1  ;;  %v1525_v40 = vpop.f32.mrb[25].mxu0 }
 0x128   :  { %v1526_v41 = vadd.f32 %v1525_v40, %v1524_v38  ;;  %v1589_v42 = vpop.f32.mrb[25].mxu1  ;;  %v1527_v43 = vpop.f32.mrb[26].mxu0 }
 0x129   :  { %v1590_v44 = vadd.f32 %v1589_v42, %v1588_v39  ;;  %v1591_v45 = vpop.f32.mrb[26].mxu1  ;;  %v1528_v47 = vpop.f32.mrb[27].mxu0 }
 0x12a   :  { %v1001_v49 = vadd.f32 %v1526_v41, %v2199_v2  ;;  %v1529_v50 = vadd.f32 %v1528_v47, %v1527_v43  ;;  %v1592_v51 = vpop.f32.mrb[27].mxu1 }
 0x12b   :  { %v1593_v52 = vadd.f32 %v1592_v51, %v1591_v45 }
 0x12c   :  { %v2238_v53 = vadd.f32 %v1590_v44, %v1001_v49  ;;  %v1004_v54 = vadd.f32 %v1529_v50, %v2199_v2 }
 0x12e   :  { %v2241_v55 = vadd.f32 %v1593_v52, %v1004_v54  ;;  %v1530_v56 = vpop.f32.mrb[28].mxu0 }
 0x12f   :  { %v1594_v57 = vpop.f32.mrb[28].mxu1  ;;  %v1531_v58 = vpop.f32.mrb[29].mxu0 }
 0x130   :  { %v1532_v59 = vadd.f32 %v1531_v58, %v1530_v56  ;;  %v1595_v60 = vpop.f32.mrb[29].mxu1  ;;  %v1533_v61 = vpop.f32.mrb[30].mxu0 }
 0x131   :  { %v1596_v63 = vadd.f32 %v1595_v60, %v1594_v57  ;;  %v1597_v1 = vpop.f32.mrb[30].mxu1  ;;  %v1534_v3 = vpop.f32.mrb[31].mxu0 }
 0x132   :  { %v1009_v4 = vadd.f32 %v1532_v59, %v2199_v2  ;;  %v1535_v5 = vadd.f32 %v1534_v3, %v1533_v61  ;;  %v1598_v6 = vpop.f32.mrb[31].mxu1 }
 0x133   :  { %v1599_v7 = vadd.f32 %v1598_v6, %v1597_v1 }
 0x134   :  { %v2244_v8 = vadd.f32 %v1596_v63, %v1009_v4  ;;  %v1012_v9 = vadd.f32 %v1535_v5, %v2199_v2 }
 0x136   :  { %v2247_v10 = vadd.f32 %v1599_v7, %v1012_v9  ;;  %v1616_v11 = vpop.f32.mrb[32].mxu0 }
 0x137   :  { %v1680_v12 = vpop.f32.mrb[32].mxu1  ;;  %v1617_v13 = vpop.f32.mrb[33].mxu0 }
 0x138   :  { %v1618_v15 = vadd.f32 %v1617_v13, %v1616_v11  ;;  %v1681_v18 = vpop.f32.mrb[33].mxu1  ;;  %v1619_v20 = vpop.f32.mrb[34].mxu0 }
 0x139   :  { %v1682_v21 = vadd.f32 %v1681_v18, %v1680_v12  ;;  %v1683_v22 = vpop.f32.mrb[34].mxu1  ;;  %v1620_v23 = vpop.f32.mrb[35].mxu0 }
 0x13a   :  { %v1147_v24 = vadd.f32 %v1618_v15, %v2202_v14  ;;  %v1621_v25 = vadd.f32 %v1620_v23, %v1619_v20  ;;  %v1684_v26 = vpop.f32.mrb[35].mxu1 }
 0x13b   :  { %v1685_v27 = vadd.f32 %v1684_v26, %v1683_v22 }
 0x13c   :  { %v1244_v28 = vadd.f32 %v1682_v21, %v1147_v24  ;;  %v1150_v29 = vadd.f32 %v1621_v25, %v2205_v16 }
 0x13e   :  { %v1306_v2 = vmax.f32 %v1244_v28, 0.0  ;;  %v1247_v31 = vadd.f32 %v1685_v27, %v1150_v29  ;;  %v1622_v33 = vpop.f32.mrb[36].mxu0 }
 0x13f   :  { %v1686_v34 = vpop.f32.mrb[36].mxu1  ;;  %v1623_v36 = vpop.f32.mrb[37].mxu0 }
 0x140   :  { %1323 = vst.msk [vmem:[%s2332_s3] sm:$0xff] %vm1322_vm0, %v1306_v2  ;;  %v1307_v38 = vmax.f32 %v1247_v31, 0.0  ;;  %v1624_v39 = vadd.f32 %v1623_v36, %v1622_v33  ;;  %v1687_v14 = vpop.f32.mrb[37].mxu1  ;;  %v1625_v40 = vpop.f32.mrb[38].mxu0 }
 0x141   :  { %v1688_v41 = vadd.f32 %v1687_v14, %v1686_v34  ;;  %v1689_v42 = vpop.f32.mrb[38].mxu1  ;;  %v1626_v43 = vpop.f32.mrb[39].mxu0 }
 0x142   :  { %1324 = vst.msk [vmem:[%s2332_s3 + $0x8] sm:$0xff] %vm1322_vm0, %v1307_v38  ;;  %v1155_v16 = vadd.f32 %v1624_v39, %v2208_v30  ;;  %v1627_v44 = vadd.f32 %v1626_v43, %v1625_v40  ;;  %v1690_v45 = vpop.f32.mrb[39].mxu1 }
 0x143   :  { %v1691_v47 = vadd.f32 %v1690_v45, %v1689_v42 }
 0x144   :  { %v1252_v49 = vadd.f32 %v1688_v41, %v1155_v16  ;;  %v1158_v50 = vadd.f32 %v1627_v44, %v2211_v32 }
 0x146   :  { %v1308_v51 = vmax.f32 %v1252_v49, 0.0  ;;  %v1255_v52 = vadd.f32 %v1691_v47, %v1158_v50  ;;  %v1628_v54 = vpop.f32.mrb[40].mxu0 }
 0x147   :  { %v1692_v56 = vpop.f32.mrb[40].mxu1  ;;  %v1629_v57 = vpop.f32.mrb[41].mxu0 }
 0x148   :  { %1325 = vst.msk [vmem:[%s2332_s3 + $0x10] sm:$0xff] %vm1322_vm0, %v1308_v51  ;;  %v1309_v58 = vmax.f32 %v1255_v52, 0.0  ;;  %v1630_v59 = vadd.f32 %v1629_v57, %v1628_v54  ;;  %v1693_v60 = vpop.f32.mrb[41].mxu1  ;;  %v1631_v30 = vpop.f32.mrb[42].mxu0 }
 0x149   :  { %v1694_v61 = vadd.f32 %v1693_v60, %v1692_v56  ;;  %v1695_v63 = vpop.f32.mrb[42].mxu1  ;;  %v1632_v1 = vpop.f32.mrb[43].mxu0 }
 0x14a   :  { %1326 = vst.msk [vmem:[%s2332_s3 + $0x18] sm:$0xff] %vm1322_vm0, %v1309_v58  ;;  %v1163_v32 = vadd.f32 %v1630_v59, %v2214_v46  ;;  %v1633_v3 = vadd.f32 %v1632_v1, %v1631_v30  ;;  %v1696_v4 = vpop.f32.mrb[43].mxu1 }
 0x14b   :  { %v1697_v5 = vadd.f32 %v1696_v4, %v1695_v63 }
 0x14c   :  { %v1260_v6 = vadd.f32 %v1694_v61, %v1163_v32  ;;  %v1166_v7 = vadd.f32 %v1633_v3, %v2217_v48 }
 0x14e   :  { %v1310_v9 = vmax.f32 %v1260_v6, 0.0  ;;  %v1263_v11 = vadd.f32 %v1697_v5, %v1166_v7  ;;  %v1634_v12 = vpop.f32.mrb[44].mxu0 }
 0x14f   :  { %v1698_v13 = vpop.f32.mrb[44].mxu1  ;;  %v1635_v15 = vpop.f32.mrb[45].mxu0 }
 0x150   :  { %1327 = vst.msk [vmem:[%s2332_s3 + $0x20] sm:$0xff] %vm1322_vm0, %v1310_v9  ;;  %v1311_v18 = vmax.f32 %v1263_v11, 0.0  ;;  %v1636_v20 = vadd.f32 %v1635_v15, %v1634_v12  ;;  %v1699_v21 = vpop.f32.mrb[45].mxu1  ;;  %v1637_v46 = vpop.f32.mrb[46].mxu0 }
 0x151   :  { %v1700_v22 = vadd.f32 %v1699_v21, %v1698_v13  ;;  %v1701_v23 = vpop.f32.mrb[46].mxu1  ;;  %v1638_v24 = vpop.f32.mrb[47].mxu0 }
 0x152   :  { %1328 = vst.msk [vmem:[%s2332_s3 + $0x28] sm:$0xff] %vm1322_vm0, %v1311_v18  ;;  %v1171_v48 = vadd.f32 %v1636_v20, %v2220_v62  ;;  %v1639_v25 = vadd.f32 %v1638_v24, %v1637_v46  ;;  %v1702_v26 = vpop.f32.mrb[47].mxu1 }
 0x153   :  { %v1703_v27 = vadd.f32 %v1702_v26, %v1701_v23 }
 0x154   :  { %v1268_v28 = vadd.f32 %v1700_v22, %v1171_v48  ;;  %v1174_v29 = vadd.f32 %v1639_v25, %v2223_v0 }
 0x156   :  { %v1312_v2 = vmax.f32 %v1268_v28, 0.0  ;;  %v1271_v31 = vadd.f32 %v1703_v27, %v1174_v29  ;;  %v1640_v33 = vpop.f32.mrb[48].mxu0 }
 0x157   :  { %v1704_v34 = vpop.f32.mrb[48].mxu1  ;;  %v1641_v36 = vpop.f32.mrb[49].mxu0 }
 0x158   :  { %1329 = vst.msk [vmem:[%s2332_s3 + $0x30] sm:$0xff] %vm1322_vm0, %v1312_v2  ;;  %v1313_v38 = vmax.f32 %v1271_v31, 0.0  ;;  %v1642_v39 = vadd.f32 %v1641_v36, %v1640_v33  ;;  %v1705_v14 = vpop.f32.mrb[49].mxu1  ;;  %v1643_v62 = vpop.f32.mrb[50].mxu0 }
 0x159   :  { %v1706_v40 = vadd.f32 %v1705_v14, %v1704_v34  ;;  %v1707_v41 = vpop.f32.mrb[50].mxu1  ;;  %v1644_v42 = vpop.f32.mrb[51].mxu0 }
 0x15a   :  { %1330 = vst.msk [vmem:[%s2332_s3 + $0x38] sm:$0xff] %vm1322_vm0, %v1313_v38  ;;  %v1179_v0 = vadd.f32 %v1642_v39, %v2226_v17  ;;  %v1645_v43 = vadd.f32 %v1644_v42, %v1643_v62  ;;  %v1708_v16 = vpop.f32.mrb[51].mxu1 }
 0x15b   :  { %v1709_v44 = vadd.f32 %v1708_v16, %v1707_v41 }
 0x15c   :  { %v1276_v45 = vadd.f32 %v1706_v40, %v1179_v0  ;;  %v1182_v47 = vadd.f32 %v1645_v43, %v2229_v19 }
 0x15e   :  { %v1314_v49 = vmax.f32 %v1276_v45, 0.0  ;;  %v1279_v50 = vadd.f32 %v1709_v44, %v1182_v47  ;;  %v1646_v51 = vpop.f32.mrb[52].mxu0 }
 0x15f   :  { %v1710_v52 = vpop.f32.mrb[52].mxu1  ;;  %v1647_v54 = vpop.f32.mrb[53].mxu0 }
 0x160   :  { %1331 = vst.msk [vmem:[%s2332_s3 + $0x40] sm:$0xff] %vm1322_vm0, %v1314_v49  ;;  %v1315_v56 = vmax.f32 %v1279_v50, 0.0  ;;  %v1648_v57 = vadd.f32 %v1647_v54, %v1646_v51  ;;  %v1711_v58 = vpop.f32.mrb[53].mxu1  ;;  %v1649_v17 = vpop.f32.mrb[54].mxu0 }
 0x161   :  { %v1712_v59 = vadd.f32 %v1711_v58, %v1710_v52  ;;  %v1713_v60 = vpop.f32.mrb[54].mxu1  ;;  %v1650_v30 = vpop.f32.mrb[55].mxu0 }
 0x162   :  { %1332 = vst.msk [vmem:[%s2332_s3 + $0x48] sm:$0xff] %vm1322_vm0, %v1315_v56  ;;  %v1187_v19 = vadd.f32 %v1648_v57, %v2232_v35  ;;  %v1651_v61 = vadd.f32 %v1650_v30, %v1649_v17  ;;  %v1714_v63 = vpop.f32.mrb[55].mxu1 }
 0x163   :  { %v1715_v1 = vadd.f32 %v1714_v63, %v1713_v60 }
 0x164   :  { %v1284_v32 = vadd.f32 %v1712_v59, %v1187_v19  ;;  %v1190_v3 = vadd.f32 %v1651_v61, %v2235_v37 }
 0x166   :  { %v1316_v4 = vmax.f32 %v1284_v32, 0.0  ;;  %v1287_v5 = vadd.f32 %v1715_v1, %v1190_v3  ;;  %v1652_v6 = vpop.f32.mrb[56].mxu0 }
 0x167   :  { %v1716_v7 = vpop.f32.mrb[56].mxu1  ;;  %v1653_v9 = vpop.f32.mrb[57].mxu0 }
 0x168   :  { %1333 = vst.msk [vmem:[%s2332_s3 + $0x50] sm:$0xff] %vm1322_vm0, %v1316_v4  ;;  %v1317_v11 = vmax.f32 %v1287_v5, 0.0  ;;  %v1654_v12 = vadd.f32 %v1653_v9, %v1652_v6  ;;  %v1717_v13 = vpop.f32.mrb[57].mxu1  ;;  %v1655_v35 = vpop.f32.mrb[58].mxu0 }
 0x169   :  { %v1718_v15 = vadd.f32 %v1717_v13, %v1716_v7  ;;  %v1719_v18 = vpop.f32.mrb[58].mxu1  ;;  %v1656_v20 = vpop.f32.mrb[59].mxu0 }
 0x16a   :  { %1334 = vst.msk [vmem:[%s2332_s3 + $0x58] sm:$0xff] %vm1322_vm0, %v1317_v11  ;;  %v1195_v37 = vadd.f32 %v1654_v12, %v2238_v53  ;;  %v1657_v21 = vadd.f32 %v1656_v20, %v1655_v35  ;;  %v1720_v46 = vpop.f32.mrb[59].mxu1 }
 0x16b   :  { %v1721_v22 = vadd.f32 %v1720_v46, %v1719_v18 }
 0x16c   :  { %v1292_v23 = vadd.f32 %v1718_v15, %v1195_v37  ;;  %v1198_v24 = vadd.f32 %v1657_v21, %v2241_v55 }
 0x16e   :  { %v1318_v48 = vmax.f32 %v1292_v23, 0.0  ;;  %v1295_v25 = vadd.f32 %v1721_v22, %v1198_v24  ;;  %v1658_v26 = vpop.f32.mrb[60].mxu0 }
 0x16f   :  { %v1722_v27 = vpop.f32.mrb[60].mxu1  ;;  %v1659_v28 = vpop.f32.mrb[61].mxu0 }
 0x170   :  { %1335 = vst.msk [vmem:[%s2332_s3 + $0x60] sm:$0xff] %vm1322_vm0, %v1318_v48  ;;  %v1319_v29 = vmax.f32 %v1295_v25, 0.0  ;;  %v1660_v2 = vadd.f32 %v1659_v28, %v1658_v26  ;;  %v1723_v31 = vpop.f32.mrb[61].mxu1  ;;  %v1661_v53 = vpop.f32.mrb[62].mxu0 }
 0x171   :  { %v1724_v33 = vadd.f32 %v1723_v31, %v1722_v27  ;;  %v1725_v34 = vpop.f32.mrb[62].mxu1  ;;  %v1662_v36 = vpop.f32.mrb[63].mxu0 }
 0x172   :  { %1336 = vst.msk [vmem:[%s2332_s3 + $0x68] sm:$0xff] %vm1322_vm0, %v1319_v29  ;;  %v1203_v55 = vadd.f32 %v1660_v2, %v2244_v8  ;;  %v1663_v38 = vadd.f32 %v1662_v36, %v1661_v53  ;;  %v1726_v39 = vpop.f32.mrb[63].mxu1 }
 0x173   :  { %v1727_v14 = vadd.f32 %v1726_v39, %v1725_v34 }
 0x174   :  { %v1300_v62 = vadd.f32 %v1724_v33, %v1203_v55  ;;  %v1206_v40 = vadd.f32 %v1663_v38, %v2247_v10 }
 0x176   :  { %v1320_v41 = vmax.f32 %v1300_v62, 0.0  ;;  %v1303_v42 = vadd.f32 %v1727_v14, %v1206_v40 }
 0x178   :  { %1337 = vst.msk [vmem:[%s2332_s3 + $0x70] sm:$0xff] %vm1322_vm0, %v1320_v41  ;;  %v1321_v0 = vmax.f32 %v1303_v42, 0.0 }
 0x17a   :  { %1338 = vst.msk [vmem:[%s2332_s3 + $0x78] sm:$0xff] %vm1322_vm0, %v1321_v0 }

// kernel: vae_forward.14
= control target key start
LH: loop header
LB: loop body
LE: loop exit
PB: predicated region body
PF: predicated region fallthrough
CT: control target
= control target key end

     0   :  { %s4916_s0 = inlined_call_operand.vmem [shape: bf16[1,512], index: 0, kind: input, shape index: {}]   ;;  %s4917_s1 = inlined_call_operand.<no memory space> [shape: f32[1], index: 1, kind: input, shape index: {}]   ;;  %s4918_s2 = inlined_call_operand.vmem [shape: bf16[512,512], index: 2, kind: input, shape index: {}]   ;;  %s4919_s3 = inlined_call_operand.vmem [shape: f32[1,512], index: 3, kind: output, shape index: {}]  }
   0x1   :  { %v15_v0 = vld [vmem:[%s4918_s2] sm:$0xff]   ;;  %v4226_v1 = vld [vmem:[%s4918_s2 + $0x10] sm:$0xff]   ;;  %v4227_v2 = vld [vmem:[%s4918_s2 + $0x8] sm:$0xff]  }
   0x2   :  { %20 = vst [vmem:[#allocation3] sm:$0xff] %v15_v0   ;;  %v4228_v3 = vld [vmem:[%s4918_s2 + $0x18] sm:$0xff]   ;;  %v4231_v4 = vld [vmem:[%s4918_s2 + $0x20] sm:$0xff]   ;;  %v4232_v7 = vld [vmem:[%s4918_s2 + $0x30] sm:$0xff]  }
   0x3   :  { %v3326_v5 = vcombine.high %v4227_v2, %v4228_v3  ;;  %v3325_v6 = vcombine.low %v4227_v2, %v4228_v3  ;;  %v4234_v8 = vld [vmem:[%s4918_s2 + $0x28] sm:$0xff]   ;;  %v4235_v9 = vld [vmem:[%s4918_s2 + $0x38] sm:$0xff]   ;;  %v3328_v11 = vcombine.high %v4231_v4, %v4232_v7  ;;  %v4239_v12 = vld [vmem:[%s4918_s2 + $0x40] sm:$0xff]   ;;  %v3327_v20 = vcombine.low %v4231_v4, %v4232_v7 }
   0x4   :  { %v3330_v15 = vcombine.high %v4234_v8, %v4235_v9  ;;  %v3329_v16 = vcombine.low %v4234_v8, %v4235_v9  ;;  %v4240_v17 = vld [vmem:[%s4918_s2 + $0x50] sm:$0xff]   ;;  %v4242_v18 = vld [vmem:[%s4918_s2 + $0x48] sm:$0xff]   ;;  %v4243_v19 = vld [vmem:[%s4918_s2 + $0x58] sm:$0xff]  }
   0x5   :  { %2943 = vmatprep.subr.bf16.mxu1 %v3326_v5  ;;  %v4247_v21 = vld [vmem:[%s4918_s2 + $0x60] sm:$0xff]   ;;  %v3332_v22 = vcombine.high %v4239_v12, %v4240_v17  ;;  %v3334_v23 = vcombine.high %v4242_v18, %v4243_v19  ;;  %v3333_v24 = vcombine.low %v4242_v18, %v4243_v19  ;;  %v4248_v25 = vld [vmem:[%s4918_s2 + $0x70] sm:$0xff]   ;;  %v4250_v26 = vld [vmem:[%s4918_s2 + $0x68] sm:$0xff]   ;;  %v3331_v28 = vcombine.low %v4239_v12, %v4240_v17 }
   0x6   :  { %2944 = vmatpush1.bf16.msra.mxu1 %v3325_v6  ;;  %v4251_v27 = vld [vmem:[%s4918_s2 + $0x78] sm:$0xff]   ;;  %v4255_v29 = vld [vmem:[%s4918_s2 + $0x80] sm:$0xff]   ;;  %v3336_v30 = vcombine.high %v4247_v21, %v4248_v25  ;;  %v4256_v33 = vld [vmem:[%s4918_s2 + $0x90] sm:$0xff]   ;;  %v3335_v36 = vcombine.low %v4247_v21, %v4248_v25 }
   0x7   :  { %2945 = vmatprep.subr.bf16.mxu1 %v3330_v15  ;;  %v3338_v31 = vcombine.high %v4250_v26, %v4251_v27  ;;  %v3337_v32 = vcombine.low %v4250_v26, %v4251_v27  ;;  %v4258_v34 = vld [vmem:[%s4918_s2 + $0x88] sm:$0xff]   ;;  %v4259_v35 = vld [vmem:[%s4918_s2 + $0x98] sm:$0xff]   ;;  %v4263_v37 = vld [vmem:[%s4918_s2 + $0xa0] sm:$0xff]   ;;  %v3340_v38 = vcombine.high %v4255_v29, %v4256_v33  ;;  %v3339_v44 = vcombine.low %v4255_v29, %v4256_v33 }
   0x8   :  { %v3342_v39 = vcombine.high %v4258_v34, %v4259_v35  ;;  %v3341_v40 = vcombine.low %v4258_v34, %v4259_v35  ;;  %v4264_v41 = vld [vmem:[%s4918_s2 + $0xb0] sm:$0xff]   ;;  %v4266_v42 = vld [vmem:[%s4918_s2 + $0xa8] sm:$0xff]   ;;  %v4267_v43 = vld [vmem:[%s4918_s2 + $0xb8] sm:$0xff]  }
   0x9   :  { %v2062_v10 = vld [vmem:[#allocation3] sm:$0xff]  ;;  %v3344_v46 = vcombine.high %v4263_v37, %v4264_v41  ;;  %v3346_v47 = vcombine.high %v4266_v42, %v4267_v43  ;;  %v3345_v48 = vcombine.low %v4266_v42, %v4267_v43  ;;  %v4272_v49 = vld [vmem:[%s4918_s2 + $0xd0] sm:$0xff]   ;;  %v4274_v50 = vld [vmem:[%s4918_s2 + $0xc8] sm:$0xff]   ;;  %v3343_v52 = vcombine.low %v4263_v37, %v4264_v41 }
   0xa   :  { %v3324_v13 = vcombine.high %v2062_v10, %v4226_v1  ;;  %v3323_v14 = vcombine.low %v2062_v10, %v4226_v1  ;;  %2946 = vmatpush1.bf16.msra.mxu1 %v3329_v16  ;;  %v4271_v45 = vld [vmem:[%s4918_s2 + $0xc0] sm:$0xff]   ;;  %v4275_v51 = vld [vmem:[%s4918_s2 + $0xd8] sm:$0xff]   ;;  %v4280_v57 = vld [vmem:[%s4918_s2 + $0xf0] sm:$0xff]  }
   0xb   :  { %2947 = vmatprep.subr.bf16.mxu1 %v3334_v23  ;;  %v4279_v53 = vld [vmem:[%s4918_s2 + $0xe0] sm:$0xff]   ;;  %v3348_v54 = vcombine.high %v4271_v45, %v4272_v49  ;;  %v3350_v55 = vcombine.high %v4274_v50, %v4275_v51  ;;  %v3349_v56 = vcombine.low %v4274_v50, %v4275_v51  ;;  %v4282_v58 = vld [vmem:[%s4918_s2 + $0xe8] sm:$0xff]   ;;  %v4283_v59 = vld [vmem:[%s4918_s2 + $0xf8] sm:$0xff]   ;;  %v3347_v60 = vcombine.low %v4271_v45, %v4272_v49 }
   0xc   :  { %2861 = vmatprep.subr.bf16.mxu0 %v3324_v13  ;;  %v4287_v61 = vld [vmem:[%s4918_s2 + $0x100] sm:$0xff]   ;;  %v3352_v62 = vcombine.high %v4279_v53, %v4280_v57  ;;  %v3354_v63 = vcombine.high %v4282_v58, %v4283_v59  ;;  %v3353_v0 = vcombine.low %v4282_v58, %v4283_v59  ;;  %v4288_v1 = vld [vmem:[%s4918_s2 + $0x110] sm:$0xff]   ;;  %v4290_v2 = vld [vmem:[%s4918_s2 + $0x108] sm:$0xff]   ;;  %v3351_v4 = vcombine.low %v4279_v53, %v4280_v57 }
   0xd   :  { %2862 = vmatpush1.bf16.msra.mxu0 %v3323_v14  ;;  %v4291_v3 = vld [vmem:[%s4918_s2 + $0x118] sm:$0xff]   ;;  %v4295_v5 = vld [vmem:[%s4918_s2 + $0x120] sm:$0xff]   ;;  %v3356_v6 = vcombine.high %v4287_v61, %v4288_v1  ;;  %v4296_v9 = vld [vmem:[%s4918_s2 + $0x130] sm:$0xff]   ;;  %v3355_v12 = vcombine.low %v4287_v61, %v4288_v1 }
   0xe   :  { %2863 = vmatprep.subr.bf16.mxu0 %v3328_v11  ;;  %2948 = vmatpush1.bf16.msra.mxu1 %v3333_v24  ;;  %v3358_v7 = vcombine.high %v4290_v2, %v4291_v3  ;;  %v3357_v8 = vcombine.low %v4290_v2, %v4291_v3  ;;  %v4298_v10 = vld [vmem:[%s4918_s2 + $0x128] sm:$0xff]   ;;  %v4299_v11 = vld [vmem:[%s4918_s2 + $0x138] sm:$0xff]   ;;  %v4303_v13 = vld [vmem:[%s4918_s2 + $0x140] sm:$0xff]   ;;  %v3360_v14 = vcombine.high %v4295_v5, %v4296_v9 }
   0xf   :  { %2949 = vmatprep.subr.bf16.mxu1 %v3338_v31  ;;  %v3362_v15 = vcombine.high %v4298_v10, %v4299_v11  ;;  %v3361_v16 = vcombine.low %v4298_v10, %v4299_v11  ;;  %v4304_v17 = vld [vmem:[%s4918_s2 + $0x150] sm:$0xff]   ;;  %v4306_v18 = vld [vmem:[%s4918_s2 + $0x148] sm:$0xff]   ;;  %v4307_v19 = vld [vmem:[%s4918_s2 + $0x158] sm:$0xff]  }
  0x10   :  { %v4311_v21 = vld [vmem:[%s4918_s2 + $0x160] sm:$0xff]   ;;  %v3366_v23 = vcombine.high %v4306_v18, %v4307_v19  ;;  %v3365_v24 = vcombine.low %v4306_v18, %v4307_v19  ;;  %v4312_v25 = vld [vmem:[%s4918_s2 + $0x170] sm:$0xff]   ;;  %v4314_v26 = vld [vmem:[%s4918_s2 + $0x168] sm:$0xff]  }
  0x11   :  { %2864 = vmatpush1.bf16.msra.mxu0 %v3327_v20  ;;  %v3359_v20 = vcombine.low %v4295_v5, %v4296_v9  ;;  %v4315_v27 = vld [vmem:[%s4918_s2 + $0x178] sm:$0xff]   ;;  %v4319_v29 = vld [vmem:[%s4918_s2 + $0x180] sm:$0xff]   ;;  %v4320_v33 = vld [vmem:[%s4918_s2 + $0x190] sm:$0xff]  }
  0x12   :  { %2865 = vmatprep.subr.bf16.mxu0 %v3332_v22  ;;  %2950 = vmatpush1.bf16.msra.mxu1 %v3337_v32  ;;  %v3364_v22 = vcombine.high %v4303_v13, %v4304_v17  ;;  %v3370_v31 = vcombine.high %v4314_v26, %v4315_v27  ;;  %v3369_v32 = vcombine.low %v4314_v26, %v4315_v27  ;;  %v4322_v34 = vld [vmem:[%s4918_s2 + $0x188] sm:$0xff]   ;;  %v4323_v35 = vld [vmem:[%s4918_s2 + $0x198] sm:$0xff]   ;;  %v4327_v37 = vld [vmem:[%s4918_s2 + $0x1a0] sm:$0xff]  }
  0x13   :  { %2951 = vmatprep.subr.bf16.mxu1 %v3342_v39  ;;  %v3374_v39 = vcombine.high %v4322_v34, %v4323_v35  ;;  %v4328_v41 = vld [vmem:[%s4918_s2 + $0x1b0] sm:$0xff]   ;;  %v4330_v42 = vld [vmem:[%s4918_s2 + $0x1a8] sm:$0xff]   ;;  %v4331_v43 = vld [vmem:[%s4918_s2 + $0x1b8] sm:$0xff]  }
  0x14   :  { %v3376_v49 = vcombine.high %v4327_v37, %v4328_v41  ;;  %v3378_v50 = vcombine.high %v4330_v42, %v4331_v43  ;;  %v3377_v51 = vcombine.low %v4330_v42, %v4331_v43  ;;  %v4338_v53 = vld [vmem:[%s4918_s2 + $0x1c8] sm:$0xff]   ;;  %v3375_v57 = vcombine.low %v4327_v37, %v4328_v41  ;;  %v4343_v58 = vld [vmem:[%s4918_s2 + $0x1e0] sm:$0xff]   ;;  %v4352_v9 = vld [vmem:[%s4918_s2 + $0x210] sm:$0xff]  }
  0x15   :  { %2866 = vmatpush1.bf16.msra.mxu0 %v3331_v28  ;;  %v3363_v28 = vcombine.low %v4303_v13, %v4304_v17  ;;  %v3322_v3 = vld.sshfl [vmem:[%s4916_s0] sm:$0x33 pattern:$0x75316420]  ;;  %v4355_v11 = vld [vmem:[%s4918_s2 + $0x208] sm:$0xff]   ;;  %v4360_v19 = vld [vmem:[%s4918_s2 + $0x230] sm:$0xff]  }
  0x16   :  { %2867 = vmatprep.subr.bf16.mxu0 %v3336_v30  ;;  %2952 = vmatpush1.bf16.msra.mxu1 %v3341_v40  ;;  %v3368_v30 = vcombine.high %v4311_v21, %v4312_v25  ;;  %v3373_v40 = vcombine.low %v4322_v34, %v4323_v35  ;;  %v4379_v37 = vld [vmem:[%s4918_s2 + $0x268] sm:$0xff]   ;;  %v4383_v41 = vld [vmem:[%s4918_s2 + $0x280] sm:$0xff]  }
  0x17   :  { %2953 = vmatprep.subr.bf16.mxu1 %v3346_v47  ;;  %v3371_v47 = vcombine.low %v4319_v29, %v4320_v33 }
  0x19   :  { %2868 = vmatpush1.bf16.msra.mxu0 %v3335_v36  ;;  %v3367_v36 = vcombine.low %v4311_v21, %v4312_v25  ;;  %v4363_v21 = vld [vmem:[%s4918_s2 + $0x228] sm:$0xff]   ;;  %v4367_v25 = vld [vmem:[%s4918_s2 + $0x240] sm:$0xff]  }
  0x1a   :  { %2869 = vmatprep.subr.bf16.mxu0 %v3340_v38  ;;  %2954 = vmatpush1.bf16.msra.mxu1 %v3345_v48  ;;  %v3372_v38 = vcombine.high %v4319_v29, %v4320_v33  ;;  %v4335_v48 = vld [vmem:[%s4918_s2 + $0x1c0] sm:$0xff]   ;;  %v4371_v29 = vld [vmem:[%s4918_s2 + $0x248] sm:$0xff]  }
  0x1b   :  { %2955 = vmatprep.subr.bf16.mxu1 %v3350_v55  ;;  %v4375_v33 = vld [vmem:[%s4918_s2 + $0x260] sm:$0xff]  }
  0x1d   :  { %2870 = vmatpush1.bf16.msra.mxu0 %v3339_v44  ;;  %v4487_v44 = vmov 1966171168  }
  0x1e   :  { %2871 = vmatprep.subr.bf16.mxu0 %v3344_v46  ;;  %2956 = vmatpush1.bf16.msra.mxu1 %v3349_v56  ;;  %v2202_v45 = vunpack.c.l.s4 %v4487_v44  ;;  %v2204_v46 = vlaneseq  ;;  %v4384_v44 = vld [vmem:[%s4918_s2 + $0x290] sm:$0xff]  }
  0x1f   :  { %2957 = vmatprep.subr.bf16.mxu1 %v3354_v63  ;;  %v4346_v63 = vld [vmem:[%s4918_s2 + $0x1e8] sm:$0xff]  }
  0x20   :  { %v2203_v55 = vunpack.c.0.s8 %v2202_v45  ;;  %v2205_v56 = vshrl.u32 %v2204_v46, 7  ;;  %v4387_v45 = vld [vmem:[%s4918_s2 + $0x288] sm:$0xff]   ;;  %vm3060_vm0 = vcmp.lt.s32.totalorder %v2204_v46, 512 }
  0x21   :  { %2872 = vmatpush1.bf16.msra.mxu0 %v3343_v52  ;;  %v4336_v52 = vld [vmem:[%s4918_s2 + $0x1d0] sm:$0xff]  }
  0x22   :  { %2873 = vmatprep.subr.bf16.mxu0 %v3348_v54  ;;  %2958 = vmatpush1.bf16.msra.mxu1 %v3353_v0  ;;  %v4339_v54 = vld [vmem:[%s4918_s2 + $0x1d8] sm:$0xff]   ;;  %v3380_v59 = vcombine.high %v4335_v48, %v4336_v52  ;;  %v4701_v1 = vsub.s32 %v2203_v55, %v2205_v56  ;;  %v3379_v2 = vcombine.low %v4335_v48, %v4336_v52 }
  0x23   :  { %2959 = vmatprep.subr.bf16.mxu1 %v3358_v7  ;;  %v3381_v61 = vcombine.low %v4338_v53, %v4339_v54  ;;  %v4347_v0 = vld [vmem:[%s4918_s2 + $0x1f8] sm:$0xff]   ;;  %v2200_v7 = vcombine.high %v3322_v3, %v3322_v3  ;;  %v3403_v55 = vcombine.low %v4383_v41, %v4384_v44 }
  0x24   :  { %v3386_v5 = vcombine.high %v4346_v63, %v4347_v0  ;;  %v4388_v48 = vld [vmem:[%s4918_s2 + $0x298] sm:$0xff]  }
  0x25   :  { %2874 = vmatpush1.bf16.msra.mxu0 %v3347_v60  ;;  %v3382_v60 = vcombine.high %v4338_v53, %v4339_v54  ;;  %v2214_v10 = vrot.slane %v2200_v7, %v4701_v1  ;;  %v3406_v52 = vcombine.high %v4387_v45, %v4388_v48  ;;  %v4392_v53 = vld [vmem:[%s4918_s2 + $0x2b0] sm:$0xff]   ;;  %v4395_v54 = vld [vmem:[%s4918_s2 + $0x2a8] sm:$0xff]   ;;  %v4396_v56 = vld [vmem:[%s4918_s2 + $0x2b8] sm:$0xff]  }
  0x26   :  { %2875 = vmatprep.subr.bf16.mxu0 %v3352_v62  ;;  %2960 = vmatpush1.bf16.msra.mxu1 %v3357_v8  ;;  %v4344_v62 = vld [vmem:[%s4918_s2 + $0x1f0] sm:$0xff]   ;;  %v4351_v8 = vld [vmem:[%s4918_s2 + $0x200] sm:$0xff]   ;;  %v4411_v7 = vld [vmem:[%s4918_s2 + $0x2e8] sm:$0xff]  }
  0x27   :  { %2961 = vmatprep.subr.bf16.mxu1 %v3362_v15  ;;  %v3383_v13 = vcombine.low %v4343_v58, %v4344_v62  ;;  %2893 = vmatprep.mubr.bf16.mxu0 %v2214_v10  ;;  %v3388_v15 = vcombine.high %v4351_v8, %v4352_v9 }
  0x28   :  { %2975 = vmatprep.mubr.bf16.mxu1 %v2214_v10 }
  0x29   :  { %2876 = vmatpush1.bf16.msra.mxu0 %v3351_v4  ;;  %v3384_v4 = vcombine.high %v4343_v58, %v4344_v62  ;;  %v4399_v58 = vld [vmem:[%s4918_s2 + $0x2c0] sm:$0xff]   ;;  %v4403_v62 = vld [vmem:[%s4918_s2 + $0x2c8] sm:$0xff]  }
  0x2a   :  { %2877 = vmatprep.subr.bf16.mxu0 %v3356_v6  ;;  %2962 = vmatpush1.bf16.msra.mxu1 %v3361_v16  ;;  %v3385_v6 = vcombine.low %v4346_v63, %v4347_v0  ;;  %v4359_v16 = vld [vmem:[%s4918_s2 + $0x220] sm:$0xff]   ;;  %v4404_v0 = vld [vmem:[%s4918_s2 + $0x2d8] sm:$0xff]  }
  0x2b   :  { %2963 = vmatprep.subr.bf16.mxu1 %v3366_v23  ;;  %v4364_v23 = vld [vmem:[%s4918_s2 + $0x238] sm:$0xff]  }
  0x2c   :  { %v3393_v26 = vcombine.low %v4363_v21, %v4364_v23  ;;  %v3394_v27 = vcombine.high %v4363_v21, %v4364_v23  ;;  %v4424_v23 = vld [vmem:[%s4918_s2 + $0x330] sm:$0xff]  }
  0x2d   :  { %2878 = vmatpush1.bf16.msra.mxu0 %v3355_v12  ;;  %v4717_v12 = vrot.slane %v3322_v3, %v4701_v1  ;;  %v4407_v3 = vld [vmem:[%s4918_s2 + $0x2e0] sm:$0xff]  }
  0x2e   :  { %2879 = vmatprep.subr.bf16.mxu0 %v3360_v14  ;;  %2964 = vmatpush1.bf16.msra.mxu1 %v3365_v24  ;;  %v4356_v14 = vld [vmem:[%s4918_s2 + $0x218] sm:$0xff]   ;;  %v3392_v24 = vcombine.high %v4359_v16, %v4360_v19 }
  0x2f   :  { %2965 = vmatprep.subr.bf16.mxu1 %v3370_v31  ;;  %v3389_v17 = vcombine.low %v4355_v11, %v4356_v14  ;;  %v3390_v18 = vcombine.high %v4355_v11, %v4356_v14  ;;  %v4372_v31 = vld [vmem:[%s4918_s2 + $0x258] sm:$0xff]   ;;  %v4415_v11 = vld [vmem:[%s4918_s2 + $0x300] sm:$0xff]  }
  0x30   :  { %v3397_v34 = vcombine.low %v4371_v29, %v4372_v31  ;;  %v3398_v35 = vcombine.high %v4371_v29, %v4372_v31  ;;  %v4432_v31 = vld [vmem:[%s4918_s2 + $0x350] sm:$0xff]  }
  0x31   :  { %2880 = vmatpush1.bf16.msra.mxu0 %v3359_v20  ;;  %v2216_v20 = vcombine.high %v2214_v10, %v2214_v10 }
  0x32   :  { %2881 = vmatprep.subr.bf16.mxu0 %v3364_v22  ;;  %2966 = vmatpush1.bf16.msra.mxu1 %v3369_v32  ;;  %v3387_v22 = vcombine.low %v4351_v8, %v4352_v9  ;;  %v4412_v9 = vld [vmem:[%s4918_s2 + $0x2f8] sm:$0xff]  }
  0x33   :  { %2967 = vmatprep.subr.bf16.mxu1 %v3374_v39  ;;  %v4380_v39 = vld [vmem:[%s4918_s2 + $0x278] sm:$0xff]   ;;  %v3418_v14 = vcombine.high %v4411_v7, %v4412_v9 }
  0x34   :  { %v3401_v42 = vcombine.low %v4379_v37, %v4380_v39  ;;  %v3402_v43 = vcombine.high %v4379_v37, %v4380_v39  ;;  %v4440_v39 = vld [vmem:[%s4918_s2 + $0x370] sm:$0xff]  }
  0x35   :  { %2882 = vmatpush1.bf16.msra.mxu0 %v3363_v28  ;;  %v4368_v28 = vld [vmem:[%s4918_s2 + $0x250] sm:$0xff]  }
  0x36   :  { %2883 = vmatprep.subr.bf16.mxu0 %v3368_v30  ;;  %2968 = vmatpush1.bf16.msra.mxu1 %v3373_v40  ;;  %v3391_v30 = vcombine.low %v4359_v16, %v4360_v19  ;;  %v3396_v32 = vcombine.high %v4367_v25, %v4368_v28  ;;  %v4419_v16 = vld [vmem:[%s4918_s2 + $0x308] sm:$0xff]  }
  0x37   :  { %2969 = vmatprep.subr.bf16.mxu1 %v3378_v50  ;;  %v4391_v50 = vld [vmem:[%s4918_s2 + $0x2a0] sm:$0xff]  }
  0x38   :  { %v3407_v63 = vcombine.low %v4391_v50, %v4392_v53 }
  0x39   :  { %2884 = vmatpush1.bf16.msra.mxu0 %v3367_v36  ;;  %v4376_v36 = vld [vmem:[%s4918_s2 + $0x270] sm:$0xff]  }
  0x3a   :  { %2885 = vmatprep.subr.bf16.mxu0 %v3372_v38  ;;  %2970 = vmatpush1.bf16.msra.mxu1 %v3377_v51  ;;  %v3395_v38 = vcombine.low %v4367_v25, %v4368_v28  ;;  %v3400_v40 = vcombine.high %v4375_v33, %v4376_v36  ;;  %v3405_v51 = vcombine.low %v4387_v45, %v4388_v48  ;;  %v4431_v28 = vld [vmem:[%s4918_s2 + $0x340] sm:$0xff]   ;;  %v4448_v48 = vld [vmem:[%s4918_s2 + $0x390] sm:$0xff]  }
  0x3b   :  { %2971 = vmatprep.subr.bf16.mxu1 %v3382_v60  ;;  %v3410_v60 = vcombine.high %v4395_v54, %v4396_v56 }
  0x3d   :  { %2886 = vmatpush1.bf16.msra.mxu0 %v3371_v47  ;;  %v3399_v47 = vcombine.low %v4375_v33, %v4376_v36  ;;  %v4439_v36 = vld [vmem:[%s4918_s2 + $0x360] sm:$0xff]  }
  0x3e   :  { %2887 = vmatprep.subr.bf16.mxu0 %v3376_v49  ;;  %2972 = vmatpush1.bf16.msra.mxu1 %v3381_v61  ;;  %v3404_v49 = vcombine.high %v4383_v41, %v4384_v44  ;;  %v4400_v61 = vld [vmem:[%s4918_s2 + $0x2d0] sm:$0xff]   ;;  %v3427_v41 = vcombine.low %v4431_v28, %v4432_v31  ;;  %v4447_v44 = vld [vmem:[%s4918_s2 + $0x380] sm:$0xff]  }
  0x3f   :  { %2973 = vmatprep.subr.bf16.mxu1 %v3386_v5  ;;  %v3414_v5 = vcombine.high %v4403_v62, %v4404_v0  ;;  %v3411_v8 = vcombine.low %v4399_v58, %v4400_v61 }
  0x41   :  { %2888 = vmatpush1.bf16.msra.mxu0 %v3375_v57  ;;  %v3408_v57 = vcombine.high %v4391_v50, %v4392_v53  ;;  %v3431_v50 = vcombine.low %v4439_v36, %v4440_v39  ;;  %v4455_v53 = vld [vmem:[%s4918_s2 + $0x3a0] sm:$0xff]  }
  0x42   :  { %2889 = vmatprep.subr.bf16.mxu0 %v3380_v59  ;;  %2974 = vmatpush1.bf16.msra.mxu1 %v3385_v6  ;;  %v3409_v59 = vcombine.low %v4395_v54, %v4396_v56  ;;  %v4408_v6 = vld [vmem:[%s4918_s2 + $0x2f0] sm:$0xff]  }
  0x43   :  { %2984 = vmatprep.subr.bf16.mxu1 %v3390_v18  ;;  %v3416_v10 = vcombine.high %v4407_v3, %v4408_v6  ;;  %v4420_v18 = vld [vmem:[%s4918_s2 + $0x318] sm:$0xff]   ;;  %v4456_v56 = vld [vmem:[%s4918_s2 + $0x3b0] sm:$0xff]  }
  0x44   :  { %v3421_v21 = vcombine.low %v4419_v16, %v4420_v18 }
  0x45   :  { %2890 = vmatpush1.bf16.msra.mxu0 %v3379_v2  ;;  %2976 = vmatmul.mubr.bf16.vlgmr.msra.gmra.mrb[0].mxu1 %v4717_v12  ;;  %v3412_v2 = vcombine.high %v4399_v58, %v4400_v61  ;;  %v3435_v58 = vcombine.low %v4447_v44, %v4448_v48  ;;  %v4463_v61 = vld [vmem:[%s4918_s2 + $0x3c0] sm:$0xff]  }
  0x46   :  { %2891 = vmatprep.subr.bf16.mxu0 %v3384_v4  ;;  %2985 = vmatpush1.bf16.msra.mxu1 %v3389_v17  ;;  %v3413_v4 = vcombine.low %v4403_v62, %v4404_v0  ;;  %v3415_v17 = vcombine.low %v4407_v3, %v4408_v6  ;;  %v4464_v0 = vld [vmem:[%s4918_s2 + $0x3d0] sm:$0xff]   ;;  %v3439_v3 = vcombine.low %v4455_v53, %v4456_v56  ;;  %v4471_v6 = vld [vmem:[%s4918_s2 + $0x3e0] sm:$0xff]  }
  0x47   :  { %3016 = vmatprep.mubr.bf16.mxu1 %v2216_v20  ;;  %2986 = vmatprep.subr.bf16.mxu1 %v3394_v27 }
  0x49   :  { %2892 = vmatpush1.bf16.msra.mxu0 %v3383_v13  ;;  %v3417_v13 = vcombine.low %v4411_v7, %v4412_v9  ;;  %v4472_v9 = vld [vmem:[%s4918_s2 + $0x3f0] sm:$0xff]  }
  0x4a   :  { %2902 = vmatprep.subr.bf16.mxu0 %v3388_v15  ;;  %2987 = vmatpush1.bf16.msra.mxu1 %v3393_v26  ;;  %v4416_v15 = vld [vmem:[%s4918_s2 + $0x310] sm:$0xff]   ;;  %v4428_v26 = vld [vmem:[%s4918_s2 + $0x338] sm:$0xff]  }
  0x4b   :  { %2988 = vmatprep.subr.bf16.mxu1 %v3398_v35  ;;  %v3420_v19 = vcombine.high %v4415_v11, %v4416_v15  ;;  %v3419_v25 = vcombine.low %v4415_v11, %v4416_v15  ;;  %v3428_v35 = vcombine.high %v4431_v28, %v4432_v31  ;;  %v3443_v11 = vcombine.low %v4463_v61, %v4464_v0 }
  0x4c   :  { %2894 = vmatmul.mubr.bf16.vlgmr.msra.gmra.mrb[0].mxu0 %v4717_v12 }
  0x4d   :  { %2903 = vmatpush1.bf16.msra.mxu0 %v3387_v22  ;;  %2934 = vmatprep.mubr.bf16.mxu0 %v2216_v20  ;;  %v4423_v20 = vld [vmem:[%s4918_s2 + $0x320] sm:$0xff]   ;;  %v3422_v22 = vcombine.high %v4419_v16, %v4420_v18  ;;  %v2215_v18 = vcombine.high %v4717_v12, %v4717_v12 }
  0x4e   :  { %2904 = vmatprep.subr.bf16.mxu0 %v3392_v24  ;;  %2989 = vmatpush1.bf16.msra.mxu1 %v3397_v34  ;;  %v4427_v24 = vld [vmem:[%s4918_s2 + $0x328] sm:$0xff]   ;;  %v3424_v27 = vcombine.high %v4423_v20, %v4424_v23  ;;  %v3423_v33 = vcombine.low %v4423_v20, %v4424_v23  ;;  %v4436_v34 = vld [vmem:[%s4918_s2 + $0x358] sm:$0xff]  }
  0x4f   :  { %2990 = vmatprep.subr.bf16.mxu1 %v3402_v43  ;;  %v3425_v29 = vcombine.low %v4427_v24, %v4428_v26  ;;  %v3432_v43 = vcombine.high %v4439_v36, %v4440_v39 }
  0x51   :  { %2905 = vmatpush1.bf16.msra.mxu0 %v3391_v30  ;;  %v3426_v30 = vcombine.high %v4427_v24, %v4428_v26 }
  0x52   :  { %2906 = vmatprep.subr.bf16.mxu0 %v3396_v32  ;;  %2991 = vmatpush1.bf16.msra.mxu1 %v3401_v42  ;;  %v4435_v32 = vld [vmem:[%s4918_s2 + $0x348] sm:$0xff]   ;;  %v4444_v42 = vld [vmem:[%s4918_s2 + $0x378] sm:$0xff]  }
  0x53   :  { %2992 = vmatprep.subr.bf16.mxu1 %v3406_v52  ;;  %v3429_v37 = vcombine.low %v4435_v32, %v4436_v34  ;;  %v3436_v52 = vcombine.high %v4447_v44, %v4448_v48 }
  0x55   :  { %2907 = vmatpush1.bf16.msra.mxu0 %v3395_v38  ;;  %v3430_v38 = vcombine.high %v4435_v32, %v4436_v34 }
  0x56   :  { %2908 = vmatprep.subr.bf16.mxu0 %v3400_v40  ;;  %2993 = vmatpush1.bf16.msra.mxu1 %v3405_v51  ;;  %v4443_v40 = vld [vmem:[%s4918_s2 + $0x368] sm:$0xff]   ;;  %v4452_v51 = vld [vmem:[%s4918_s2 + $0x398] sm:$0xff]  }
  0x57   :  { %2994 = vmatprep.subr.bf16.mxu1 %v3410_v60  ;;  %v3433_v45 = vcombine.low %v4443_v40, %v4444_v42  ;;  %v3440_v60 = vcombine.high %v4455_v53, %v4456_v56 }
  0x59   :  { %2909 = vmatpush1.bf16.msra.mxu0 %v3399_v47  ;;  %v3434_v47 = vcombine.high %v4443_v40, %v4444_v42 }
  0x5a   :  { %2910 = vmatprep.subr.bf16.mxu0 %v3404_v49  ;;  %2995 = vmatpush1.bf16.msra.mxu1 %v3409_v59  ;;  %v4451_v49 = vld [vmem:[%s4918_s2 + $0x388] sm:$0xff]   ;;  %v4460_v59 = vld [vmem:[%s4918_s2 + $0x3b8] sm:$0xff]  }
  0x5b   :  { %2996 = vmatprep.subr.bf16.mxu1 %v3414_v5  ;;  %v3437_v54 = vcombine.low %v4451_v49, %v4452_v51  ;;  %v3444_v5 = vcombine.high %v4463_v61, %v4464_v0 }
  0x5d   :  { %2911 = vmatpush1.bf16.msra.mxu0 %v3403_v55  ;;  %v3438_v55 = vcombine.high %v4451_v49, %v4452_v51 }
  0x5e   :  { %2912 = vmatprep.subr.bf16.mxu0 %v3408_v57  ;;  %2997 = vmatpush1.bf16.msra.mxu1 %v3413_v4  ;;  %v4459_v57 = vld [vmem:[%s4918_s2 + $0x3a8] sm:$0xff]   ;;  %v4468_v4 = vld [vmem:[%s4918_s2 + $0x3d8] sm:$0xff]  }
  0x5f   :  { %2998 = vmatprep.subr.bf16.mxu1 %v3418_v14  ;;  %v3441_v62 = vcombine.low %v4459_v57, %v4460_v59  ;;  %v3448_v14 = vcombine.high %v4471_v6, %v4472_v9 }
  0x61   :  { %2913 = vmatpush1.bf16.msra.mxu0 %v3407_v63  ;;  %v3442_v63 = vcombine.high %v4459_v57, %v4460_v59 }
  0x62   :  { %2914 = vmatprep.subr.bf16.mxu0 %v3412_v2  ;;  %2999 = vmatpush1.bf16.msra.mxu1 %v3417_v13  ;;  %v4467_v2 = vld [vmem:[%s4918_s2 + $0x3c8] sm:$0xff]   ;;  %v4476_v13 = vld [vmem:[%s4918_s2 + $0x3f8] sm:$0xff]  }
  0x63   :  { %3000 = vmatprep.subr.bf16.mxu1 %v3422_v22  ;;  %v3445_v7 = vcombine.low %v4467_v2, %v4468_v4 }
  0x65   :  { %2915 = vmatpush1.bf16.msra.mxu0 %v3411_v8  ;;  %v3446_v8 = vcombine.high %v4467_v2, %v4468_v4 }
  0x66   :  { %2916 = vmatprep.subr.bf16.mxu0 %v3416_v10  ;;  %3001 = vmatpush1.bf16.msra.mxu1 %v3421_v21  ;;  %v4475_v10 = vld [vmem:[%s4918_s2 + $0x3e8] sm:$0xff]  }
  0x67   :  { %3002 = vmatprep.subr.bf16.mxu1 %v3426_v30  ;;  %v3449_v15 = vcombine.low %v4475_v10, %v4476_v13  ;;  %v3450_v16 = vcombine.high %v4475_v10, %v4476_v13 }
  0x69   :  { %2917 = vmatpush1.bf16.msra.mxu0 %v3415_v17  ;;  %v3447_v17 = vcombine.low %v4471_v6, %v4472_v9 }
  0x6a   :  { %2918 = vmatprep.subr.bf16.mxu0 %v3420_v19  ;;  %3003 = vmatpush1.bf16.msra.mxu1 %v3425_v29  ;;  %v2191_v19 = vstv %s4917_s1 }
  0x6b   :  { %3004 = vmatprep.subr.bf16.mxu1 %v3430_v38 }
  0x6d   :  { %2919 = vmatpush1.bf16.msra.mxu0 %v3419_v25 }
  0x6e   :  { %2920 = vmatprep.subr.bf16.mxu0 %v3424_v27  ;;  %3005 = vmatpush1.bf16.msra.mxu1 %v3429_v37 }
  0x6f   :  { %3006 = vmatprep.subr.bf16.mxu1 %v3434_v47 }
  0x71   :  { %2921 = vmatpush1.bf16.msra.mxu0 %v3423_v33 }
  0x72   :  { %2922 = vmatprep.subr.bf16.mxu0 %v3428_v35  ;;  %3007 = vmatpush1.bf16.msra.mxu1 %v3433_v45 }
  0x73   :  { %3008 = vmatprep.subr.bf16.mxu1 %v3438_v55 }
  0x75   :  { %2923 = vmatpush1.bf16.msra.mxu0 %v3427_v41 }
  0x76   :  { %2924 = vmatprep.subr.bf16.mxu0 %v3432_v43  ;;  %3009 = vmatpush1.bf16.msra.mxu1 %v3437_v54 }
  0x77   :  { %3010 = vmatprep.subr.bf16.mxu1 %v3442_v63 }
  0x79   :  { %2925 = vmatpush1.bf16.msra.mxu0 %v3431_v50 }
  0x7a   :  { %2926 = vmatprep.subr.bf16.mxu0 %v3436_v52  ;;  %3011 = vmatpush1.bf16.msra.mxu1 %v3441_v62 }
  0x7b   :  { %3012 = vmatprep.subr.bf16.mxu1 %v3446_v8 }
  0x7d   :  { %2927 = vmatpush1.bf16.msra.mxu0 %v3435_v58 }
  0x7e   :  { %2928 = vmatprep.subr.bf16.mxu0 %v3440_v60  ;;  %3013 = vmatpush1.bf16.msra.mxu1 %v3445_v7 }
  0x7f   :  { %3014 = vmatprep.subr.bf16.mxu1 %v3450_v16 }
  0x81   :  { %2929 = vmatpush1.bf16.msra.mxu0 %v3439_v3 }
  0x82   :  { %2930 = vmatprep.subr.bf16.mxu0 %v3444_v5  ;;  %3015 = vmatpush1.bf16.msra.mxu1 %v3449_v15 }
  0x85   :  { %2931 = vmatpush1.bf16.msra.mxu0 %v3443_v11  ;;  %3017 = vmatmul.mubr.bf16.vlgmr.msra.gmra.mrb[0].mxu1 %v2215_v18 }
  0x86   :  { %2932 = vmatprep.subr.bf16.mxu0 %v3448_v14 }
  0x89   :  { %2933 = vmatpush1.bf16.msra.mxu0 %v3447_v17 }
  0x8c   :  { %2935 = vmatmul.mubr.bf16.vlgmr.msra.gmra.mrb[0].mxu0 %v2215_v18 }
 0x158   :  { %v3018_v20 = vpop.f32.mrb[0].mxu1 }
 0x159   :  { %v4215_v21 = vadd.f32 %v3018_v20, %v2191_v19  ;;  %v3020_v22 = vpop.f32.mrb[1].mxu1 }
 0x15a   :  { %v4216_v23 = vadd.f32 %v3020_v22, %v2191_v19  ;;  %v3022_v24 = vpop.f32.mrb[2].mxu1 }
 0x15b   :  { %4479 = vtanh.f32 %v4215_v21  ;;  %v3023_v26 = vpop.f32.mrb[3].mxu1 }
 0x15c   :  { %4481 = vtanh.f32 %v4216_v23 }
 0x15f   :  { %v2936_v25 = vpop.f32.mrb[0].mxu0 }
 0x160   :  { %v4213_v27 = vadd.f32 %v2936_v25, %v2191_v19  ;;  %v2938_v28 = vpop.f32.mrb[1].mxu0 }
 0x161   :  { %v4214_v12 = vadd.f32 %v2938_v28, %v2191_v19  ;;  %v2940_v29 = vpop.f32.mrb[2].mxu0 }
 0x162   :  { %4483 = vtanh.f32 %v4213_v27  ;;  %v2941_v30 = vpop.f32.mrb[3].mxu0 }
 0x163   :  { %4485 = vtanh.f32 %v4214_v12 }
 0x165   :  { %v4480_v31 = vpop.eup %4479 }
 0x166   :  { %v4482_v32 = vpop.eup %4481 }
 0x167   :  { %v3034_v33 = vcombine.low %v4480_v31, %v4482_v32 }
 0x169   :  { %v3048_v38 = vrot.slane %v3034_v33, %v4701_v1 }
 0x16c   :  { %v4484_v34 = vpop.eup %4483 }
 0x16d   :  { %v4486_v35 = vpop.eup %4485 }
 0x16e   :  { %v3033_v36 = vcombine.low %v4484_v34, %v4486_v35 }
 0x170   :  { %v3041_v37 = vrot.slane %v3033_v36, %v4701_v1 }
 0x172   :  { %v3049_v39 = vcombine.low %v3041_v37, %v3048_v38 }
 0x174   :  { %v3056_v40 = vrot.slane %v3049_v39, %v4701_v1 }
 0x176   :  { %3062 = vst.msk [vmem:[%s4919_s3] sm:$0xf] %vm3060_vm0, %v3056_v40 }

</bundles_post_ra>
